<compile_context>
chip_gen: v5e
topology: v5e:2x2
jax: 0.10.0
libtpu: 0.0.40
codegen_flags: <defaults>
</compile_context>

<pallas_src>
import functools
import math

import jax
import jax.numpy as jnp
import numpy as np
from jax.experimental import pallas as pl
from jax.experimental.pallas import tpu as pltpu


# ----------------------------- fused Pallas kernel ---------------------------

def _fused_dqn_kernel(p1_ref, w1_ref, b1_ref,
                      g2_ref, w2_ref, b2_ref,
                      g3_ref, w3_ref, b3_ref,
                      sf_ref, wf_ref, bf_ref,
                      wva_ref, bva_ref,
                      o_ref, *, n_actions):
    f32 = jnp.float32

    # --- conv1: wrapper-built im2col patches @ reshaped weight, bias, ReLU ---
    a1 = jnp.dot(p1_ref[...], w1_ref[...], preferred_element_type=f32) + b1_ref[...]
    a1 = jnp.maximum(a1, 0.0)                              # (B*H1*W1, C1)

    # --- conv2: sum over kernel offsets of (row-gather matmul) @ W_offset ---
    acc2 = None
    for t in range(g2_ref.shape[0]):
        rows = jnp.dot(g2_ref[t], a1, preferred_element_type=f32)     # (B*H2*W2, C1)
        part = jnp.dot(rows, w2_ref[t], preferred_element_type=f32)   # (B*H2*W2, C2)
        acc2 = part if acc2 is None else acc2 + part
    a2 = jnp.maximum(acc2 + b2_ref[...], 0.0)              # (B*H2*W2, C2)

    # --- conv3 (same pattern, stride 1) ---
    acc3 = None
    for t in range(g3_ref.shape[0]):
        rows = jnp.dot(g3_ref[t], a2, preferred_element_type=f32)
        part = jnp.dot(rows, w3_ref[t], preferred_element_type=f32)
        acc3 = part if acc3 is None else acc3 + part
    a3 = jnp.maximum(acc3 + b3_ref[...], 0.0)              # (B*H3*W3, C3)

    # --- fc: flatten folded as a sum over spatial positions; the fc weight
    #     rows were pre-permuted to channel-last so this matches PyTorch's
    #     NCHW flatten order exactly ---
    accf = None
    for p in range(sf_ref.shape[0]):
        rows = jnp.dot(sf_ref[p], a3, preferred_element_type=f32)     # (B, C3)
        part = jnp.dot(rows, wf_ref[p], preferred_element_type=f32)   # (B, hidden)
        accf = part if accf is None else accf + part
    f = jnp.maximum(accf + bf_ref[...], 0.0)               # (B, hidden)

    # --- dueling head: merged value/advantage matmul, split in-register ---
    va = jnp.dot(f, wva_ref[...], preferred_element_type=f32) + bva_ref[...]  # (B, 1+A)
    v = va[:, 0:1]
    a = va[:, 1:1 + n_actions]
    o_ref[...] = v + (a - jnp.mean(a, axis=-1, keepdims=True))


def _full_spec(arr):
    nd = arr.ndim
    return pl.BlockSpec(arr.shape, lambda i, _nd=nd: (0,) * _nd)


# ----------------------------- conv1 im2col (wrapper) ------------------------

def im2col(x_nchw, kh, kw, stride):
    B, C, H, W = x_nchw.shape
    Ho = (H - kh) // stride + 1
    Wo = (W - kw) // stride + 1
    cols = []
    for i in range(kh):
        for j in range(kw):
            cols.append(
                x_nchw[:, :, i:i + stride * Ho:stride, j:j + stride * Wo:stride]
            )  # (B, C, Ho, Wo)
    p = jnp.stack(cols, axis=0).reshape(kh, kw, B, C, Ho, Wo)
    # rows ordered (B, Ho, Wo); cols ordered (C, kh, kw) to match PyTorch OIHW
    p = p.transpose(2, 4, 5, 3, 0, 1).reshape(B * Ho * Wo, C * kh * kw)
    return p, Ho, Wo


# ----------------------------- constant gather matrices ----------------------

def _conv_gather(batch, h_in, w_in, h_out, w_out, kh, kw, stride):
    """One 0/1 row-selection matrix per kernel offset t = i*kw + j."""
    g = np.zeros((kh * kw, batch * h_out * w_out, batch * h_in * w_in), np.float32)
    for i in range(kh):
        for j in range(kw):
            t = i * kw + j
            for b in range(batch):
                for ho in range(h_out):
                    for wo in range(w_out):
                        r = b * h_out * w_out + ho * w_out + wo
                        c = b * h_in * w_in + (ho * stride + i) * w_in + (wo * stride + j)
                        g[t, r, c] = 1.0
    return g


def _flatten_gather(batch, hw):
    """S[p, b, b*hw + p] = 1 — selects spatial position p of every batch image."""
    s = np.zeros((hw, batch, batch * hw), np.float32)
    for p in range(hw):
        for b in range(batch):
            s[p, b, b * hw + p] = 1.0
    return s


# ----------------------------- model params ---------------------------------

def init_params(key, in_ch, img_size, channels, kernel_sizes, strides,
                hidden_dim, out_features):
    keys = jax.random.split(key, 2 * len(channels) + 6)
    ki = 0
    convs = []
    prev, sz = in_ch, img_size
    for ch, ks, sd in zip(channels, kernel_sizes, strides):
        bound = 1.0 / math.sqrt(prev * ks * ks)
        w = jax.random.uniform(keys[ki], (ch, prev, ks, ks), jnp.float32, -bound, bound)
        b = jax.random.uniform(keys[ki + 1], (ch,), jnp.float32, -bound, bound)
        ki += 2
        convs.append((w, b, sd))
        prev, sz = ch, (sz - ks) // sd + 1
    fc_size = prev * sz * sz

    def lin(k1, k2, fin, fout):
        bound = 1.0 / math.sqrt(fin)
        return (jax.random.uniform(k1, (fin, fout), jnp.float32, -bound, bound),
                jax.random.uniform(k2, (fout,), jnp.float32, -bound, bound))

    params = {
        "convs": convs,
        "fc": lin(keys[ki], keys[ki + 1], fc_size, hidden_dim),
        "value": lin(keys[ki + 2], keys[ki + 3], hidden_dim, 1),
        "advantage": lin(keys[ki + 4], keys[ki + 5], hidden_dim, out_features),
    }
    return params, fc_size


def prepare_kernel_params(params, batch, img_size):
    """One-time weight/layout prep for the fused kernel (like a checkpoint load)."""
    convs = params["convs"]
    assert len(convs) == 3, "fused kernel is specialized to the 3-conv DuelingDQN"
    sizes = [img_size]
    for (w, _, sd) in convs:
        ks = w.shape[2]
        sizes.append((sizes[-1] - ks) // sd + 1)

    (w1, b1, s1), (w2, b2, s2), (w3, b3, s3) = convs
    c1, cin1, k1, _ = w1.shape
    c2, cin2, k2, _ = w2.shape
    c3, cin3, k3, _ = w3.shape

    kp = {"batch": batch, "k1": k1, "s1": s1}

    kp["w1"] = jnp.asarray(w1).reshape(c1, cin1 * k1 * k1).T            # (cin*k*k, c1)
    kp["b1"] = jnp.asarray(b1).reshape(1, c1)

    kp["g2"] = jnp.asarray(_conv_gather(batch, sizes[1], sizes[1],
                                        sizes[2], sizes[2], k2, k2, s2))
    kp["w2"] = jnp.transpose(jnp.asarray(w2), (2, 3, 1, 0)).reshape(k2 * k2, cin2, c2)
    kp["b2"] = jnp.asarray(b2).reshape(1, c2)

    kp["g3"] = jnp.asarray(_conv_gather(batch, sizes[2], sizes[2],
                                        sizes[3], sizes[3], k3, k3, s3))
    kp["w3"] = jnp.transpose(jnp.asarray(w3), (2, 3, 1, 0)).reshape(k3 * k3, cin3, c3)
    kp["b3"] = jnp.asarray(b3).reshape(1, c3)

    wf, bf = params["fc"]
    hidden = wf.shape[1]
    hw = sizes[3] * sizes[3]
    # fc weight rows are in PyTorch (C, H, W) flatten order; kernel activations
    # are channel-last (rows = (b, h, w), cols = C). Permute rows once here.
    kp["wf"] = jnp.asarray(wf).reshape(c3, hw, hidden).transpose(1, 0, 2)   # (hw, C3, hidden)
    kp["bf"] = jnp.asarray(bf).reshape(1, hidden)
    kp["sf"] = jnp.asarray(_flatten_gather(batch, hw))

    wv, bv = params["value"]
    wa, ba = params["advantage"]
    kp["n_actions"] = wa.shape[1]
    kp["wva"] = jnp.concatenate([wv, wa], axis=1)                       # (hidden, 1+A)
    kp["bva"] = jnp.concatenate([bv, ba]).reshape(1, 1 + wa.shape[1])
    return kp


# ----------------------------- forward ---------------------------------------

def dueling_dqn_forward(kp, x):
    """Fused DuelingDQN forward. x: (B, C_in, H, W) NCHW float32."""
    B = x.shape[0]
    assert B == kp["batch"]
    A = kp["n_actions"]

    # conv1 patch extraction on the raw input (plain-XLA glue, one-time).
    patches1, _, _ = im2col(x, kp["k1"], kp["k1"], kp["s1"])    # (B*H1*W1, Cin*k*k)

    ins = [patches1, kp["w1"], kp["b1"],
           kp["g2"], kp["w2"], kp["b2"],
           kp["g3"], kp["w3"], kp["b3"],
           kp["sf"], kp["wf"], kp["bf"],
           kp["wva"], kp["bva"]]

    kernel = functools.partial(_fused_dqn_kernel, n_actions=A)
    return pl.pallas_call(
        kernel,
        grid=(1,),
        out_shape=jax.ShapeDtypeStruct((B, A), jnp.float32),
        in_specs=[_full_spec(a) for a in ins],
        out_specs=pl.BlockSpec((B, A), lambda i: (0, 0)),
        compiler_params=pltpu.CompilerParams(
            dimension_semantics=("arbitrary",)),
    )(*ins)


def reference_forward(params, x):
    for (w, b, sd) in params["convs"]:
        x = jax.lax.conv_general_dilated(
            x, w, (sd, sd), "VALID", dimension_numbers=("NCHW", "OIHW", "NCHW"))
        x = jax.nn.relu(x + b[None, :, None, None])
    B = x.shape[0]
    f = x.reshape(B, -1)
    wf, bf = params["fc"]
    f = jax.nn.relu(f @ wf + bf)
    wv, bv = params["value"]
    wa, ba = params["advantage"]
    vs = f @ wv + bv
    a = f @ wa + ba
    return vs + (a - jnp.mean(a, -1, keepdims=True))


# TODO(synk): check_point/load_checkpoint (torch file I/O) and the noised=True
# NoisedLinear training-time epsilon resampling are not part of this synthetic
# forward pass (default noised=False / eval semantics are what is implemented).
# TODO(synk): conv1's im2col stays as wrapper-side XLA on the raw input; moving
# it in-kernel would require strided in-kernel slicing with no measurable win
# at these shapes.

if __name__ == "__main__":
    key = jax.random.PRNGKey(0)
    B = 2
    input_channels, n_repeats = 1, 4       # -> 4 stacked input channels
    img_size = 44                          # 44 -> 10 -> 4 -> 2 spatial
    channels = [16, 32, 32]
    kernel_sizes = [8, 4, 3]
    strides = [4, 2, 1]
    hidden_dim = 128
    out_features = 6

    in_ch = input_channels * n_repeats
    pkey, xkey = jax.random.split(key)
    params, fc_size = init_params(pkey, in_ch, img_size, channels, kernel_sizes,
                                  strides, hidden_dim, out_features)
    x = jax.random.normal(xkey, (B, in_ch, img_size, img_size), jnp.float32)

    kp = prepare_kernel_params(params, B, img_size)

    q = jax.block_until_ready(dueling_dqn_forward(kp, x))
    q_ref = jax.block_until_ready(reference_forward(params, x))

    assert q.shape == (B, out_features)
    np.testing.assert_allclose(np.asarray(q), np.asarray(q_ref), rtol=2e-2, atol=2e-2)
    print("KERNEL_OK")
</pallas_src>

<mosaic_0001>
module attributes {stable_mosaic.version = 11 : i64} {
  func.func @_fused_dqn_kernel(%arg0: i32, %arg1: memref<200x256xf32, #tpu.memory_space<vmem>>, %arg2: memref<256x16xf32, #tpu.memory_space<vmem>>, %arg3: memref<1x16xf32, #tpu.memory_space<vmem>>, %arg4: memref<16x32x200xf32, #tpu.memory_space<vmem>>, %arg5: memref<16x16x32xf32, #tpu.memory_space<vmem>>, %arg6: memref<1x32xf32, #tpu.memory_space<vmem>>, %arg7: memref<9x8x32xf32, #tpu.memory_space<vmem>>, %arg8: memref<9x32x32xf32, #tpu.memory_space<vmem>>, %arg9: memref<1x32xf32, #tpu.memory_space<vmem>>, %arg10: memref<4x2x8xf32, #tpu.memory_space<vmem>>, %arg11: memref<4x32x128xf32, #tpu.memory_space<vmem>>, %arg12: memref<1x128xf32, #tpu.memory_space<vmem>>, %arg13: memref<128x7xf32, #tpu.memory_space<vmem>>, %arg14: memref<1x7xf32, #tpu.memory_space<vmem>>, %arg15: memref<2x6xf32, #tpu.memory_space<vmem>>) attributes {dimension_semantics = [#tpu.dimension_semantics<arbitrary>], iteration_bounds = array<i64: 1>, scalar_prefetch = 0 : i64, scratch_operands = 0 : i64, tpu.core_type = #tpu.core_type<tc>, window_params = [{pipeline_mode = #tpu.pipeline_mode<synchronous>, transform_indices = @transform_0, window_bounds = array<i64: 200, 256>}, {pipeline_mode = #tpu.pipeline_mode<synchronous>, transform_indices = @transform_1, window_bounds = array<i64: 256, 16>}, {pipeline_mode = #tpu.pipeline_mode<synchronous>, transform_indices = @transform_2, window_bounds = array<i64: 1, 16>}, {pipeline_mode = #tpu.pipeline_mode<synchronous>, transform_indices = @transform_3, window_bounds = array<i64: 16, 32, 200>}, {pipeline_mode = #tpu.pipeline_mode<synchronous>, transform_indices = @transform_4, window_bounds = array<i64: 16, 16, 32>}, {pipeline_mode = #tpu.pipeline_mode<synchronous>, transform_indices = @transform_5, window_bounds = array<i64: 1, 32>}, {pipeline_mode = #tpu.pipeline_mode<synchronous>, transform_indices = @transform_6, window_bounds = array<i64: 9, 8, 32>}, {pipeline_mode = #tpu.pipeline_mode<synchronous>, transform_indices = @transform_7, window_bounds = array<i64: 9, 32, 32>}, {pipeline_mode = #tpu.pipeline_mode<synchronous>, transform_indices = @transform_8, window_bounds = array<i64: 1, 32>}, {pipeline_mode = #tpu.pipeline_mode<synchronous>, transform_indices = @transform_9, window_bounds = array<i64: 4, 2, 8>}, {pipeline_mode = #tpu.pipeline_mode<synchronous>, transform_indices = @transform_10, window_bounds = array<i64: 4, 32, 128>}, {pipeline_mode = #tpu.pipeline_mode<synchronous>, transform_indices = @transform_11, window_bounds = array<i64: 1, 128>}, {pipeline_mode = #tpu.pipeline_mode<synchronous>, transform_indices = @transform_12, window_bounds = array<i64: 128, 7>}, {pipeline_mode = #tpu.pipeline_mode<synchronous>, transform_indices = @transform_13, window_bounds = array<i64: 1, 7>}, {pipeline_mode = #tpu.pipeline_mode<synchronous>, transform_indices = @transform_14, window_bounds = array<i64: 2, 6>}]} {
    %c0 = arith.constant 0 : index
    %c0_0 = arith.constant 0 : index
    %0 = vector.load %arg1[%c0, %c0_0] : memref<200x256xf32, #tpu.memory_space<vmem>>, vector<200x256xf32>
    %c0_1 = arith.constant 0 : index
    %c0_2 = arith.constant 0 : index
    %1 = vector.load %arg2[%c0_1, %c0_2] : memref<256x16xf32, #tpu.memory_space<vmem>>, vector<256x16xf32>
    %cst = arith.constant dense<0.000000e+00> : vector<200x16xf32>
    %2 = tpu.matmul %0, %1, %cst {dimension_numbers = #tpu.dot_dimension_numbers<[1], [0], [0], [1], [0, 0, 1, 1], [], []>} : vector<200x256xf32>, vector<256x16xf32>, vector<200x16xf32> -> vector<200x16xf32>
    %c0_3 = arith.constant 0 : index
    %c0_4 = arith.constant 0 : index
    %3 = vector.load %arg3[%c0_3, %c0_4] : memref<1x16xf32, #tpu.memory_space<vmem>>, vector<1x16xf32>
    %4 = vector.broadcast %3 : vector<1x16xf32> to vector<200x16xf32>
    %5 = arith.addf %2, %4 : vector<200x16xf32>
    %cst_5 = arith.constant 0.000000e+00 : f32
    %6 = vector.broadcast %cst_5 : f32 to vector<200x16xf32>
    %7 = arith.maximumf %5, %6 : vector<200x16xf32>
    %c0_6 = arith.constant 0 : index
    %c0_7 = arith.constant 0 : index
    %c0_8 = arith.constant 0 : index
    %8 = vector.load %arg4[%c0_6, %c0_7, %c0_8] : memref<16x32x200xf32, #tpu.memory_space<vmem>>, vector<1x32x200xf32>
    %9 = vector.shape_cast %8 : vector<1x32x200xf32> to vector<32x200xf32>
    %cst_9 = arith.constant dense<0.000000e+00> : vector<32x16xf32>
    %10 = tpu.matmul %9, %7, %cst_9 {dimension_numbers = #tpu.dot_dimension_numbers<[1], [0], [0], [1], [0, 0, 1, 1], [], []>} : vector<32x200xf32>, vector<200x16xf32>, vector<32x16xf32> -> vector<32x16xf32>
    %c0_10 = arith.constant 0 : index
    %c0_11 = arith.constant 0 : index
    %c0_12 = arith.constant 0 : index
    %11 = vector.load %arg5[%c0_10, %c0_11, %c0_12] : memref<16x16x32xf32, #tpu.memory_space<vmem>>, vector<1x16x32xf32>
    %12 = vector.shape_cast %11 : vector<1x16x32xf32> to vector<16x32xf32>
    %cst_13 = arith.constant dense<0.000000e+00> : vector<32x32xf32>
    %13 = tpu.matmul %10, %12, %cst_13 {dimension_numbers = #tpu.dot_dimension_numbers<[1], [0], [0], [1], [0, 0, 1, 1], [], []>} : vector<32x16xf32>, vector<16x32xf32>, vector<32x32xf32> -> vector<32x32xf32>
    %c1 = arith.constant 1 : index
    %c0_14 = arith.constant 0 : index
    %c0_15 = arith.constant 0 : index
    %14 = vector.load %arg4[%c1, %c0_14, %c0_15] : memref<16x32x200xf32, #tpu.memory_space<vmem>>, vector<1x32x200xf32>
    %15 = vector.shape_cast %14 : vector<1x32x200xf32> to vector<32x200xf32>
    %cst_16 = arith.constant dense<0.000000e+00> : vector<32x16xf32>
    %16 = tpu.matmul %15, %7, %cst_16 {dimension_numbers = #tpu.dot_dimension_numbers<[1], [0], [0], [1], [0, 0, 1, 1], [], []>} : vector<32x200xf32>, vector<200x16xf32>, vector<32x16xf32> -> vector<32x16xf32>
    %c1_17 = arith.constant 1 : index
    %c0_18 = arith.constant 0 : index
    %c0_19 = arith.constant 0 : index
    %17 = vector.load %arg5[%c1_17, %c0_18, %c0_19] : memref<16x16x32xf32, #tpu.memory_space<vmem>>, vector<1x16x32xf32>
    %18 = vector.shape_cast %17 : vector<1x16x32xf32> to vector<16x32xf32>
    %cst_20 = arith.constant dense<0.000000e+00> : vector<32x32xf32>
    %19 = tpu.matmul %16, %18, %cst_20 {dimension_numbers = #tpu.dot_dimension_numbers<[1], [0], [0], [1], [0, 0, 1, 1], [], []>} : vector<32x16xf32>, vector<16x32xf32>, vector<32x32xf32> -> vector<32x32xf32>
    %20 = arith.addf %13, %19 : vector<32x32xf32>
    %c2 = arith.constant 2 : index
    %c0_21 = arith.constant 0 : index
    %c0_22 = arith.constant 0 : index
    %21 = vector.load %arg4[%c2, %c0_21, %c0_22] : memref<16x32x200xf32, #tpu.memory_space<vmem>>, vector<1x32x200xf32>
    %22 = vector.shape_cast %21 : vector<1x32x200xf32> to vector<32x200xf32>
    %cst_23 = arith.constant dense<0.000000e+00> : vector<32x16xf32>
    %23 = tpu.matmul %22, %7, %cst_23 {dimension_numbers = #tpu.dot_dimension_numbers<[1], [0], [0], [1], [0, 0, 1, 1], [], []>} : vector<32x200xf32>, vector<200x16xf32>, vector<32x16xf32> -> vector<32x16xf32>
    %c2_24 = arith.constant 2 : index
    %c0_25 = arith.constant 0 : index
    %c0_26 = arith.constant 0 : index
    %24 = vector.load %arg5[%c2_24, %c0_25, %c0_26] : memref<16x16x32xf32, #tpu.memory_space<vmem>>, vector<1x16x32xf32>
    %25 = vector.shape_cast %24 : vector<1x16x32xf32> to vector<16x32xf32>
    %cst_27 = arith.constant dense<0.000000e+00> : vector<32x32xf32>
    %26 = tpu.matmul %23, %25, %cst_27 {dimension_numbers = #tpu.dot_dimension_numbers<[1], [0], [0], [1], [0, 0, 1, 1], [], []>} : vector<32x16xf32>, vector<16x32xf32>, vector<32x32xf32> -> vector<32x32xf32>
    %27 = arith.addf %20, %26 : vector<32x32xf32>
    %c3 = arith.constant 3 : index
    %c0_28 = arith.constant 0 : index
    %c0_29 = arith.constant 0 : index
    %28 = vector.load %arg4[%c3, %c0_28, %c0_29] : memref<16x32x200xf32, #tpu.memory_space<vmem>>, vector<1x32x200xf32>
    %29 = vector.shape_cast %28 : vector<1x32x200xf32> to vector<32x200xf32>
    %cst_30 = arith.constant dense<0.000000e+00> : vector<32x16xf32>
    %30 = tpu.matmul %29, %7, %cst_30 {dimension_numbers = #tpu.dot_dimension_numbers<[1], [0], [0], [1], [0, 0, 1, 1], [], []>} : vector<32x200xf32>, vector<200x16xf32>, vector<32x16xf32> -> vector<32x16xf32>
    %c3_31 = arith.constant 3 : index
    %c0_32 = arith.constant 0 : index
    %c0_33 = arith.constant 0 : index
    %31 = vector.load %arg5[%c3_31, %c0_32, %c0_33] : memref<16x16x32xf32, #tpu.memory_space<vmem>>, vector<1x16x32xf32>
    %32 = vector.shape_cast %31 : vector<1x16x32xf32> to vector<16x32xf32>
    %cst_34 = arith.constant dense<0.000000e+00> : vector<32x32xf32>
    %33 = tpu.matmul %30, %32, %cst_34 {dimension_numbers = #tpu.dot_dimension_numbers<[1], [0], [0], [1], [0, 0, 1, 1], [], []>} : vector<32x16xf32>, vector<16x32xf32>, vector<32x32xf32> -> vector<32x32xf32>
    %34 = arith.addf %27, %33 : vector<32x32xf32>
    %c4 = arith.constant 4 : index
    %c0_35 = arith.constant 0 : index
    %c0_36 = arith.constant 0 : index
    %35 = vector.load %arg4[%c4, %c0_35, %c0_36] : memref<16x32x200xf32, #tpu.memory_space<vmem>>, vector<1x32x200xf32>
    %36 = vector.shape_cast %35 : vector<1x32x200xf32> to vector<32x200xf32>
    %cst_37 = arith.constant dense<0.000000e+00> : vector<32x16xf32>
    %37 = tpu.matmul %36, %7, %cst_37 {dimension_numbers = #tpu.dot_dimension_numbers<[1], [0], [0], [1], [0, 0, 1, 1], [], []>} : vector<32x200xf32>, vector<200x16xf32>, vector<32x16xf32> -> vector<32x16xf32>
    %c4_38 = arith.constant 4 : index
    %c0_39 = arith.constant 0 : index
    %c0_40 = arith.constant 0 : index
    %38 = vector.load %arg5[%c4_38, %c0_39, %c0_40] : memref<16x16x32xf32, #tpu.memory_space<vmem>>, vector<1x16x32xf32>
    %39 = vector.shape_cast %38 : vector<1x16x32xf32> to vector<16x32xf32>
    %cst_41 = arith.constant dense<0.000000e+00> : vector<32x32xf32>
    %40 = tpu.matmul %37, %39, %cst_41 {dimension_numbers = #tpu.dot_dimension_numbers<[1], [0], [0], [1], [0, 0, 1, 1], [], []>} : vector<32x16xf32>, vector<16x32xf32>, vector<32x32xf32> -> vector<32x32xf32>
    %41 = arith.addf %34, %40 : vector<32x32xf32>
    %c5 = arith.constant 5 : index
    %c0_42 = arith.constant 0 : index
    %c0_43 = arith.constant 0 : index
    %42 = vector.load %arg4[%c5, %c0_42, %c0_43] : memref<16x32x200xf32, #tpu.memory_space<vmem>>, vector<1x32x200xf32>
    %43 = vector.shape_cast %42 : vector<1x32x200xf32> to vector<32x200xf32>
    %cst_44 = arith.constant dense<0.000000e+00> : vector<32x16xf32>
    %44 = tpu.matmul %43, %7, %cst_44 {dimension_numbers = #tpu.dot_dimension_numbers<[1], [0], [0], [1], [0, 0, 1, 1], [], []>} : vector<32x200xf32>, vector<200x16xf32>, vector<32x16xf32> -> vector<32x16xf32>
    %c5_45 = arith.constant 5 : index
    %c0_46 = arith.constant 0 : index
    %c0_47 = arith.constant 0 : index
    %45 = vector.load %arg5[%c5_45, %c0_46, %c0_47] : memref<16x16x32xf32, #tpu.memory_space<vmem>>, vector<1x16x32xf32>
    %46 = vector.shape_cast %45 : vector<1x16x32xf32> to vector<16x32xf32>
    %cst_48 = arith.constant dense<0.000000e+00> : vector<32x32xf32>
    %47 = tpu.matmul %44, %46, %cst_48 {dimension_numbers = #tpu.dot_dimension_numbers<[1], [0], [0], [1], [0, 0, 1, 1], [], []>} : vector<32x16xf32>, vector<16x32xf32>, vector<32x32xf32> -> vector<32x32xf32>
    %48 = arith.addf %41, %47 : vector<32x32xf32>
    %c6 = arith.constant 6 : index
    %c0_49 = arith.constant 0 : index
    %c0_50 = arith.constant 0 : index
    %49 = vector.load %arg4[%c6, %c0_49, %c0_50] : memref<16x32x200xf32, #tpu.memory_space<vmem>>, vector<1x32x200xf32>
    %50 = vector.shape_cast %49 : vector<1x32x200xf32> to vector<32x200xf32>
    %cst_51 = arith.constant dense<0.000000e+00> : vector<32x16xf32>
    %51 = tpu.matmul %50, %7, %cst_51 {dimension_numbers = #tpu.dot_dimension_numbers<[1], [0], [0], [1], [0, 0, 1, 1], [], []>} : vector<32x200xf32>, vector<200x16xf32>, vector<32x16xf32> -> vector<32x16xf32>
    %c6_52 = arith.constant 6 : index
    %c0_53 = arith.constant 0 : index
    %c0_54 = arith.constant 0 : index
    %52 = vector.load %arg5[%c6_52, %c0_53, %c0_54] : memref<16x16x32xf32, #tpu.memory_space<vmem>>, vector<1x16x32xf32>
    %53 = vector.shape_cast %52 : vector<1x16x32xf32> to vector<16x32xf32>
    %cst_55 = arith.constant dense<0.000000e+00> : vector<32x32xf32>
    %54 = tpu.matmul %51, %53, %cst_55 {dimension_numbers = #tpu.dot_dimension_numbers<[1], [0], [0], [1], [0, 0, 1, 1], [], []>} : vector<32x16xf32>, vector<16x32xf32>, vector<32x32xf32> -> vector<32x32xf32>
    %55 = arith.addf %48, %54 : vector<32x32xf32>
    %c7 = arith.constant 7 : index
    %c0_56 = arith.constant 0 : index
    %c0_57 = arith.constant 0 : index
    %56 = vector.load %arg4[%c7, %c0_56, %c0_57] : memref<16x32x200xf32, #tpu.memory_space<vmem>>, vector<1x32x200xf32>
    %57 = vector.shape_cast %56 : vector<1x32x200xf32> to vector<32x200xf32>
    %cst_58 = arith.constant dense<0.000000e+00> : vector<32x16xf32>
    %58 = tpu.matmul %57, %7, %cst_58 {dimension_numbers = #tpu.dot_dimension_numbers<[1], [0], [0], [1], [0, 0, 1, 1], [], []>} : vector<32x200xf32>, vector<200x16xf32>, vector<32x16xf32> -> vector<32x16xf32>
    %c7_59 = arith.constant 7 : index
    %c0_60 = arith.constant 0 : index
    %c0_61 = arith.constant 0 : index
    %59 = vector.load %arg5[%c7_59, %c0_60, %c0_61] : memref<16x16x32xf32, #tpu.memory_space<vmem>>, vector<1x16x32xf32>
    %60 = vector.shape_cast %59 : vector<1x16x32xf32> to vector<16x32xf32>
    %cst_62 = arith.constant dense<0.000000e+00> : vector<32x32xf32>
    %61 = tpu.matmul %58, %60, %cst_62 {dimension_numbers = #tpu.dot_dimension_numbers<[1], [0], [0], [1], [0, 0, 1, 1], [], []>} : vector<32x16xf32>, vector<16x32xf32>, vector<32x32xf32> -> vector<32x32xf32>
    %62 = arith.addf %55, %61 : vector<32x32xf32>
    %c8 = arith.constant 8 : index
    %c0_63 = arith.constant 0 : index
    %c0_64 = arith.constant 0 : index
    %63 = vector.load %arg4[%c8, %c0_63, %c0_64] : memref<16x32x200xf32, #tpu.memory_space<vmem>>, vector<1x32x200xf32>
    %64 = vector.shape_cast %63 : vector<1x32x200xf32> to vector<32x200xf32>
    %cst_65 = arith.constant dense<0.000000e+00> : vector<32x16xf32>
    %65 = tpu.matmul %64, %7, %cst_65 {dimension_numbers = #tpu.dot_dimension_numbers<[1], [0], [0], [1], [0, 0, 1, 1], [], []>} : vector<32x200xf32>, vector<200x16xf32>, vector<32x16xf32> -> vector<32x16xf32>
    %c8_66 = arith.constant 8 : index
    %c0_67 = arith.constant 0 : index
    %c0_68 = arith.constant 0 : index
    %66 = vector.load %arg5[%c8_66, %c0_67, %c0_68] : memref<16x16x32xf32, #tpu.memory_space<vmem>>, vector<1x16x32xf32>
    %67 = vector.shape_cast %66 : vector<1x16x32xf32> to vector<16x32xf32>
    %cst_69 = arith.constant dense<0.000000e+00> : vector<32x32xf32>
    %68 = tpu.matmul %65, %67, %cst_69 {dimension_numbers = #tpu.dot_dimension_numbers<[1], [0], [0], [1], [0, 0, 1, 1], [], []>} : vector<32x16xf32>, vector<16x32xf32>, vector<32x32xf32> -> vector<32x32xf32>
    %69 = arith.addf %62, %68 : vector<32x32xf32>
    %c9 = arith.constant 9 : index
    %c0_70 = arith.constant 0 : index
    %c0_71 = arith.constant 0 : index
    %70 = vector.load %arg4[%c9, %c0_70, %c0_71] : memref<16x32x200xf32, #tpu.memory_space<vmem>>, vector<1x32x200xf32>
    %71 = vector.shape_cast %70 : vector<1x32x200xf32> to vector<32x200xf32>
    %cst_72 = arith.constant dense<0.000000e+00> : vector<32x16xf32>
    %72 = tpu.matmul %71, %7, %cst_72 {dimension_numbers = #tpu.dot_dimension_numbers<[1], [0], [0], [1], [0, 0, 1, 1], [], []>} : vector<32x200xf32>, vector<200x16xf32>, vector<32x16xf32> -> vector<32x16xf32>
    %c9_73 = arith.constant 9 : index
    %c0_74 = arith.constant 0 : index
    %c0_75 = arith.constant 0 : index
    %73 = vector.load %arg5[%c9_73, %c0_74, %c0_75] : memref<16x16x32xf32, #tpu.memory_space<vmem>>, vector<1x16x32xf32>
    %74 = vector.shape_cast %73 : vector<1x16x32xf32> to vector<16x32xf32>
    %cst_76 = arith.constant dense<0.000000e+00> : vector<32x32xf32>
    %75 = tpu.matmul %72, %74, %cst_76 {dimension_numbers = #tpu.dot_dimension_numbers<[1], [0], [0], [1], [0, 0, 1, 1], [], []>} : vector<32x16xf32>, vector<16x32xf32>, vector<32x32xf32> -> vector<32x32xf32>
    %76 = arith.addf %69, %75 : vector<32x32xf32>
    %c10 = arith.constant 10 : index
    %c0_77 = arith.constant 0 : index
    %c0_78 = arith.constant 0 : index
    %77 = vector.load %arg4[%c10, %c0_77, %c0_78] : memref<16x32x200xf32, #tpu.memory_space<vmem>>, vector<1x32x200xf32>
    %78 = vector.shape_cast %77 : vector<1x32x200xf32> to vector<32x200xf32>
    %cst_79 = arith.constant dense<0.000000e+00> : vector<32x16xf32>
    %79 = tpu.matmul %78, %7, %cst_79 {dimension_numbers = #tpu.dot_dimension_numbers<[1], [0], [0], [1], [0, 0, 1, 1], [], []>} : vector<32x200xf32>, vector<200x16xf32>, vector<32x16xf32> -> vector<32x16xf32>
    %c10_80 = arith.constant 10 : index
    %c0_81 = arith.constant 0 : index
    %c0_82 = arith.constant 0 : index
    %80 = vector.load %arg5[%c10_80, %c0_81, %c0_82] : memref<16x16x32xf32, #tpu.memory_space<vmem>>, vector<1x16x32xf32>
    %81 = vector.shape_cast %80 : vector<1x16x32xf32> to vector<16x32xf32>
    %cst_83 = arith.constant dense<0.000000e+00> : vector<32x32xf32>
    %82 = tpu.matmul %79, %81, %cst_83 {dimension_numbers = #tpu.dot_dimension_numbers<[1], [0], [0], [1], [0, 0, 1, 1], [], []>} : vector<32x16xf32>, vector<16x32xf32>, vector<32x32xf32> -> vector<32x32xf32>
    %83 = arith.addf %76, %82 : vector<32x32xf32>
    %c11 = arith.constant 11 : index
    %c0_84 = arith.constant 0 : index
    %c0_85 = arith.constant 0 : index
    %84 = vector.load %arg4[%c11, %c0_84, %c0_85] : memref<16x32x200xf32, #tpu.memory_space<vmem>>, vector<1x32x200xf32>
    %85 = vector.shape_cast %84 : vector<1x32x200xf32> to vector<32x200xf32>
    %cst_86 = arith.constant dense<0.000000e+00> : vector<32x16xf32>
    %86 = tpu.matmul %85, %7, %cst_86 {dimension_numbers = #tpu.dot_dimension_numbers<[1], [0], [0], [1], [0, 0, 1, 1], [], []>} : vector<32x200xf32>, vector<200x16xf32>, vector<32x16xf32> -> vector<32x16xf32>
    %c11_87 = arith.constant 11 : index
    %c0_88 = arith.constant 0 : index
    %c0_89 = arith.constant 0 : index
    %87 = vector.load %arg5[%c11_87, %c0_88, %c0_89] : memref<16x16x32xf32, #tpu.memory_space<vmem>>, vector<1x16x32xf32>
    %88 = vector.shape_cast %87 : vector<1x16x32xf32> to vector<16x32xf32>
    %cst_90 = arith.constant dense<0.000000e+00> : vector<32x32xf32>
    %89 = tpu.matmul %86, %88, %cst_90 {dimension_numbers = #tpu.dot_dimension_numbers<[1], [0], [0], [1], [0, 0, 1, 1], [], []>} : vector<32x16xf32>, vector<16x32xf32>, vector<32x32xf32> -> vector<32x32xf32>
    %90 = arith.addf %83, %89 : vector<32x32xf32>
    %c12 = arith.constant 12 : index
    %c0_91 = arith.constant 0 : index
    %c0_92 = arith.constant 0 : index
    %91 = vector.load %arg4[%c12, %c0_91, %c0_92] : memref<16x32x200xf32, #tpu.memory_space<vmem>>, vector<1x32x200xf32>
    %92 = vector.shape_cast %91 : vector<1x32x200xf32> to vector<32x200xf32>
    %cst_93 = arith.constant dense<0.000000e+00> : vector<32x16xf32>
    %93 = tpu.matmul %92, %7, %cst_93 {dimension_numbers = #tpu.dot_dimension_numbers<[1], [0], [0], [1], [0, 0, 1, 1], [], []>} : vector<32x200xf32>, vector<200x16xf32>, vector<32x16xf32> -> vector<32x16xf32>
    %c12_94 = arith.constant 12 : index
    %c0_95 = arith.constant 0 : index
    %c0_96 = arith.constant 0 : index
    %94 = vector.load %arg5[%c12_94, %c0_95, %c0_96] : memref<16x16x32xf32, #tpu.memory_space<vmem>>, vector<1x16x32xf32>
    %95 = vector.shape_cast %94 : vector<1x16x32xf32> to vector<16x32xf32>
    %cst_97 = arith.constant dense<0.000000e+00> : vector<32x32xf32>
    %96 = tpu.matmul %93, %95, %cst_97 {dimension_numbers = #tpu.dot_dimension_numbers<[1], [0], [0], [1], [0, 0, 1, 1], [], []>} : vector<32x16xf32>, vector<16x32xf32>, vector<32x32xf32> -> vector<32x32xf32>
    %97 = arith.addf %90, %96 : vector<32x32xf32>
    %c13 = arith.constant 13 : index
    %c0_98 = arith.constant 0 : index
    %c0_99 = arith.constant 0 : index
    %98 = vector.load %arg4[%c13, %c0_98, %c0_99] : memref<16x32x200xf32, #tpu.memory_space<vmem>>, vector<1x32x200xf32>
    %99 = vector.shape_cast %98 : vector<1x32x200xf32> to vector<32x200xf32>
    %cst_100 = arith.constant dense<0.000000e+00> : vector<32x16xf32>
    %100 = tpu.matmul %99, %7, %cst_100 {dimension_numbers = #tpu.dot_dimension_numbers<[1], [0], [0], [1], [0, 0, 1, 1], [], []>} : vector<32x200xf32>, vector<200x16xf32>, vector<32x16xf32> -> vector<32x16xf32>
    %c13_101 = arith.constant 13 : index
    %c0_102 = arith.constant 0 : index
    %c0_103 = arith.constant 0 : index
    %101 = vector.load %arg5[%c13_101, %c0_102, %c0_103] : memref<16x16x32xf32, #tpu.memory_space<vmem>>, vector<1x16x32xf32>
    %102 = vector.shape_cast %101 : vector<1x16x32xf32> to vector<16x32xf32>
    %cst_104 = arith.constant dense<0.000000e+00> : vector<32x32xf32>
    %103 = tpu.matmul %100, %102, %cst_104 {dimension_numbers = #tpu.dot_dimension_numbers<[1], [0], [0], [1], [0, 0, 1, 1], [], []>} : vector<32x16xf32>, vector<16x32xf32>, vector<32x32xf32> -> vector<32x32xf32>
    %104 = arith.addf %97, %103 : vector<32x32xf32>
    %c14 = arith.constant 14 : index
    %c0_105 = arith.constant 0 : index
    %c0_106 = arith.constant 0 : index
    %105 = vector.load %arg4[%c14, %c0_105, %c0_106] : memref<16x32x200xf32, #tpu.memory_space<vmem>>, vector<1x32x200xf32>
    %106 = vector.shape_cast %105 : vector<1x32x200xf32> to vector<32x200xf32>
    %cst_107 = arith.constant dense<0.000000e+00> : vector<32x16xf32>
    %107 = tpu.matmul %106, %7, %cst_107 {dimension_numbers = #tpu.dot_dimension_numbers<[1], [0], [0], [1], [0, 0, 1, 1], [], []>} : vector<32x200xf32>, vector<200x16xf32>, vector<32x16xf32> -> vector<32x16xf32>
    %c14_108 = arith.constant 14 : index
    %c0_109 = arith.constant 0 : index
    %c0_110 = arith.constant 0 : index
    %108 = vector.load %arg5[%c14_108, %c0_109, %c0_110] : memref<16x16x32xf32, #tpu.memory_space<vmem>>, vector<1x16x32xf32>
    %109 = vector.shape_cast %108 : vector<1x16x32xf32> to vector<16x32xf32>
    %cst_111 = arith.constant dense<0.000000e+00> : vector<32x32xf32>
    %110 = tpu.matmul %107, %109, %cst_111 {dimension_numbers = #tpu.dot_dimension_numbers<[1], [0], [0], [1], [0, 0, 1, 1], [], []>} : vector<32x16xf32>, vector<16x32xf32>, vector<32x32xf32> -> vector<32x32xf32>
    %111 = arith.addf %104, %110 : vector<32x32xf32>
    %c15 = arith.constant 15 : index
    %c0_112 = arith.constant 0 : index
    %c0_113 = arith.constant 0 : index
    %112 = vector.load %arg4[%c15, %c0_112, %c0_113] : memref<16x32x200xf32, #tpu.memory_space<vmem>>, vector<1x32x200xf32>
    %113 = vector.shape_cast %112 : vector<1x32x200xf32> to vector<32x200xf32>
    %cst_114 = arith.constant dense<0.000000e+00> : vector<32x16xf32>
    %114 = tpu.matmul %113, %7, %cst_114 {dimension_numbers = #tpu.dot_dimension_numbers<[1], [0], [0], [1], [0, 0, 1, 1], [], []>} : vector<32x200xf32>, vector<200x16xf32>, vector<32x16xf32> -> vector<32x16xf32>
    %c15_115 = arith.constant 15 : index
    %c0_116 = arith.constant 0 : index
    %c0_117 = arith.constant 0 : index
    %115 = vector.load %arg5[%c15_115, %c0_116, %c0_117] : memref<16x16x32xf32, #tpu.memory_space<vmem>>, vector<1x16x32xf32>
    %116 = vector.shape_cast %115 : vector<1x16x32xf32> to vector<16x32xf32>
    %cst_118 = arith.constant dense<0.000000e+00> : vector<32x32xf32>
    %117 = tpu.matmul %114, %116, %cst_118 {dimension_numbers = #tpu.dot_dimension_numbers<[1], [0], [0], [1], [0, 0, 1, 1], [], []>} : vector<32x16xf32>, vector<16x32xf32>, vector<32x32xf32> -> vector<32x32xf32>
    %118 = arith.addf %111, %117 : vector<32x32xf32>
    %c0_119 = arith.constant 0 : index
    %c0_120 = arith.constant 0 : index
    %119 = vector.load %arg6[%c0_119, %c0_120] : memref<1x32xf32, #tpu.memory_space<vmem>>, vector<1x32xf32>
    %120 = vector.broadcast %119 : vector<1x32xf32> to vector<32x32xf32>
    %121 = arith.addf %118, %120 : vector<32x32xf32>
    %cst_121 = arith.constant 0.000000e+00 : f32
    %122 = vector.broadcast %cst_121 : f32 to vector<32x32xf32>
    %123 = arith.maximumf %121, %122 : vector<32x32xf32>
    %c0_122 = arith.constant 0 : index
    %c0_123 = arith.constant 0 : index
    %c0_124 = arith.constant 0 : index
    %124 = vector.load %arg7[%c0_122, %c0_123, %c0_124] : memref<9x8x32xf32, #tpu.memory_space<vmem>>, vector<1x8x32xf32>
    %125 = vector.shape_cast %124 : vector<1x8x32xf32> to vector<8x32xf32>
    %cst_125 = arith.constant dense<0.000000e+00> : vector<8x32xf32>
    %126 = tpu.matmul %125, %123, %cst_125 {dimension_numbers = #tpu.dot_dimension_numbers<[1], [0], [0], [1], [0, 0, 1, 1], [], []>} : vector<8x32xf32>, vector<32x32xf32>, vector<8x32xf32> -> vector<8x32xf32>
    %c0_126 = arith.constant 0 : index
    %c0_127 = arith.constant 0 : index
    %c0_128 = arith.constant 0 : index
    %127 = vector.load %arg8[%c0_126, %c0_127, %c0_128] : memref<9x32x32xf32, #tpu.memory_space<vmem>>, vector<1x32x32xf32>
    %128 = vector.shape_cast %127 : vector<1x32x32xf32> to vector<32x32xf32>
    %cst_129 = arith.constant dense<0.000000e+00> : vector<8x32xf32>
    %129 = tpu.matmul %126, %128, %cst_129 {dimension_numbers = #tpu.dot_dimension_numbers<[1], [0], [0], [1], [0, 0, 1, 1], [], []>} : vector<8x32xf32>, vector<32x32xf32>, vector<8x32xf32> -> vector<8x32xf32>
    %c1_130 = arith.constant 1 : index
    %c0_131 = arith.constant 0 : index
    %c0_132 = arith.constant 0 : index
    %130 = vector.load %arg7[%c1_130, %c0_131, %c0_132] : memref<9x8x32xf32, #tpu.memory_space<vmem>>, vector<1x8x32xf32>
    %131 = vector.shape_cast %130 : vector<1x8x32xf32> to vector<8x32xf32>
    %cst_133 = arith.constant dense<0.000000e+00> : vector<8x32xf32>
    %132 = tpu.matmul %131, %123, %cst_133 {dimension_numbers = #tpu.dot_dimension_numbers<[1], [0], [0], [1], [0, 0, 1, 1], [], []>} : vector<8x32xf32>, vector<32x32xf32>, vector<8x32xf32> -> vector<8x32xf32>
    %c1_134 = arith.constant 1 : index
    %c0_135 = arith.constant 0 : index
    %c0_136 = arith.constant 0 : index
    %133 = vector.load %arg8[%c1_134, %c0_135, %c0_136] : memref<9x32x32xf32, #tpu.memory_space<vmem>>, vector<1x32x32xf32>
    %134 = vector.shape_cast %133 : vector<1x32x32xf32> to vector<32x32xf32>
    %cst_137 = arith.constant dense<0.000000e+00> : vector<8x32xf32>
    %135 = tpu.matmul %132, %134, %cst_137 {dimension_numbers = #tpu.dot_dimension_numbers<[1], [0], [0], [1], [0, 0, 1, 1], [], []>} : vector<8x32xf32>, vector<32x32xf32>, vector<8x32xf32> -> vector<8x32xf32>
    %136 = arith.addf %129, %135 : vector<8x32xf32>
    %c2_138 = arith.constant 2 : index
    %c0_139 = arith.constant 0 : index
    %c0_140 = arith.constant 0 : index
    %137 = vector.load %arg7[%c2_138, %c0_139, %c0_140] : memref<9x8x32xf32, #tpu.memory_space<vmem>>, vector<1x8x32xf32>
    %138 = vector.shape_cast %137 : vector<1x8x32xf32> to vector<8x32xf32>
    %cst_141 = arith.constant dense<0.000000e+00> : vector<8x32xf32>
    %139 = tpu.matmul %138, %123, %cst_141 {dimension_numbers = #tpu.dot_dimension_numbers<[1], [0], [0], [1], [0, 0, 1, 1], [], []>} : vector<8x32xf32>, vector<32x32xf32>, vector<8x32xf32> -> vector<8x32xf32>
    %c2_142 = arith.constant 2 : index
    %c0_143 = arith.constant 0 : index
    %c0_144 = arith.constant 0 : index
    %140 = vector.load %arg8[%c2_142, %c0_143, %c0_144] : memref<9x32x32xf32, #tpu.memory_space<vmem>>, vector<1x32x32xf32>
    %141 = vector.shape_cast %140 : vector<1x32x32xf32> to vector<32x32xf32>
    %cst_145 = arith.constant dense<0.000000e+00> : vector<8x32xf32>
    %142 = tpu.matmul %139, %141, %cst_145 {dimension_numbers = #tpu.dot_dimension_numbers<[1], [0], [0], [1], [0, 0, 1, 1], [], []>} : vector<8x32xf32>, vector<32x32xf32>, vector<8x32xf32> -> vector<8x32xf32>
    %143 = arith.addf %136, %142 : vector<8x32xf32>
    %c3_146 = arith.constant 3 : index
    %c0_147 = arith.constant 0 : index
    %c0_148 = arith.constant 0 : index
    %144 = vector.load %arg7[%c3_146, %c0_147, %c0_148] : memref<9x8x32xf32, #tpu.memory_space<vmem>>, vector<1x8x32xf32>
    %145 = vector.shape_cast %144 : vector<1x8x32xf32> to vector<8x32xf32>
    %cst_149 = arith.constant dense<0.000000e+00> : vector<8x32xf32>
    %146 = tpu.matmul %145, %123, %cst_149 {dimension_numbers = #tpu.dot_dimension_numbers<[1], [0], [0], [1], [0, 0, 1, 1], [], []>} : vector<8x32xf32>, vector<32x32xf32>, vector<8x32xf32> -> vector<8x32xf32>
    %c3_150 = arith.constant 3 : index
    %c0_151 = arith.constant 0 : index
    %c0_152 = arith.constant 0 : index
    %147 = vector.load %arg8[%c3_150, %c0_151, %c0_152] : memref<9x32x32xf32, #tpu.memory_space<vmem>>, vector<1x32x32xf32>
    %148 = vector.shape_cast %147 : vector<1x32x32xf32> to vector<32x32xf32>
    %cst_153 = arith.constant dense<0.000000e+00> : vector<8x32xf32>
    %149 = tpu.matmul %146, %148, %cst_153 {dimension_numbers = #tpu.dot_dimension_numbers<[1], [0], [0], [1], [0, 0, 1, 1], [], []>} : vector<8x32xf32>, vector<32x32xf32>, vector<8x32xf32> -> vector<8x32xf32>
    %150 = arith.addf %143, %149 : vector<8x32xf32>
    %c4_154 = arith.constant 4 : index
    %c0_155 = arith.constant 0 : index
    %c0_156 = arith.constant 0 : index
    %151 = vector.load %arg7[%c4_154, %c0_155, %c0_156] : memref<9x8x32xf32, #tpu.memory_space<vmem>>, vector<1x8x32xf32>
    %152 = vector.shape_cast %151 : vector<1x8x32xf32> to vector<8x32xf32>
    %cst_157 = arith.constant dense<0.000000e+00> : vector<8x32xf32>
    %153 = tpu.matmul %152, %123, %cst_157 {dimension_numbers = #tpu.dot_dimension_numbers<[1], [0], [0], [1], [0, 0, 1, 1], [], []>} : vector<8x32xf32>, vector<32x32xf32>, vector<8x32xf32> -> vector<8x32xf32>
    %c4_158 = arith.constant 4 : index
    %c0_159 = arith.constant 0 : index
    %c0_160 = arith.constant 0 : index
    %154 = vector.load %arg8[%c4_158, %c0_159, %c0_160] : memref<9x32x32xf32, #tpu.memory_space<vmem>>, vector<1x32x32xf32>
    %155 = vector.shape_cast %154 : vector<1x32x32xf32> to vector<32x32xf32>
    %cst_161 = arith.constant dense<0.000000e+00> : vector<8x32xf32>
    %156 = tpu.matmul %153, %155, %cst_161 {dimension_numbers = #tpu.dot_dimension_numbers<[1], [0], [0], [1], [0, 0, 1, 1], [], []>} : vector<8x32xf32>, vector<32x32xf32>, vector<8x32xf32> -> vector<8x32xf32>
    %157 = arith.addf %150, %156 : vector<8x32xf32>
    %c5_162 = arith.constant 5 : index
    %c0_163 = arith.constant 0 : index
    %c0_164 = arith.constant 0 : index
    %158 = vector.load %arg7[%c5_162, %c0_163, %c0_164] : memref<9x8x32xf32, #tpu.memory_space<vmem>>, vector<1x8x32xf32>
    %159 = vector.shape_cast %158 : vector<1x8x32xf32> to vector<8x32xf32>
    %cst_165 = arith.constant dense<0.000000e+00> : vector<8x32xf32>
    %160 = tpu.matmul %159, %123, %cst_165 {dimension_numbers = #tpu.dot_dimension_numbers<[1], [0], [0], [1], [0, 0, 1, 1], [], []>} : vector<8x32xf32>, vector<32x32xf32>, vector<8x32xf32> -> vector<8x32xf32>
    %c5_166 = arith.constant 5 : index
    %c0_167 = arith.constant 0 : index
    %c0_168 = arith.constant 0 : index
    %161 = vector.load %arg8[%c5_166, %c0_167, %c0_168] : memref<9x32x32xf32, #tpu.memory_space<vmem>>, vector<1x32x32xf32>
    %162 = vector.shape_cast %161 : vector<1x32x32xf32> to vector<32x32xf32>
    %cst_169 = arith.constant dense<0.000000e+00> : vector<8x32xf32>
    %163 = tpu.matmul %160, %162, %cst_169 {dimension_numbers = #tpu.dot_dimension_numbers<[1], [0], [0], [1], [0, 0, 1, 1], [], []>} : vector<8x32xf32>, vector<32x32xf32>, vector<8x32xf32> -> vector<8x32xf32>
    %164 = arith.addf %157, %163 : vector<8x32xf32>
    %c6_170 = arith.constant 6 : index
    %c0_171 = arith.constant 0 : index
    %c0_172 = arith.constant 0 : index
    %165 = vector.load %arg7[%c6_170, %c0_171, %c0_172] : memref<9x8x32xf32, #tpu.memory_space<vmem>>, vector<1x8x32xf32>
    %166 = vector.shape_cast %165 : vector<1x8x32xf32> to vector<8x32xf32>
    %cst_173 = arith.constant dense<0.000000e+00> : vector<8x32xf32>
    %167 = tpu.matmul %166, %123, %cst_173 {dimension_numbers = #tpu.dot_dimension_numbers<[1], [0], [0], [1], [0, 0, 1, 1], [], []>} : vector<8x32xf32>, vector<32x32xf32>, vector<8x32xf32> -> vector<8x32xf32>
    %c6_174 = arith.constant 6 : index
    %c0_175 = arith.constant 0 : index
    %c0_176 = arith.constant 0 : index
    %168 = vector.load %arg8[%c6_174, %c0_175, %c0_176] : memref<9x32x32xf32, #tpu.memory_space<vmem>>, vector<1x32x32xf32>
    %169 = vector.shape_cast %168 : vector<1x32x32xf32> to vector<32x32xf32>
    %cst_177 = arith.constant dense<0.000000e+00> : vector<8x32xf32>
    %170 = tpu.matmul %167, %169, %cst_177 {dimension_numbers = #tpu.dot_dimension_numbers<[1], [0], [0], [1], [0, 0, 1, 1], [], []>} : vector<8x32xf32>, vector<32x32xf32>, vector<8x32xf32> -> vector<8x32xf32>
    %171 = arith.addf %164, %170 : vector<8x32xf32>
    %c7_178 = arith.constant 7 : index
    %c0_179 = arith.constant 0 : index
    %c0_180 = arith.constant 0 : index
    %172 = vector.load %arg7[%c7_178, %c0_179, %c0_180] : memref<9x8x32xf32, #tpu.memory_space<vmem>>, vector<1x8x32xf32>
    %173 = vector.shape_cast %172 : vector<1x8x32xf32> to vector<8x32xf32>
    %cst_181 = arith.constant dense<0.000000e+00> : vector<8x32xf32>
    %174 = tpu.matmul %173, %123, %cst_181 {dimension_numbers = #tpu.dot_dimension_numbers<[1], [0], [0], [1], [0, 0, 1, 1], [], []>} : vector<8x32xf32>, vector<32x32xf32>, vector<8x32xf32> -> vector<8x32xf32>
    %c7_182 = arith.constant 7 : index
    %c0_183 = arith.constant 0 : index
    %c0_184 = arith.constant 0 : index
    %175 = vector.load %arg8[%c7_182, %c0_183, %c0_184] : memref<9x32x32xf32, #tpu.memory_space<vmem>>, vector<1x32x32xf32>
    %176 = vector.shape_cast %175 : vector<1x32x32xf32> to vector<32x32xf32>
    %cst_185 = arith.constant dense<0.000000e+00> : vector<8x32xf32>
    %177 = tpu.matmul %174, %176, %cst_185 {dimension_numbers = #tpu.dot_dimension_numbers<[1], [0], [0], [1], [0, 0, 1, 1], [], []>} : vector<8x32xf32>, vector<32x32xf32>, vector<8x32xf32> -> vector<8x32xf32>
    %178 = arith.addf %171, %177 : vector<8x32xf32>
    %c8_186 = arith.constant 8 : index
    %c0_187 = arith.constant 0 : index
    %c0_188 = arith.constant 0 : index
    %179 = vector.load %arg7[%c8_186, %c0_187, %c0_188] : memref<9x8x32xf32, #tpu.memory_space<vmem>>, vector<1x8x32xf32>
    %180 = vector.shape_cast %179 : vector<1x8x32xf32> to vector<8x32xf32>
    %cst_189 = arith.constant dense<0.000000e+00> : vector<8x32xf32>
    %181 = tpu.matmul %180, %123, %cst_189 {dimension_numbers = #tpu.dot_dimension_numbers<[1], [0], [0], [1], [0, 0, 1, 1], [], []>} : vector<8x32xf32>, vector<32x32xf32>, vector<8x32xf32> -> vector<8x32xf32>
    %c8_190 = arith.constant 8 : index
    %c0_191 = arith.constant 0 : index
    %c0_192 = arith.constant 0 : index
    %182 = vector.load %arg8[%c8_190, %c0_191, %c0_192] : memref<9x32x32xf32, #tpu.memory_space<vmem>>, vector<1x32x32xf32>
    %183 = vector.shape_cast %182 : vector<1x32x32xf32> to vector<32x32xf32>
    %cst_193 = arith.constant dense<0.000000e+00> : vector<8x32xf32>
    %184 = tpu.matmul %181, %183, %cst_193 {dimension_numbers = #tpu.dot_dimension_numbers<[1], [0], [0], [1], [0, 0, 1, 1], [], []>} : vector<8x32xf32>, vector<32x32xf32>, vector<8x32xf32> -> vector<8x32xf32>
    %185 = arith.addf %178, %184 : vector<8x32xf32>
    %c0_194 = arith.constant 0 : index
    %c0_195 = arith.constant 0 : index
    %186 = vector.load %arg9[%c0_194, %c0_195] : memref<1x32xf32, #tpu.memory_space<vmem>>, vector<1x32xf32>
    %187 = vector.broadcast %186 : vector<1x32xf32> to vector<8x32xf32>
    %188 = arith.addf %185, %187 : vector<8x32xf32>
    %cst_196 = arith.constant 0.000000e+00 : f32
    %189 = vector.broadcast %cst_196 : f32 to vector<8x32xf32>
    %190 = arith.maximumf %188, %189 : vector<8x32xf32>
    %c0_197 = arith.constant 0 : index
    %c0_198 = arith.constant 0 : index
    %c0_199 = arith.constant 0 : index
    %191 = vector.load %arg10[%c0_197, %c0_198, %c0_199] : memref<4x2x8xf32, #tpu.memory_space<vmem>>, vector<1x2x8xf32>
    %192 = vector.shape_cast %191 : vector<1x2x8xf32> to vector<2x8xf32>
    %cst_200 = arith.constant dense<0.000000e+00> : vector<2x32xf32>
    %193 = tpu.matmul %192, %190, %cst_200 {dimension_numbers = #tpu.dot_dimension_numbers<[1], [0], [0], [1], [0, 0, 1, 1], [], []>} : vector<2x8xf32>, vector<8x32xf32>, vector<2x32xf32> -> vector<2x32xf32>
    %c0_201 = arith.constant 0 : index
    %c0_202 = arith.constant 0 : index
    %c0_203 = arith.constant 0 : index
    %194 = vector.load %arg11[%c0_201, %c0_202, %c0_203] : memref<4x32x128xf32, #tpu.memory_space<vmem>>, vector<1x32x128xf32>
    %195 = vector.shape_cast %194 : vector<1x32x128xf32> to vector<32x128xf32>
    %cst_204 = arith.constant dense<0.000000e+00> : vector<2x128xf32>
    %196 = tpu.matmul %193, %195, %cst_204 {dimension_numbers = #tpu.dot_dimension_numbers<[1], [0], [0], [1], [0, 0, 1, 1], [], []>} : vector<2x32xf32>, vector<32x128xf32>, vector<2x128xf32> -> vector<2x128xf32>
    %c1_205 = arith.constant 1 : index
    %c0_206 = arith.constant 0 : index
    %c0_207 = arith.constant 0 : index
    %197 = vector.load %arg10[%c1_205, %c0_206, %c0_207] : memref<4x2x8xf32, #tpu.memory_space<vmem>>, vector<1x2x8xf32>
    %198 = vector.shape_cast %197 : vector<1x2x8xf32> to vector<2x8xf32>
    %cst_208 = arith.constant dense<0.000000e+00> : vector<2x32xf32>
    %199 = tpu.matmul %198, %190, %cst_208 {dimension_numbers = #tpu.dot_dimension_numbers<[1], [0], [0], [1], [0, 0, 1, 1], [], []>} : vector<2x8xf32>, vector<8x32xf32>, vector<2x32xf32> -> vector<2x32xf32>
    %c1_209 = arith.constant 1 : index
    %c0_210 = arith.constant 0 : index
    %c0_211 = arith.constant 0 : index
    %200 = vector.load %arg11[%c1_209, %c0_210, %c0_211] : memref<4x32x128xf32, #tpu.memory_space<vmem>>, vector<1x32x128xf32>
    %201 = vector.shape_cast %200 : vector<1x32x128xf32> to vector<32x128xf32>
    %cst_212 = arith.constant dense<0.000000e+00> : vector<2x128xf32>
    %202 = tpu.matmul %199, %201, %cst_212 {dimension_numbers = #tpu.dot_dimension_numbers<[1], [0], [0], [1], [0, 0, 1, 1], [], []>} : vector<2x32xf32>, vector<32x128xf32>, vector<2x128xf32> -> vector<2x128xf32>
    %203 = arith.addf %196, %202 : vector<2x128xf32>
    %c2_213 = arith.constant 2 : index
    %c0_214 = arith.constant 0 : index
    %c0_215 = arith.constant 0 : index
    %204 = vector.load %arg10[%c2_213, %c0_214, %c0_215] : memref<4x2x8xf32, #tpu.memory_space<vmem>>, vector<1x2x8xf32>
    %205 = vector.shape_cast %204 : vector<1x2x8xf32> to vector<2x8xf32>
    %cst_216 = arith.constant dense<0.000000e+00> : vector<2x32xf32>
    %206 = tpu.matmul %205, %190, %cst_216 {dimension_numbers = #tpu.dot_dimension_numbers<[1], [0], [0], [1], [0, 0, 1, 1], [], []>} : vector<2x8xf32>, vector<8x32xf32>, vector<2x32xf32> -> vector<2x32xf32>
    %c2_217 = arith.constant 2 : index
    %c0_218 = arith.constant 0 : index
    %c0_219 = arith.constant 0 : index
    %207 = vector.load %arg11[%c2_217, %c0_218, %c0_219] : memref<4x32x128xf32, #tpu.memory_space<vmem>>, vector<1x32x128xf32>
    %208 = vector.shape_cast %207 : vector<1x32x128xf32> to vector<32x128xf32>
    %cst_220 = arith.constant dense<0.000000e+00> : vector<2x128xf32>
    %209 = tpu.matmul %206, %208, %cst_220 {dimension_numbers = #tpu.dot_dimension_numbers<[1], [0], [0], [1], [0, 0, 1, 1], [], []>} : vector<2x32xf32>, vector<32x128xf32>, vector<2x128xf32> -> vector<2x128xf32>
    %210 = arith.addf %203, %209 : vector<2x128xf32>
    %c3_221 = arith.constant 3 : index
    %c0_222 = arith.constant 0 : index
    %c0_223 = arith.constant 0 : index
    %211 = vector.load %arg10[%c3_221, %c0_222, %c0_223] : memref<4x2x8xf32, #tpu.memory_space<vmem>>, vector<1x2x8xf32>
    %212 = vector.shape_cast %211 : vector<1x2x8xf32> to vector<2x8xf32>
    %cst_224 = arith.constant dense<0.000000e+00> : vector<2x32xf32>
    %213 = tpu.matmul %212, %190, %cst_224 {dimension_numbers = #tpu.dot_dimension_numbers<[1], [0], [0], [1], [0, 0, 1, 1], [], []>} : vector<2x8xf32>, vector<8x32xf32>, vector<2x32xf32> -> vector<2x32xf32>
    %c3_225 = arith.constant 3 : index
    %c0_226 = arith.constant 0 : index
    %c0_227 = arith.constant 0 : index
    %214 = vector.load %arg11[%c3_225, %c0_226, %c0_227] : memref<4x32x128xf32, #tpu.memory_space<vmem>>, vector<1x32x128xf32>
    %215 = vector.shape_cast %214 : vector<1x32x128xf32> to vector<32x128xf32>
    %cst_228 = arith.constant dense<0.000000e+00> : vector<2x128xf32>
    %216 = tpu.matmul %213, %215, %cst_228 {dimension_numbers = #tpu.dot_dimension_numbers<[1], [0], [0], [1], [0, 0, 1, 1], [], []>} : vector<2x32xf32>, vector<32x128xf32>, vector<2x128xf32> -> vector<2x128xf32>
    %217 = arith.addf %210, %216 : vector<2x128xf32>
    %c0_229 = arith.constant 0 : index
    %c0_230 = arith.constant 0 : index
    %218 = vector.load %arg12[%c0_229, %c0_230] : memref<1x128xf32, #tpu.memory_space<vmem>>, vector<1x128xf32>
    %219 = vector.broadcast %218 : vector<1x128xf32> to vector<2x128xf32>
    %220 = arith.addf %217, %219 : vector<2x128xf32>
    %cst_231 = arith.constant 0.000000e+00 : f32
    %221 = vector.broadcast %cst_231 : f32 to vector<2x128xf32>
    %222 = arith.maximumf %220, %221 : vector<2x128xf32>
    %c0_232 = arith.constant 0 : index
    %c0_233 = arith.constant 0 : index
    %223 = vector.load %arg13[%c0_232, %c0_233] : memref<128x7xf32, #tpu.memory_space<vmem>>, vector<128x7xf32>
    %cst_234 = arith.constant dense<0.000000e+00> : vector<2x7xf32>
    %224 = tpu.matmul %222, %223, %cst_234 {dimension_numbers = #tpu.dot_dimension_numbers<[1], [0], [0], [1], [0, 0, 1, 1], [], []>} : vector<2x128xf32>, vector<128x7xf32>, vector<2x7xf32> -> vector<2x7xf32>
    %c0_235 = arith.constant 0 : index
    %c0_236 = arith.constant 0 : index
    %225 = vector.load %arg14[%c0_235, %c0_236] : memref<1x7xf32, #tpu.memory_space<vmem>>, vector<1x7xf32>
    %226 = vector.broadcast %225 : vector<1x7xf32> to vector<2x7xf32>
    %227 = arith.addf %224, %226 : vector<2x7xf32>
    %228 = vector.extract_strided_slice %227 {offsets = [0, 0], sizes = [2, 1], strides = [1, 1]} : vector<2x7xf32> to vector<2x1xf32>
    %229 = vector.extract_strided_slice %227 {offsets = [0, 1], sizes = [2, 6], strides = [1, 1]} : vector<2x7xf32> to vector<2x6xf32>
    %cst_237 = arith.constant dense<0.000000e+00> : vector<2xf32>
    %230 = vector.multi_reduction <add>, %229, %cst_237 [1] : vector<2x6xf32> to vector<2xf32>
    %231 = vector.shape_cast %230 : vector<2xf32> to vector<2x1xf32>
    %cst_238 = arith.constant 6.000000e+00 : f32
    %232 = vector.broadcast %cst_238 : f32 to vector<2x1xf32>
    %233 = arith.divf %231, %232 : vector<2x1xf32>
    %234 = vector.broadcast %233 : vector<2x1xf32> to vector<2x6xf32>
    %235 = arith.subf %229, %234 : vector<2x6xf32>
    %236 = vector.broadcast %228 : vector<2x1xf32> to vector<2x6xf32>
    %237 = arith.addf %236, %235 : vector<2x6xf32>
    %c0_239 = arith.constant 0 : index
    %c0_240 = arith.constant 0 : index
    %238 = vector.load %arg15[%c0_239, %c0_240] : memref<2x6xf32, #tpu.memory_space<vmem>>, vector<2x6xf32>
    tpu.vector_store %arg15[%c0_239, %c0_240], %237 {strides = array<i32>} : memref<2x6xf32, #tpu.memory_space<vmem>>, vector<2x6xf32>,
    return
  }
  func.func @transform_0(%arg0: i32) -> (i32, i32) {
    %c0_i32 = arith.constant 0 : i32
    %c0_i32_0 = arith.constant 0 : i32
    %c0_i32_1 = arith.constant 0 : i32
    return %c0_i32, %c0_i32_0 : i32, i32
  }
  func.func @transform_1(%arg0: i32) -> (i32, i32) {
    %c0_i32 = arith.constant 0 : i32
    %c0_i32_0 = arith.constant 0 : i32
    %c0_i32_1 = arith.constant 0 : i32
    return %c0_i32, %c0_i32_0 : i32, i32
  }
  func.func @transform_2(%arg0: i32) -> (i32, i32) {
    %c0_i32 = arith.constant 0 : i32
    %c0_i32_0 = arith.constant 0 : i32
    %c0_i32_1 = arith.constant 0 : i32
    return %c0_i32, %c0_i32_0 : i32, i32
  }
  func.func @transform_3(%arg0: i32) -> (i32, i32, i32) {
    %c0_i32 = arith.constant 0 : i32
    %c0_i32_0 = arith.constant 0 : i32
    %c0_i32_1 = arith.constant 0 : i32
    %c0_i32_2 = arith.constant 0 : i32
    return %c0_i32, %c0_i32_0, %c0_i32_1 : i32, i32, i32
  }
  func.func @transform_4(%arg0: i32) -> (i32, i32, i32) {
    %c0_i32 = arith.constant 0 : i32
    %c0_i32_0 = arith.constant 0 : i32
    %c0_i32_1 = arith.constant 0 : i32
    %c0_i32_2 = arith.constant 0 : i32
    return %c0_i32, %c0_i32_0, %c0_i32_1 : i32, i32, i32
  }
  func.func @transform_5(%arg0: i32) -> (i32, i32) {
    %c0_i32 = arith.constant 0 : i32
    %c0_i32_0 = arith.constant 0 : i32
    %c0_i32_1 = arith.constant 0 : i32
    return %c0_i32, %c0_i32_0 : i32, i32
  }
  func.func @transform_6(%arg0: i32) -> (i32, i32, i32) {
    %c0_i32 = arith.constant 0 : i32
    %c0_i32_0 = arith.constant 0 : i32
    %c0_i32_1 = arith.constant 0 : i32
    %c0_i32_2 = arith.constant 0 : i32
    return %c0_i32, %c0_i32_0, %c0_i32_1 : i32, i32, i32
  }
  func.func @transform_7(%arg0: i32) -> (i32, i32, i32) {
    %c0_i32 = arith.constant 0 : i32
    %c0_i32_0 = arith.constant 0 : i32
    %c0_i32_1 = arith.constant 0 : i32
    %c0_i32_2 = arith.constant 0 : i32
    return %c0_i32, %c0_i32_0, %c0_i32_1 : i32, i32, i32
  }
  func.func @transform_8(%arg0: i32) -> (i32, i32) {
    %c0_i32 = arith.constant 0 : i32
    %c0_i32_0 = arith.constant 0 : i32
    %c0_i32_1 = arith.constant 0 : i32
    return %c0_i32, %c0_i32_0 : i32, i32
  }
  func.func @transform_9(%arg0: i32) -> (i32, i32, i32) {
    %c0_i32 = arith.constant 0 : i32
    %c0_i32_0 = arith.constant 0 : i32
    %c0_i32_1 = arith.constant 0 : i32
    %c0_i32_2 = arith.constant 0 : i32
    return %c0_i32, %c0_i32_0, %c0_i32_1 : i32, i32, i32
  }
  func.func @transform_10(%arg0: i32) -> (i32, i32, i32) {
    %c0_i32 = arith.constant 0 : i32
    %c0_i32_0 = arith.constant 0 : i32
    %c0_i32_1 = arith.constant 0 : i32
    %c0_i32_2 = arith.constant 0 : i32
    return %c0_i32, %c0_i32_0, %c0_i32_1 : i32, i32, i32
  }
  func.func @transform_11(%arg0: i32) -> (i32, i32) {
    %c0_i32 = arith.constant 0 : i32
    %c0_i32_0 = arith.constant 0 : i32
    %c0_i32_1 = arith.constant 0 : i32
    return %c0_i32, %c0_i32_0 : i32, i32
  }
  func.func @transform_12(%arg0: i32) -> (i32, i32) {
    %c0_i32 = arith.constant 0 : i32
    %c0_i32_0 = arith.constant 0 : i32
    %c0_i32_1 = arith.constant 0 : i32
    return %c0_i32, %c0_i32_0 : i32, i32
  }
  func.func @transform_13(%arg0: i32) -> (i32, i32) {
    %c0_i32 = arith.constant 0 : i32
    %c0_i32_0 = arith.constant 0 : i32
    %c0_i32_1 = arith.constant 0 : i32
    return %c0_i32, %c0_i32_0 : i32, i32
  }
  func.func @transform_14(%arg0: i32) -> (i32, i32) {
    %c0_i32 = arith.constant 0 : i32
    %c0_i32_0 = arith.constant 0 : i32
    %c0_i32_1 = arith.constant 0 : i32
    return %c0_i32, %c0_i32_0 : i32, i32
  }
}

</mosaic_0001>

<bundles_post_ra>
// kernel: tpu_custom_call.1
= control target key start
LH: loop header
LB: loop body
LE: loop exit
PB: predicated region body
PF: predicated region fallthrough
CT: control target
= control target key end

     0   :  { %19 = vsyncpa [#allocation3], 0  ;;  %s4927_s0 = inlined_call_operand.hbm [shape: f32[200,256], index: 0, kind: input, shape index: {}]   ;;  %s4928_s1 = inlined_call_operand.vmem [shape: f32[256,16], index: 1, kind: input, shape index: {}]   ;;  %s4929_s2 = inlined_call_operand.vmem [shape: f32[1,16], index: 2, kind: input, shape index: {}]   ;;  %s4930_s3 = inlined_call_operand.hbm [shape: f32[16,32,200], index: 3, kind: input, shape index: {}]   ;;  %s4931_s4 = inlined_call_operand.hbm [shape: f32[16,16,32], index: 4, kind: input, shape index: {}]   ;;  %s4932_s5 = inlined_call_operand.vmem [shape: f32[1,32], index: 5, kind: input, shape index: {}]   ;;  %s4933_s6 = inlined_call_operand.vmem [shape: f32[9,8,32], index: 6, kind: input, shape index: {}]   ;;  %s4934_s7 = inlined_call_operand.vmem [shape: f32[9,32,32], index: 7, kind: input, shape index: {}]   ;;  %s4935_s8 = inlined_call_operand.vmem [shape: f32[1,32], index: 8, kind: input, shape index: {}]   ;;  %s4936_s9 = inlined_call_operand.vmem [shape: f32[4,2,8], index: 9, kind: input, shape index: {}]   ;;  %s4937_s10 = inlined_call_operand.hbm [shape: f32[4,32,128], index: 10, kind: input, shape index: {}]   ;;  %s4938_s11 = inlined_call_operand.vmem [shape: f32[1,128], index: 11, kind: input, shape index: {}]   ;;  %s4939_s12 = inlined_call_operand.vmem [shape: f32[128,7], index: 12, kind: input, shape index: {}]   ;;  %s4940_s13 = inlined_call_operand.vmem [shape: f32[1,7], index: 13, kind: input, shape index: {}]   ;;  %s4941_s14 = inlined_call_operand.hbm [shape: f32[2,6], index: 14, kind: output, shape index: {}]  }
   0x1   :  { %20 = vsyncpa [#allocation6], 0 }
   0x2   :  { %21 = vsyncpa [#allocation9], 0 }
   0x3   :  { %22 = vsyncpa [#allocation4], 0  ;;  %s44_s15 = sshll.u32 %s4930_s3, 4  ;;  %s3607_s16 = smov [#allocation5]   ;;  %s45_s15 = int_to_ptr.hbm [resolvable:$true] %s44_s15 }
   0x4   :  { %s46_s17 = sshll.u32 %s3607_s16, 4  ;;  %s27_s20 = sshll.u32 %s4927_s0, 4  ;;  %s47_s17 = int_to_ptr.vmem [resolvable:$true] %s46_s17  ;;  %s28_s20 = int_to_ptr.hbm [resolvable:$true] %s27_s20 }
   0x5   :  { %s3608_s21 = smov 256   ;;  %s3609_s22 = smov 16  }
   0x6   :  { %52 = dma.hbm_to_vmem [thread:$0]  %s45_s15, 16384, %s47_s17, [#allocation6], %s3608_s21, %s3608_s21, %s3609_s22  }
   0x7   :  { %s3610_s23 = smov [#allocation2]   ;;  %s57_s27 = sshll.u32 %s4931_s4, 4  ;;  %s58_s27 = int_to_ptr.hbm [resolvable:$true] %s57_s27 }
   0x8   :  { %s29_s24 = sshll.u32 %s3610_s23, 4  ;;  %s3611_s3 = smov [#allocation7]   ;;  %s30_s24 = int_to_ptr.vmem [resolvable:$true] %s29_s24 }
   0x9   :  { %35 = dma.hbm_to_vmem [thread:$0]  %s28_s20, 6400, %s30_s24, [#allocation3], %s3608_s21, %s3608_s21, %s3609_s22  }
   0xa   :  { %s59_s28 = sshll.u32 %s3611_s3, 4  ;;  %s80_s0 = sshll.u32 %s4937_s10, 4  ;;  %s60_s28 = int_to_ptr.vmem [resolvable:$true] %s59_s28  ;;  %s81_s0 = int_to_ptr.hbm [resolvable:$true] %s80_s0 }
   0xb   :  { %s3612_s16 = smov 128   ;;  %s3613_s18 = smov 8  }
   0xc   :  { %65 = dma.hbm_to_vmem [thread:$0]  %s58_s27, 4096, %s60_s28, [#allocation6], %s3612_s16, %s3612_s16, %s3613_s18  }
   0xd   :  { %s3614_s15 = smov [#allocation8]  }
   0xe   :  { %s82_s17 = sshll.u32 %s3614_s15, 4  ;;  %s83_s17 = int_to_ptr.vmem [resolvable:$true] %s82_s17 }
   0xf   :  { %88 = dma.hbm_to_vmem [thread:$0]  %s81_s0, 2048, %s83_s17, [#allocation9], %s3612_s16, %s3612_s16, %s3613_s18  }
  0x10   :  { %3599 = dma.done.wait [#allocation3], 6400  }
  0x11   :  { %3600 = vsyncadd [#allocation3], 4294960896 }
  0x12   :  { %3601 = dma.done.wait [#allocation6], 20480  }
  0x13   :  { %3602 = vsyncadd [#allocation6], 4294946816 }
  0x14   :  { %3603 = dma.done.wait [#allocation9], 2048  }
  0x15   :  { %3604 = vsyncadd [#allocation9], 4294965248  ;;  %v176_v0 = vld [vmem:[%s4928_s1 + $0x78] sm:$0xff]  ;;  %v175_v1 = vld [vmem:[%s4928_s1 + $0x70] sm:$0xff]  ;;  %vm414_vm0 = vcmask 588800   ;;  %vm569_vm1 = vcmask 130048  }
  0x16   :  { %v192_v2 = vld [vmem:[%s4928_s1 + $0xf8] sm:$0xff]  ;;  %197 = vmatpush.msra.mxu0 %v176_v0  ;;  %v191_v3 = vld [vmem:[%s4928_s1 + $0xf0] sm:$0xff]  ;;  %v174_v4 = vld [vmem:[%s4928_s1 + $0x68] sm:$0xff]  ;;  %vm2443_vm2 = vcmask 261120   ;;  %vm2932_vm3 = vcmask 64512   ;;  %s3616_s0 = smov 127  }
  0x17   :  { %289 = vmatpush.msra.mxu1 %v192_v2  ;;  %v190_v5 = vld [vmem:[%s4928_s1 + $0xe8] sm:$0xff]  ;;  %v173_v6 = vld [vmem:[%s4928_s1 + $0x60] sm:$0xff]  ;;  %v172_v8 = vld [vmem:[%s4928_s1 + $0x58] sm:$0xff]  ;;  %vm3194_vm4 = vcmask 41984   ;;  %s3224_s15 = sshll.u32 %s4941_s14, 4  ;;  %s3225_s15 = int_to_ptr.hbm [resolvable:$true] %s3224_s15 }
  0x18   :  { %198 = vmatpush.msra.mxu0 %v175_v1  ;;  %v189_v7 = vld [vmem:[%s4928_s1 + $0xe0] sm:$0xff]  ;;  %v188_v9 = vld [vmem:[%s4928_s1 + $0xd8] sm:$0xff]  ;;  %v171_v10 = vld [vmem:[%s4928_s1 + $0x50] sm:$0xff] }
  0x19   :  { %290 = vmatpush.msra.mxu1 %v191_v3  ;;  %v187_v11 = vld [vmem:[%s4928_s1 + $0xd0] sm:$0xff]  ;;  %v170_v12 = vld [vmem:[%s4928_s1 + $0x48] sm:$0xff]  ;;  %v169_v14 = vld [vmem:[%s4928_s1 + $0x40] sm:$0xff] }
  0x1a   :  { %199 = vmatpush.msra.mxu0 %v174_v4  ;;  %v186_v13 = vld [vmem:[%s4928_s1 + $0xc8] sm:$0xff]  ;;  %v185_v15 = vld [vmem:[%s4928_s1 + $0xc0] sm:$0xff]  ;;  %v168_v16 = vld [vmem:[%s4928_s1 + $0x38] sm:$0xff] }
  0x1b   :  { %291 = vmatpush.msra.mxu1 %v190_v5  ;;  %v184_v17 = vld [vmem:[%s4928_s1 + $0xb8] sm:$0xff]  ;;  %v167_v18 = vld [vmem:[%s4928_s1 + $0x30] sm:$0xff]  ;;  %v166_v20 = vld [vmem:[%s4928_s1 + $0x28] sm:$0xff] }
  0x1c   :  { %200 = vmatpush.msra.mxu0 %v173_v6  ;;  %v183_v19 = vld [vmem:[%s4928_s1 + $0xb0] sm:$0xff]  ;;  %v182_v21 = vld [vmem:[%s4928_s1 + $0xa8] sm:$0xff]  ;;  %v165_v22 = vld [vmem:[%s4928_s1 + $0x20] sm:$0xff] }
  0x1d   :  { %292 = vmatpush.msra.mxu1 %v189_v7  ;;  %v181_v23 = vld [vmem:[%s4928_s1 + $0xa0] sm:$0xff]  ;;  %v164_v24 = vld [vmem:[%s4928_s1 + $0x18] sm:$0xff]  ;;  %v163_v26 = vld [vmem:[%s4928_s1 + $0x10] sm:$0xff] }
  0x1e   :  { %201 = vmatpush.msra.mxu0 %v172_v8  ;;  %v180_v25 = vld [vmem:[%s4928_s1 + $0x98] sm:$0xff]  ;;  %v179_v27 = vld [vmem:[%s4928_s1 + $0x90] sm:$0xff]  ;;  %v162_v28 = vld [vmem:[%s4928_s1 + $0x8] sm:$0xff] }
  0x1f   :  { %293 = vmatpush.msra.mxu1 %v188_v9  ;;  %v178_v29 = vld [vmem:[%s4928_s1 + $0x88] sm:$0xff]  ;;  %v161_v30 = vld [vmem:[%s4928_s1] sm:$0xff]  ;;  %v113_v34 = vld [vmem:[#allocation2 + $0x10] sm:$0xff] }
  0x20   :  { %202 = vmatpush.msra.mxu0 %v171_v10  ;;  %v177_v31 = vld [vmem:[%s4928_s1 + $0x80] sm:$0xff]  ;;  %v112_v33 = vld [vmem:[#allocation2 + $0x8] sm:$0xff]  ;;  %v114_v35 = vld [vmem:[#allocation2 + $0x18] sm:$0xff] }
  0x21   :  { %294 = vmatpush.msra.mxu1 %v187_v11  ;;  %v111_v32 = vld [vmem:[#allocation2] sm:$0xff]  ;;  %v116_v37 = vld [vmem:[#allocation2 + $0x28] sm:$0xff]  ;;  %v117_v38 = vld [vmem:[#allocation2 + $0x30] sm:$0xff] }
  0x22   :  { %203 = vmatpush.msra.mxu0 %v170_v12  ;;  %v115_v36 = vld [vmem:[#allocation2 + $0x20] sm:$0xff]  ;;  %v118_v39 = vld [vmem:[#allocation2 + $0x38] sm:$0xff]  ;;  %v120_v41 = vld [vmem:[#allocation2 + $0x48] sm:$0xff] }
  0x23   :  { %295 = vmatpush.msra.mxu1 %v186_v13  ;;  %v119_v40 = vld [vmem:[#allocation2 + $0x40] sm:$0xff]  ;;  %v121_v42 = vld [vmem:[#allocation2 + $0x50] sm:$0xff]  ;;  %v122_v43 = vld [vmem:[#allocation2 + $0x58] sm:$0xff] }
  0x24   :  { %204 = vmatpush.msra.mxu0 %v169_v14  ;;  %v123_v44 = vld [vmem:[#allocation2 + $0x60] sm:$0xff]  ;;  %v124_v45 = vld [vmem:[#allocation2 + $0x68] sm:$0xff]  ;;  %v125_v46 = vld [vmem:[#allocation2 + $0x70] sm:$0xff] }
  0x25   :  { %296 = vmatpush.msra.mxu1 %v185_v15  ;;  %v126_v47 = vld [vmem:[#allocation2 + $0x78] sm:$0xff]  ;;  %v127_v48 = vld [vmem:[#allocation2 + $0x80] sm:$0xff]  ;;  %v128_v49 = vld [vmem:[#allocation2 + $0x88] sm:$0xff] }
  0x26   :  { %205 = vmatpush.msra.mxu0 %v168_v16  ;;  %v129_v50 = vld [vmem:[#allocation2 + $0x90] sm:$0xff]  ;;  %v130_v51 = vld [vmem:[#allocation2 + $0x98] sm:$0xff]  ;;  %v131_v52 = vld [vmem:[#allocation2 + $0xa0] sm:$0xff] }
  0x27   :  { %297 = vmatpush.msra.mxu1 %v184_v17  ;;  %v132_v53 = vld [vmem:[#allocation2 + $0xa8] sm:$0xff]  ;;  %v133_v54 = vld [vmem:[#allocation2 + $0xb0] sm:$0xff]  ;;  %v134_v55 = vld [vmem:[#allocation2 + $0xb8] sm:$0xff] }
  0x28   :  { %206 = vmatpush.msra.mxu0 %v167_v18  ;;  %v135_v56 = vld [vmem:[#allocation2 + $0xc0] sm:$0xff]  ;;  %v136_v57 = vld [vmem:[#allocation2 + $0xc8] sm:$0xff]  ;;  %v137_v58 = vld [vmem:[#allocation2 + $0xd0] sm:$0xff] }
  0x29   :  { %298 = vmatpush.msra.mxu1 %v183_v19  ;;  %v138_v59 = vld [vmem:[#allocation2 + $0xd8] sm:$0xff]  ;;  %v139_v60 = vld [vmem:[#allocation2 + $0xe0] sm:$0xff]  ;;  %v140_v61 = vld [vmem:[#allocation2 + $0xe8] sm:$0xff] }
  0x2a   :  { %207 = vmatpush.msra.mxu0 %v166_v20  ;;  %v141_v62 = vld [vmem:[#allocation2 + $0xf0] sm:$0xff]  ;;  %v142_v63 = vld [vmem:[#allocation2 + $0xf8] sm:$0xff]  ;;  %v143_v2 = vld [vmem:[#allocation2 + $0x100] sm:$0xff] }
  0x2b   :  { %299 = vmatpush.msra.mxu1 %v182_v21  ;;  %v144_v3 = vld [vmem:[#allocation2 + $0x108] sm:$0xff]  ;;  %v145_v6 = vld [vmem:[#allocation2 + $0x110] sm:$0xff]  ;;  %v146_v7 = vld [vmem:[#allocation2 + $0x118] sm:$0xff] }
  0x2c   :  { %208 = vmatpush.msra.mxu0 %v165_v22  ;;  %v147_v10 = vld [vmem:[#allocation2 + $0x120] sm:$0xff]  ;;  %v148_v11 = vld [vmem:[#allocation2 + $0x128] sm:$0xff]  ;;  %v149_v14 = vld [vmem:[#allocation2 + $0x130] sm:$0xff] }
  0x2d   :  { %300 = vmatpush.msra.mxu1 %v181_v23  ;;  %v150_v15 = vld [vmem:[#allocation2 + $0x138] sm:$0xff]  ;;  %v151_v18 = vld [vmem:[#allocation2 + $0x140] sm:$0xff]  ;;  %v152_v19 = vld [vmem:[#allocation2 + $0x148] sm:$0xff] }
  0x2e   :  { %209 = vmatpush.msra.mxu0 %v164_v24  ;;  %v153_v22 = vld [vmem:[#allocation2 + $0x150] sm:$0xff]  ;;  %v154_v23 = vld [vmem:[#allocation2 + $0x158] sm:$0xff] }
  0x2f   :  { %301 = vmatpush.msra.mxu1 %v180_v25 }
  0x30   :  { %210 = vmatpush.msra.mxu0 %v163_v26  ;;  %v155_v26 = vld [vmem:[#allocation2 + $0x160] sm:$0xff] }
  0x31   :  { %302 = vmatpush.msra.mxu1 %v179_v27  ;;  %v156_v27 = vld [vmem:[#allocation2 + $0x168] sm:$0xff] }
  0x32   :  { %211 = vmatpush.msra.mxu0 %v162_v28 }
  0x33   :  { %303 = vmatpush.msra.mxu1 %v178_v29 }
  0x34   :  { %212 = vmatpush.msra.mxu0 %v161_v30  ;;  %v157_v30 = vld [vmem:[#allocation2 + $0x170] sm:$0xff] }
  0x35   :  { %304 = vmatpush.msra.mxu1 %v177_v31  ;;  %213 = vmatmul.f32.vlgmr.msra.gmra.mxu0 %v111_v32  ;;  %v158_v31 = vld [vmem:[#allocation2 + $0x178] sm:$0xff] }
  0x36   :  { %305 = vmatmul.f32.vlgmr.msra.gmra.mxu1 %v112_v33 }
  0x3d   :  { %216 = vmatmul.f32.gmra.mxu0 %v113_v34  ;;  %v159_v34 = vld [vmem:[#allocation2 + $0x180] sm:$0xff] }
  0x3e   :  { %308 = vmatmul.f32.gmra.mxu1 %v114_v35  ;;  %v160_v35 = vld [vmem:[#allocation2 + $0x188] sm:$0xff] }
  0x45   :  { %219 = vmatmul.f32.gmra.mxu0 %v115_v36 }
  0x46   :  { %311 = vmatmul.f32.gmra.mxu1 %v116_v37 }
  0x4d   :  { %222 = vmatmul.f32.gmra.mxu0 %v117_v38 }
  0x4e   :  { %314 = vmatmul.f32.gmra.mxu1 %v118_v39 }
  0x55   :  { %225 = vmatmul.f32.gmra.mxu0 %v119_v40 }
  0x56   :  { %317 = vmatmul.f32.gmra.mxu1 %v120_v41 }
  0x5d   :  { %228 = vmatmul.f32.gmra.mxu0 %v121_v42 }
  0x5e   :  { %320 = vmatmul.f32.gmra.mxu1 %v122_v43 }
  0x65   :  { %231 = vmatmul.f32.gmra.mxu0 %v123_v44 }
  0x66   :  { %323 = vmatmul.f32.gmra.mxu1 %v124_v45 }
  0x6d   :  { %234 = vmatmul.f32.gmra.mxu0 %v125_v46 }
  0x6e   :  { %326 = vmatmul.f32.gmra.mxu1 %v126_v47 }
  0x75   :  { %237 = vmatmul.f32.gmra.mxu0 %v127_v48  ;;  %v3835_v48 = vld [vmem:[%s4929_s2] ss:$0 sm:$0xff] }
  0x76   :  { %329 = vmatmul.f32.gmra.mxu1 %v128_v49 }
  0x7d   :  { %240 = vmatmul.f32.gmra.mxu0 %v129_v50 }
  0x7e   :  { %332 = vmatmul.f32.gmra.mxu1 %v130_v51 }
  0x85   :  { %243 = vmatmul.f32.gmra.mxu0 %v131_v52 }
  0x86   :  { %335 = vmatmul.f32.gmra.mxu1 %v132_v53 }
  0x8d   :  { %246 = vmatmul.f32.gmra.mxu0 %v133_v54 }
  0x8e   :  { %338 = vmatmul.f32.gmra.mxu1 %v134_v55 }
  0x95   :  { %249 = vmatmul.f32.gmra.mxu0 %v135_v56 }
  0x96   :  { %341 = vmatmul.f32.gmra.mxu1 %v136_v57 }
  0x9d   :  { %252 = vmatmul.f32.gmra.mxu0 %v137_v58 }
  0x9e   :  { %344 = vmatmul.f32.gmra.mxu1 %v138_v59 }
  0xa5   :  { %255 = vmatmul.f32.gmra.mxu0 %v139_v60 }
  0xa6   :  { %347 = vmatmul.f32.gmra.mxu1 %v140_v61 }
  0xad   :  { %258 = vmatmul.f32.gmra.mxu0 %v141_v62 }
  0xae   :  { %350 = vmatmul.f32.gmra.mxu1 %v142_v63 }
  0xb2   :  { %v3802_v0 = vpop.f32.mrf.mxu0 }
  0xb3   :  { %v3804_v1 = vpop.f32.mrf.mxu1 }
  0xb5   :  { %261 = vmatmul.f32.gmra.mxu0 %v143_v2 }
  0xb6   :  { %353 = vmatmul.f32.gmra.mxu1 %v144_v3 }
  0xba   :  { %v3806_v4 = vpop.f32.mrf.mxu0 }
  0xbb   :  { %v3808_v5 = vpop.f32.mrf.mxu1 }
  0xbd   :  { %264 = vmatmul.f32.gmra.mxu0 %v145_v6 }
  0xbe   :  { %356 = vmatmul.f32.gmra.mxu1 %v146_v7 }
  0xc2   :  { %v3810_v8 = vpop.f32.mrf.mxu0 }
  0xc3   :  { %v3812_v9 = vpop.f32.mrf.mxu1 }
  0xc5   :  { %267 = vmatmul.f32.gmra.mxu0 %v147_v10 }
  0xc6   :  { %359 = vmatmul.f32.gmra.mxu1 %v148_v11 }
  0xca   :  { %v3814_v12 = vpop.f32.mrf.mxu0 }
  0xcb   :  { %v3816_v13 = vpop.f32.mrf.mxu1 }
  0xcd   :  { %270 = vmatmul.f32.gmra.mxu0 %v149_v14 }
  0xce   :  { %362 = vmatmul.f32.gmra.mxu1 %v150_v15 }
  0xd2   :  { %v3818_v16 = vpop.f32.mrf.mxu0 }
  0xd3   :  { %v3820_v17 = vpop.f32.mrf.mxu1 }
  0xd5   :  { %273 = vmatmul.f32.gmra.mxu0 %v151_v18 }
  0xd6   :  { %365 = vmatmul.f32.gmra.mxu1 %v152_v19 }
  0xda   :  { %v3822_v20 = vpop.f32.mrf.mxu0 }
  0xdb   :  { %v3824_v21 = vpop.f32.mrf.mxu1 }
  0xdd   :  { %276 = vmatmul.f32.gmra.mxu0 %v153_v22 }
  0xde   :  { %368 = vmatmul.f32.gmra.mxu1 %v154_v23 }
  0xe2   :  { %v3826_v24 = vpop.f32.mrf.mxu0 }
  0xe3   :  { %v3828_v25 = vpop.f32.mrf.mxu1  ;;  %v233_v22 = vadd.f32 %v3835_v48, %v3826_v24  ;;  %v227_v24 = vadd.f32 %v3835_v48, %v3818_v16  ;;  %v221_v16 = vadd.f32 %v3835_v48, %v3810_v8 }
  0xe5   :  { %279 = vmatmul.f32.gmra.mxu0 %v155_v26 }
  0xe6   :  { %371 = vmatmul.f32.gmra.mxu1 %v156_v27 }
  0xea   :  { %v235_v28 = vpop.f32.mrf.mxu0 }
  0xeb   :  { %v3830_v29 = vpop.f32.mrf.mxu1  ;;  %v236_v15 = vadd.f32 %v3835_v48, %v235_v28 }
  0xed   :  { %282 = vmatmul.f32.gmra.mxu0 %v157_v30  ;;  %v230_v30 = vadd.f32 %v3835_v48, %v3822_v20  ;;  %v224_v20 = vadd.f32 %v3835_v48, %v3814_v12 }
  0xee   :  { %374 = vmatmul.f32.gmra.mxu1 %v158_v31  ;;  %v328_v31 = vadd.f32 %v3830_v29, %v236_v15 }
  0xef   :  { %v322_v29 = vadd.f32 %v3824_v21, %v230_v30 }
  0xf1   :  { %v3922_v8 = vmax.f32 %v322_v29, 0.0 }
  0xf2   :  { %v238_v32 = vpop.f32.mrf.mxu0 }
  0xf3   :  { %v330_v33 = vpop.f32.mrf.mxu1  ;;  %v239_v10 = vadd.f32 %v3835_v48, %v238_v32 }
  0xf5   :  { %285 = vmatmul.f32.gmra.mxu0 %v159_v34  ;;  %v331_v23 = vadd.f32 %v330_v33, %v239_v10  ;;  %v325_v33 = vadd.f32 %v3828_v25, %v233_v22  ;;  %v319_v25 = vadd.f32 %v3820_v17, %v227_v24  ;;  %v215_v17 = vadd.f32 %v3835_v48, %v3802_v0 }
  0xf6   :  { %377 = vmatmul.f32.gmra.mxu1 %v160_v35  ;;  %v3902_v35 = vmax.f32 %v328_v31, 0.0 }
  0xf7   :  { %v3894_v34 = vmax.f32 %v331_v23, 0.0  ;;  %v307_v0 = vadd.f32 %v3804_v1, %v215_v17 }
  0xf9   :  { %v3956_v1 = vmax.f32 %v307_v0, 0.0 }
  0xfa   :  { %v241_v36 = vpop.f32.mrf.mxu0 }
  0xfb   :  { %v333_v37 = vpop.f32.mrf.mxu1  ;;  %v242_v3 = vadd.f32 %v3835_v48, %v241_v36  ;;  %v3910_v36 = vmax.f32 %v325_v33, 0.0 }
  0xfd   :  { %v334_v18 = vadd.f32 %v333_v37, %v242_v3  ;;  %v218_v37 = vadd.f32 %v3835_v48, %v3806_v4 }
  0xff   :  { %v3886_v32 = vmax.f32 %v334_v18, 0.0  ;;  %v310_v4 = vadd.f32 %v3808_v5, %v218_v37 }
 0x102   :  { %v244_v38 = vpop.f32.mrf.mxu0 }
 0x103   :  { %v336_v39 = vpop.f32.mrf.mxu1  ;;  %v245_v60 = vadd.f32 %v3835_v48, %v244_v38  ;;  %v316_v38 = vadd.f32 %v3816_v13, %v224_v20 }
 0x105   :  { %v337_v11 = vadd.f32 %v336_v39, %v245_v60  ;;  %v313_v39 = vadd.f32 %v3812_v9, %v221_v16  ;;  %v3936_v13 = vmax.f32 %v316_v38, 0.0  ;;  %v412_v60 = vld [vmem:[#allocation5 + $0x30] sm:$0xff] }
 0x107   :  { %v3874_v26 = vmax.f32 %v337_v11, 0.0  ;;  %v3942_v9 = vmax.f32 %v313_v39, 0.0 }
 0x10a   :  { %v247_v40 = vpop.f32.mrf.mxu0 }
 0x10b   :  { %v339_v41 = vpop.f32.mrf.mxu1  ;;  %v248_v57 = vadd.f32 %v3835_v48, %v247_v40  ;;  %v3930_v40 = vmax.f32 %v319_v25, 0.0 }
 0x10d   :  { %v340_v6 = vadd.f32 %v339_v41, %v248_v57 }
 0x10f   :  { %v3867_v19 = vmax.f32 %v340_v6, 0.0 }
 0x112   :  { %v250_v42 = vpop.f32.mrf.mxu0 }
 0x113   :  { %v342_v43 = vpop.f32.mrf.mxu1  ;;  %v251_v54 = vadd.f32 %v3835_v48, %v250_v42  ;;  %v3951_v42 = vmax.f32 %v310_v4, 0.0 }
 0x115   :  { %v343_v61 = vadd.f32 %v342_v43, %v251_v54  ;;  %v987_v43 = vld [vmem:[#allocation7 + $0x48] sm:$0xff] }
 0x117   :  { %v3861_v14 = vmax.f32 %v343_v61, 0.0  ;;  %v1040_v61 = vld [vmem:[#allocation5 + $0x170] sm:$0xff] }
 0x11a   :  { %v253_v44 = vpop.f32.mrf.mxu0 }
 0x11b   :  { %v345_v45 = vpop.f32.mrf.mxu1  ;;  %v254_v52 = vadd.f32 %v3835_v48, %v253_v44  ;;  %v488_v44 = vld [vmem:[#allocation5 + $0x40] sm:$0xff] }
 0x11d   :  { %v346_v58 = vadd.f32 %v345_v45, %v254_v52  ;;  %v406_v45 = vld [vmem:[#allocation5] sm:$0xff]  ;;  %v1036_v52 = vld [vmem:[#allocation5 + $0x150] sm:$0xff] }
 0x11f   :  { %v3855_v7 = vmax.f32 %v346_v58, 0.0 }
 0x122   :  { %v256_v46 = vpop.f32.mrf.mxu0 }
 0x123   :  { %v348_v47 = vpop.f32.mrf.mxu1  ;;  %v257_v49 = vadd.f32 %v3835_v48, %v256_v46  ;;  %v986_v46 = vld [vmem:[#allocation7 + $0x40] sm:$0xff] }
 0x125   :  { %v349_v55 = vadd.f32 %v348_v47, %v257_v49  ;;  %v1034_v47 = vld [vmem:[#allocation5 + $0x140] sm:$0xff] }
 0x127   :  { %v3845_v62 = vmax.f32 %v349_v55, 0.0  ;;  %v410_v55 = vld [vmem:[#allocation5 + $0x20] sm:$0xff] }
 0x12a   :  { %v259_v50 = vpop.f32.mrf.mxu0 }
 0x12b   :  { %v351_v51 = vpop.f32.mrf.mxu1  ;;  %v260_v53 = vadd.f32 %v3835_v48, %v259_v50 }
 0x12d   :  { %v352_v56 = vadd.f32 %v351_v51, %v260_v53  ;;  %v408_v51 = vld [vmem:[#allocation5 + $0x10] sm:$0xff] }
 0x12f   :  { %v3842_v59 = vmax.f32 %v352_v56, 0.0  ;;  %v1038_v56 = vld [vmem:[#allocation5 + $0x160] sm:$0xff] }
 0x131   :  { %427 = vmatpush.msra.mxu2 %v3842_v59  ;;  %508 = vmatpush.msrb.mxu0 %v3842_v59 }
 0x132   :  { %1054 = vmatpush.msrb.mxu1 %v3842_v59  ;;  %v3850_v63 = vpop.f32.mrf.mxu0 }
 0x133   :  { %v3852_v2 = vpop.f32.mrf.mxu1  ;;  %428 = vmatpush.msra.mxu2 %v3845_v62  ;;  %509 = vmatpush.msrb.mxu0 %v3845_v62 }
 0x134   :  { %1055 = vmatpush.msrb.mxu1 %v3845_v62 }
 0x135   :  { %429 = vmatpush.msra.mxu2 %v3855_v7  ;;  %510 = vmatpush.msrb.mxu0 %v3855_v7 }
 0x136   :  { %1056 = vmatpush.msrb.mxu1 %v3855_v7 }
 0x137   :  { %430 = vmatpush.msra.mxu2 %v3861_v14  ;;  %511 = vmatpush.msrb.mxu0 %v3861_v14 }
 0x138   :  { %1057 = vmatpush.msrb.mxu1 %v3861_v14 }
 0x139   :  { %431 = vmatpush.msra.mxu2 %v3867_v19  ;;  %512 = vmatpush.msrb.mxu0 %v3867_v19 }
 0x13a   :  { %1058 = vmatpush.msrb.mxu1 %v3867_v19  ;;  %v3879_v27 = vpop.f32.mrf.mxu0 }
 0x13b   :  { %v3881_v28 = vpop.f32.mrf.mxu1  ;;  %432 = vmatpush.msra.mxu2 %v3874_v26  ;;  %513 = vmatpush.msrb.mxu0 %v3874_v26  ;;  %v266_v39 = vadd.f32 %v3835_v48, %v3879_v27 }
 0x13c   :  { %1059 = vmatpush.msrb.mxu1 %v3874_v26 }
 0x13d   :  { %433 = vmatpush.msra.mxu2 %v3886_v32  ;;  %514 = vmatpush.msrb.mxu0 %v3886_v32  ;;  %v358_v27 = vadd.f32 %v3881_v28, %v266_v39 }
 0x13e   :  { %1060 = vmatpush.msrb.mxu1 %v3886_v32 }
 0x13f   :  { %434 = vmatpush.msra.mxu2 %v3894_v34  ;;  %515 = vmatpush.msrb.mxu0 %v3894_v34 }
 0x140   :  { %1061 = vmatpush.msrb.mxu1 %v3894_v34 }
 0x141   :  { %435 = vmatpush.msra.mxu2 %v3902_v35  ;;  %516 = vmatpush.msrb.mxu0 %v3902_v35 }
 0x142   :  { %1062 = vmatpush.msrb.mxu1 %v3902_v35  ;;  %v3915_v12 = vpop.f32.mrf.mxu0 }
 0x143   :  { %v3917_v21 = vpop.f32.mrf.mxu1  ;;  %436 = vmatpush.msra.mxu2 %v3910_v36  ;;  %517 = vmatpush.msrb.mxu0 %v3910_v36  ;;  %v269_v37 = vadd.f32 %v3835_v48, %v3915_v12  ;;  %v263_v12 = vadd.f32 %v3835_v48, %v3850_v63 }
 0x144   :  { %1063 = vmatpush.msrb.mxu1 %v3910_v36 }
 0x145   :  { %437 = vmatpush.msra.mxu2 %v3922_v8  ;;  %518 = vmatpush.msrb.mxu0 %v3922_v8 }
 0x146   :  { %1064 = vmatpush.msrb.mxu1 %v3922_v8 }
 0x147   :  { %438 = vmatpush.msra.mxu2 %v3930_v40  ;;  %519 = vmatpush.msrb.mxu0 %v3930_v40 }
 0x148   :  { %1065 = vmatpush.msrb.mxu1 %v3930_v40 }
 0x149   :  { %439 = vmatpush.msra.mxu2 %v3936_v13  ;;  %520 = vmatpush.msrb.mxu0 %v3936_v13 }
 0x14a   :  { %1066 = vmatpush.msrb.mxu1 %v3936_v13  ;;  %v3947_v41 = vpop.f32.mrf.mxu0 }
 0x14b   :  { %v3949_v5 = vpop.f32.mrf.mxu1  ;;  %440 = vmatpush.msra.mxu2 %v3942_v9  ;;  %521 = vmatpush.msrb.mxu0 %v3942_v9  ;;  %v272_v29 = vadd.f32 %v3835_v48, %v3947_v41  ;;  %v361_v41 = vadd.f32 %v3917_v21, %v269_v37  ;;  %v4029_v21 = vmax.f32 %v358_v27, 0.0 }
 0x14c   :  { %1067 = vmatpush.msrb.mxu1 %v3942_v9 }
 0x14d   :  { %441 = vmatpush.msra.mxu2 %v3951_v42  ;;  %522 = vmatpush.msrb.mxu0 %v3951_v42  ;;  %v364_v4 = vadd.f32 %v3949_v5, %v272_v29  ;;  %v4024_v63 = vmax.f32 %v361_v41, 0.0  ;;  %v860_v41 = vld [vmem:[#allocation7 + $0x38] sm:$0xff] }
 0x14e   :  { %1068 = vmatpush.msrb.mxu1 %v3951_v42 }
 0x14f   :  { %442 = vmatpush.msra.mxu2 %v3956_v1  ;;  %523 = vmatpush.msrb.mxu0 %v3956_v1  ;;  %v4018_v5 = vmax.f32 %v364_v4, 0.0  ;;  %v654_v4 = vld [vmem:[#allocation5 + $0x88] sm:$0xff] }
 0x150   :  { %1069 = vmatpush.msrb.mxu1 %v3956_v1  ;;  %524 = vmatmul.f32.vlgmr.msrb.gmra.mxu0 %v488_v44  ;;  %v486_v44 = vld [vmem:[#allocation7 + $0x8] sm:$0xff] }
 0x151   :  { %1014 = vmatpush.msra.mxu0 %v987_v43  ;;  %443 = vmatmul.f32.vlgmr.msra.gmra.mxu2 %v406_v45  ;;  %v1368_v45 = vld [vmem:[#allocation7 + $0x78] sm:$0xff] }
 0x152   :  { %v274_v49 = vpop.f32.mrf.mxu0  ;;  %1070 = vmatmul.f32.vlgmr.msrb.gmra.mxu1 %v1034_v47  ;;  %v485_v47 = vld [vmem:[#allocation7] sm:$0xff] }
 0x153   :  { %1015 = vmatpush.msra.mxu0 %v986_v46  ;;  %v366_v50 = vpop.f32.mrf.mxu1  ;;  %v275_v24 = vadd.f32 %v3835_v48, %v274_v49  ;;  %v489_v46 = vld [vmem:[#allocation5 + $0x48] sm:$0xff]  ;;  %v1367_v49 = vld [vmem:[#allocation7 + $0x70] sm:$0xff] }
 0x155   :  { %1181 = vmatpush.msrb.mxu0 %v3842_v59  ;;  %v367_v38 = vadd.f32 %v366_v50, %v275_v24  ;;  %v1162_v50 = vld [vmem:[#allocation5 + $0x188] sm:$0xff] }
 0x157   :  { %1182 = vmatpush.msrb.mxu0 %v3845_v62  ;;  %v4012_v43 = vmax.f32 %v367_v38, 0.0 }
 0x159   :  { %1183 = vmatpush.msrb.mxu0 %v3855_v7  ;;  %446 = vmatmul.f32.gmra.mxu2 %v408_v51  ;;  %v409_v51 = vld [vmem:[#allocation5 + $0x18] sm:$0xff] }
 0x15a   :  { %v277_v53 = vpop.f32.mrf.mxu0  ;;  %1073 = vmatmul.f32.gmra.mxu1 %v1036_v52  ;;  %v411_v52 = vld [vmem:[#allocation5 + $0x28] sm:$0xff] }
 0x15b   :  { %1184 = vmatpush.msrb.mxu0 %v3861_v14  ;;  %v369_v54 = vpop.f32.mrf.mxu1  ;;  %v278_v23 = vadd.f32 %v3835_v48, %v277_v53  ;;  %v491_v53 = vld [vmem:[#allocation5 + $0x58] sm:$0xff] }
 0x15d   :  { %1185 = vmatpush.msrb.mxu0 %v3867_v19  ;;  %v370_v16 = vadd.f32 %v369_v54, %v278_v23  ;;  %v413_v54 = vld [vmem:[#allocation5 + $0x38] sm:$0xff] }
 0x15f   :  { %1186 = vmatpush.msrb.mxu0 %v3874_v26  ;;  %v4004_v0 = vmax.f32 %v370_v16, 0.0 }
 0x161   :  { %1187 = vmatpush.msrb.mxu0 %v3886_v32  ;;  %449 = vmatmul.f32.gmra.mxu2 %v410_v55  ;;  %v490_v55 = vld [vmem:[#allocation5 + $0x50] sm:$0xff] }
 0x162   :  { %v280_v57 = vpop.f32.mrf.mxu0  ;;  %1076 = vmatmul.f32.gmra.mxu1 %v1038_v56  ;;  %v492_v56 = vld [vmem:[#allocation5 + $0x60] sm:$0xff] }
 0x163   :  { %1188 = vmatpush.msrb.mxu0 %v3894_v34  ;;  %v372_v58 = vpop.f32.mrf.mxu1  ;;  %v281_v18 = vadd.f32 %v3835_v48, %v280_v57  ;;  %v494_v57 = vld [vmem:[#allocation5 + $0x70] sm:$0xff] }
 0x165   :  { %1189 = vmatpush.msrb.mxu0 %v3902_v35  ;;  %v373_v33 = vadd.f32 %v372_v58, %v281_v18  ;;  %v568_v58 = vld [vmem:[#allocation7 + $0x18] sm:$0xff] }
 0x167   :  { %1190 = vmatpush.msrb.mxu0 %v3910_v36  ;;  %v3996_v17 = vmax.f32 %v373_v33, 0.0 }
 0x169   :  { %1191 = vmatpush.msrb.mxu0 %v3922_v8  ;;  %452 = vmatmul.f32.gmra.mxu2 %v412_v60  ;;  %v567_v60 = vld [vmem:[#allocation7 + $0x10] sm:$0xff] }
 0x16a   :  { %v283_v3 = vpop.f32.mrf.mxu0  ;;  %1079 = vmatmul.f32.gmra.mxu1 %v1040_v61  ;;  %v493_v61 = vld [vmem:[#allocation5 + $0x68] sm:$0xff] }
 0x16b   :  { %1192 = vmatpush.msrb.mxu0 %v3930_v40  ;;  %v375_v6 = vpop.f32.mrf.mxu1  ;;  %v284_v10 = vadd.f32 %v3835_v48, %v283_v3  ;;  %v495_v3 = vld [vmem:[#allocation5 + $0x78] sm:$0xff] }
 0x16d   :  { %1193 = vmatpush.msrb.mxu0 %v3936_v13  ;;  %v376_v30 = vadd.f32 %v375_v6, %v284_v10 }
 0x16f   :  { %1194 = vmatpush.msrb.mxu0 %v3942_v9  ;;  %v3989_v25 = vmax.f32 %v376_v30, 0.0 }
 0x171   :  { %1195 = vmatpush.msrb.mxu0 %v3951_v42 }
 0x172   :  { %v286_v11 = vpop.f32.mrf.mxu0 }
 0x173   :  { %1196 = vmatpush.msrb.mxu0 %v3956_v1  ;;  %v378_v15 = vpop.f32.mrf.mxu1  ;;  %v287_v22 = vadd.f32 %v3835_v48, %v286_v11  ;;  %v355_v48 = vadd.f32 %v3852_v2, %v263_v12  ;;  %v407_v2 = vld [vmem:[#allocation5 + $0x8] sm:$0xff] }
 0x175   :  { %v379_v31 = vadd.f32 %v378_v15, %v287_v22  ;;  %v4034_v28 = vmax.f32 %v355_v48, 0.0  ;;  %v859_v48 = vld [vmem:[#allocation7 + $0x30] sm:$0xff] }
 0x177   :  { %v3985_v20 = vmax.f32 %v379_v31, 0.0 }
 0x179   :  { %463 = vmatpush.msra.mxu3 %v3985_v20  ;;  %544 = vmatpush.msrb.mxu2 %v3985_v20 }
 0x17a   :  { %1217 = vmatpush.msra.mxu1 %v3985_v20 }
 0x17b   :  { %464 = vmatpush.msra.mxu3 %v3989_v25  ;;  %545 = vmatpush.msrb.mxu2 %v3989_v25 }
 0x17c   :  { %1218 = vmatpush.msra.mxu1 %v3989_v25 }
 0x17d   :  { %465 = vmatpush.msra.mxu3 %v3996_v17  ;;  %546 = vmatpush.msrb.mxu2 %v3996_v17 }
 0x17e   :  { %1219 = vmatpush.msra.mxu1 %v3996_v17 }
 0x17f   :  { %466 = vmatpush.msra.mxu3 %v4004_v0  ;;  %547 = vmatpush.msrb.mxu2 %v4004_v0 }
 0x180   :  { %1220 = vmatpush.msra.mxu1 %v4004_v0 }
 0x181   :  { %467 = vmatpush.msra.mxu3 %v4012_v43  ;;  %548 = vmatpush.msrb.mxu2 %v4012_v43 }
 0x182   :  { %1221 = vmatpush.msra.mxu1 %v4012_v43 }
 0x183   :  { %468 = vmatpush.msra.mxu3 %v4018_v5  ;;  %549 = vmatpush.msrb.mxu2 %v4018_v5 }
 0x184   :  { %1222 = vmatpush.msra.mxu1 %v4018_v5 }
 0x185   :  { %469 = vmatpush.msra.mxu3 %v4024_v63  ;;  %550 = vmatpush.msrb.mxu2 %v4024_v63 }
 0x186   :  { %1223 = vmatpush.msra.mxu1 %v4024_v63 }
 0x187   :  { %470 = vmatpush.msra.mxu3 %v4029_v21  ;;  %551 = vmatpush.msrb.mxu2 %v4029_v21 }
 0x188   :  { %1224 = vmatpush.msra.mxu1 %v4029_v21 }
 0x189   :  { %471 = vmatpush.msra.mxu3 %v4034_v28  ;;  %552 = vmatpush.msrb.mxu2 %v4034_v28 }
 0x18a   :  { %1225 = vmatpush.msra.mxu1 %v4034_v28  ;;  %3236 = vmatmul.msk.f32.vlgmr.msra.gmra.mxu3 %vm414_vm0, %v407_v2  ;;  %v656_v2 = vld [vmem:[#allocation5 + $0x98] sm:$0xff] }
 0x18b   :  { %3433 = vmatpush.msrb.mxu3 %v3842_v59  ;;  %637 = vmatpush.msra.mxu2 %v486_v44  ;;  %v733_v44 = vld [vmem:[#allocation7 + $0x28] sm:$0xff] }
 0x18c   :  { %1395 = vmatpush.msrb.mxu1 %v1368_v45  ;;  %3240 = vmatmul.msk.f32.vlgmr.msrb.gmra.mxu2 %vm414_vm0, %v489_v46  ;;  %v732_v46 = vld [vmem:[#allocation7 + $0x20] sm:$0xff] }
 0x18d   :  { %3434 = vmatpush.msrb.mxu3 %v3845_v62  ;;  %638 = vmatpush.msra.mxu2 %v485_v47  ;;  %v658_v47 = vld [vmem:[#allocation5 + $0xa8] sm:$0xff] }
 0x18e   :  { %1396 = vmatpush.msrb.mxu1 %v1367_v49 }
 0x18f   :  { %709 = vmatpush.msrb.mxu2 %v3985_v20  ;;  %3284 = vmatmul.msk.f32.vlgmr.msra.gmra.mxu1 %vm414_vm0, %v1162_v50  ;;  %v660_v50 = vld [vmem:[#allocation5 + $0xb8] sm:$0xff] }
 0x190   :  { %3435 = vmatpush.msrb.mxu3 %v3855_v7  ;;  %1562 = vmatpush.msra.mxu1 %v3842_v59 }
 0x191   :  { %710 = vmatpush.msrb.mxu2 %v3989_v25 }
 0x192   :  { %3436 = vmatpush.msrb.mxu3 %v3861_v14  ;;  %1563 = vmatpush.msra.mxu1 %v3845_v62 }
 0x193   :  { %711 = vmatpush.msrb.mxu2 %v3996_v17  ;;  %3237 = vmatmul.msk.f32.gmra.mxu3 %vm414_vm0, %v409_v51 }
 0x194   :  { %1564 = vmatpush.msra.mxu1 %v3855_v7  ;;  %3437 = vmatpush.msrb.mxu3 %v3867_v19 }
 0x195   :  { %712 = vmatpush.msrb.mxu2 %v4004_v0 }
 0x196   :  { %1565 = vmatpush.msra.mxu1 %v3861_v14  ;;  %3438 = vmatpush.msrb.mxu3 %v3874_v26 }
 0x197   :  { %713 = vmatpush.msrb.mxu2 %v4012_v43 }
 0x198   :  { %1566 = vmatpush.msra.mxu1 %v3867_v19  ;;  %3439 = vmatpush.msrb.mxu3 %v3886_v32 }
 0x199   :  { %714 = vmatpush.msrb.mxu2 %v4018_v5 }
 0x19a   :  { %1567 = vmatpush.msra.mxu1 %v3874_v26  ;;  %3440 = vmatpush.msrb.mxu3 %v3894_v34 }
 0x19b   :  { %715 = vmatpush.msrb.mxu2 %v4024_v63  ;;  %3238 = vmatmul.msk.f32.gmra.mxu3 %vm414_vm0, %v411_v52 }
 0x19c   :  { %1568 = vmatpush.msra.mxu1 %v3886_v32  ;;  %3441 = vmatpush.msrb.mxu3 %v3902_v35 }
 0x19d   :  { %716 = vmatpush.msrb.mxu2 %v4029_v21 }
 0x19e   :  { %1569 = vmatpush.msra.mxu1 %v3894_v34  ;;  %3442 = vmatpush.msrb.mxu3 %v3910_v36 }
 0x19f   :  { %717 = vmatpush.msrb.mxu2 %v4034_v28 }
 0x1a0   :  { %1570 = vmatpush.msra.mxu1 %v3902_v35  ;;  %3443 = vmatpush.msrb.mxu3 %v3922_v8 }
 0x1a1   :  { %3241 = vmatmul.msk.f32.gmra.mxu2 %vm414_vm0, %v491_v53  ;;  %v780_v53 = vld [vmem:[#allocation5 + $0xc0] sm:$0xff] }
 0x1a2   :  { %1571 = vmatpush.msra.mxu1 %v3910_v36  ;;  %3444 = vmatpush.msrb.mxu3 %v3930_v40 }
 0x1a3   :  { %3239 = vmatmul.msk.f32.gmra.mxu3 %vm414_vm0, %v413_v54 }
 0x1a4   :  { %1572 = vmatpush.msra.mxu1 %v3922_v8  ;;  %3445 = vmatpush.msrb.mxu3 %v3936_v13 }
 0x1a6   :  { %1573 = vmatpush.msra.mxu1 %v3930_v40  ;;  %3446 = vmatpush.msrb.mxu3 %v3942_v9 }
 0x1a8   :  { %1574 = vmatpush.msra.mxu1 %v3936_v13  ;;  %3447 = vmatpush.msrb.mxu3 %v3951_v42 }
 0x1aa   :  { %1575 = vmatpush.msra.mxu1 %v3942_v9  ;;  %3448 = vmatpush.msrb.mxu3 %v3956_v1 }
 0x1ab   :  { %527 = vmatmul.f32.vlgmr.msrb.gmra.mxu3 %v490_v55 }
 0x1ac   :  { %3449 = vmatpush.msra.mxu3 %v3985_v20  ;;  %1576 = vmatpush.msra.mxu1 %v3951_v42 }
 0x1ae   :  { %3450 = vmatpush.msra.mxu3 %v3989_v25  ;;  %1577 = vmatpush.msra.mxu1 %v3956_v1 }
 0x1b0   :  { %3451 = vmatpush.msra.mxu3 %v3996_v17 }
 0x1b2   :  { %3452 = vmatpush.msra.mxu3 %v4004_v0 }
 0x1b3   :  { %530 = vmatmul.f32.gmra.mxu3 %v492_v56  ;;  %v653_v56 = vld [vmem:[#allocation5 + $0x80] sm:$0xff] }
 0x1b4   :  { %3453 = vmatpush.msra.mxu3 %v4012_v43 }
 0x1b6   :  { %3454 = vmatpush.msra.mxu3 %v4018_v5 }
 0x1b8   :  { %3455 = vmatpush.msra.mxu3 %v4024_v63 }
 0x1ba   :  { %3456 = vmatpush.msra.mxu3 %v4029_v21 }
 0x1bb   :  { %533 = vmatmul.f32.gmra.mxu3 %v494_v57  ;;  %v655_v57 = vld [vmem:[#allocation5 + $0x90] sm:$0xff] }
 0x1bc   :  { %3457 = vmatpush.msra.mxu3 %v4034_v28 }
 0x1be   :  { %596 = vmatpush.msrb.mxu3 %v568_v58  ;;  %v657_v58 = vld [vmem:[#allocation5 + $0xa0] sm:$0xff] }
 0x1c0   :  { %597 = vmatpush.msrb.mxu3 %v567_v60  ;;  %v659_v60 = vld [vmem:[#allocation5 + $0xb0] sm:$0xff] }
 0x1c3   :  { %3242 = vmatmul.msk.f32.vlgmr.msra.gmra.mxu3 %vm414_vm0, %v493_v61 }
 0x1c4   :  { %673 = vmatpush.msra.mxu3 %v3842_v59 }
 0x1c6   :  { %674 = vmatpush.msra.mxu3 %v3845_v62 }
 0x1c8   :  { %675 = vmatpush.msra.mxu3 %v3855_v7 }
 0x1ca   :  { %676 = vmatpush.msra.mxu3 %v3861_v14 }
 0x1cb   :  { %3243 = vmatmul.msk.f32.gmra.mxu3 %vm414_vm0, %v495_v3 }
 0x1cc   :  { %677 = vmatpush.msra.mxu3 %v3867_v19 }
 0x1cd   :  { %v525_v22 = vpop.f32.mrf.mxu0 }
 0x1ce   :  { %678 = vmatpush.msra.mxu3 %v3874_v26 }
 0x1d0   :  { %679 = vmatpush.msra.mxu3 %v3886_v32 }
 0x1d2   :  { %680 = vmatpush.msra.mxu3 %v3894_v34 }
 0x1d4   :  { %681 = vmatpush.msra.mxu3 %v3902_v35  ;;  %v444_v6 = vpop.f32.mrf.mxu2 }
 0x1d6   :  { %682 = vmatpush.msra.mxu3 %v3910_v36 }
 0x1d8   :  { %683 = vmatpush.msra.mxu3 %v3922_v8 }
 0x1da   :  { %684 = vmatpush.msra.mxu3 %v3930_v40 }
 0x1dc   :  { %685 = vmatpush.msra.mxu3 %v3936_v13  ;;  %v447_v10 = vpop.f32.mrf.mxu2 }
 0x1de   :  { %686 = vmatpush.msra.mxu3 %v3942_v9 }
 0x1e0   :  { %687 = vmatpush.msra.mxu3 %v3951_v42 }
 0x1e2   :  { %688 = vmatpush.msra.mxu3 %v3956_v1 }
 0x1e4   :  { %v450_v11 = vpop.f32.mrf.mxu2 }
 0x1ec   :  { %v453_v15 = vpop.f32.mrf.mxu2 }
 0x20d   :  { %v473_v18 = vpop.f32.mrf.mxu3 }
 0x20e   :  { %v474_v23 = vadd.f32 %v473_v18, %v444_v6 }
 0x20f   :  { %v554_v30 = vpop.f32.mrf.mxu2 }
 0x210   :  { %3248 = vmatmul.msk.f32.vlgmr.msra.gmra.mxu2 %vm569_vm1, %v474_v23  ;;  %v555_v31 = vadd.f32 %v554_v30, %v525_v22 }
 0x211   :  { %800 = vmatpush.msra.mxu2 %v3842_v59 }
 0x212   :  { %3244 = vmatmul.msk.f32.vlgmr.msrb.gmra.mxu3 %vm569_vm1, %v555_v31 }
 0x213   :  { %801 = vmatpush.msra.mxu2 %v3845_v62  ;;  %760 = vmatpush.msrb.mxu3 %v733_v44  ;;  %v783_v44 = vld [vmem:[#allocation5 + $0xd8] sm:$0xff] }
 0x215   :  { %802 = vmatpush.msra.mxu2 %v3855_v7  ;;  %761 = vmatpush.msrb.mxu3 %v732_v46  ;;  %v787_v46 = vld [vmem:[#allocation5 + $0xf8] sm:$0xff] }
 0x216   :  { %v476_v24 = vpop.f32.mrf.mxu3 }
 0x217   :  { %v477_v33 = vadd.f32 %v476_v24, %v447_v10  ;;  %803 = vmatpush.msra.mxu2 %v3861_v14 }
 0x219   :  { %3249 = vmatmul.msk.f32.gmra.mxu2 %vm569_vm1, %v477_v33 }
 0x21a   :  { %804 = vmatpush.msra.mxu2 %v3867_v19 }
 0x21c   :  { %805 = vmatpush.msra.mxu2 %v3874_v26 }
 0x21e   :  { %806 = vmatpush.msra.mxu2 %v3886_v32  ;;  %v479_v29 = vpop.f32.mrf.mxu3 }
 0x21f   :  { %v480_v16 = vadd.f32 %v479_v29, %v450_v11 }
 0x220   :  { %807 = vmatpush.msra.mxu2 %v3894_v34 }
 0x221   :  { %3250 = vmatmul.msk.f32.gmra.mxu2 %vm569_vm1, %v480_v16  ;;  %v782_v16 = vld [vmem:[#allocation5 + $0xd0] sm:$0xff] }
 0x222   :  { %808 = vmatpush.msra.mxu2 %v3902_v35 }
 0x224   :  { %809 = vmatpush.msra.mxu2 %v3910_v36  ;;  %v557_v39 = vpop.f32.mrf.mxu2 }
 0x226   :  { %810 = vmatpush.msra.mxu2 %v3922_v8  ;;  %v482_v37 = vpop.f32.mrf.mxu3 }
 0x227   :  { %v483_v38 = vadd.f32 %v482_v37, %v453_v15 }
 0x228   :  { %811 = vmatpush.msra.mxu2 %v3930_v40 }
 0x229   :  { %3251 = vmatmul.msk.f32.gmra.mxu2 %vm569_vm1, %v483_v38 }
 0x22a   :  { %812 = vmatpush.msra.mxu2 %v3936_v13 }
 0x22c   :  { %813 = vmatpush.msra.mxu2 %v3942_v9 }
 0x22e   :  { %814 = vmatpush.msra.mxu2 %v3951_v42  ;;  %v528_v12 = vpop.f32.mrf.mxu3 }
 0x22f   :  { %v558_v27 = vadd.f32 %v557_v39, %v528_v12 }
 0x230   :  { %815 = vmatpush.msra.mxu2 %v3956_v1 }
 0x231   :  { %3252 = vmatmul.msk.f32.vlgmr.msrb.gmra.mxu2 %vm414_vm0, %v654_v4  ;;  %3245 = vmatmul.msk.f32.gmra.mxu3 %vm569_vm1, %v558_v27  ;;  %v784_v4 = vld [vmem:[#allocation5 + $0xe0] sm:$0xff]  ;;  %v786_v27 = vld [vmem:[#allocation5 + $0xf0] sm:$0xff] }
 0x232   :  { %887 = vmatpush.msrb.mxu2 %v860_v41 }
 0x234   :  { %888 = vmatpush.msrb.mxu2 %v859_v48 }
 0x236   :  { %v531_v45 = vpop.f32.mrf.mxu3 }
 0x239   :  { %3253 = vmatmul.msk.f32.gmra.mxu2 %vm414_vm0, %v656_v2  ;;  %v781_v2 = vld [vmem:[#allocation5 + $0xc8] sm:$0xff] }
 0x23e   :  { %v534_v49 = vpop.f32.mrf.mxu3 }
 0x241   :  { %3254 = vmatmul.msk.f32.gmra.mxu2 %vm414_vm0, %v658_v47  ;;  %v907_v47 = vld [vmem:[#allocation5 + $0x100] sm:$0xff] }
 0x246   :  { %v560_v51 = vpop.f32.mrf.mxu3 }
 0x247   :  { %v561_v52 = vadd.f32 %v560_v51, %v531_v45  ;;  %v785_v45 = vld [vmem:[#allocation5 + $0xe8] sm:$0xff]  ;;  %v909_v51 = vld [vmem:[#allocation5 + $0x110] sm:$0xff] }
 0x249   :  { %3255 = vmatmul.msk.f32.gmra.mxu2 %vm414_vm0, %v660_v50  ;;  %3246 = vmatmul.msk.f32.gmra.mxu3 %vm569_vm1, %v561_v52  ;;  %v1240_v50 = vld [vmem:[#allocation7 + $0x60] sm:$0xff] }
 0x24a   :  { %v911_v52 = vld [vmem:[#allocation5 + $0x120] sm:$0xff] }
 0x24e   :  { %v563_v54 = vpop.f32.mrf.mxu3 }
 0x24f   :  { %v564_v55 = vadd.f32 %v563_v54, %v534_v49  ;;  %v1241_v49 = vld [vmem:[#allocation7 + $0x68] sm:$0xff] }
 0x250   :  { %v1035_v54 = vld [vmem:[#allocation5 + $0x148] sm:$0xff] }
 0x251   :  { %816 = vmatmul.f32.vlgmr.msra.gmra.mxu2 %v780_v53  ;;  %3247 = vmatmul.msk.f32.gmra.mxu3 %vm569_vm1, %v564_v55  ;;  %v913_v53 = vld [vmem:[#allocation5 + $0x130] sm:$0xff]  ;;  %v1037_v55 = vld [vmem:[#allocation5 + $0x158] sm:$0xff] }
 0x252   :  { %963 = vmatpush.msra.mxu2 %v3985_v20 }
 0x254   :  { %964 = vmatpush.msra.mxu2 %v3989_v25 }
 0x256   :  { %965 = vmatpush.msra.mxu2 %v3996_v17 }
 0x258   :  { %966 = vmatpush.msra.mxu2 %v4004_v0 }
 0x259   :  { %689 = vmatmul.f32.vlgmr.msra.gmra.mxu3 %v653_v56  ;;  %819 = vmatmul.f32.gmra.mxu2 %v782_v16  ;;  %v1039_v56 = vld [vmem:[#allocation5 + $0x168] sm:$0xff] }
 0x25a   :  { %967 = vmatpush.msra.mxu2 %v4012_v43  ;;  %836 = vmatpush.msra.mxu3 %v3985_v20 }
 0x25c   :  { %968 = vmatpush.msra.mxu2 %v4018_v5  ;;  %837 = vmatpush.msra.mxu3 %v3989_v25 }
 0x25e   :  { %969 = vmatpush.msra.mxu2 %v4024_v63  ;;  %838 = vmatpush.msra.mxu3 %v3996_v17 }
 0x260   :  { %970 = vmatpush.msra.mxu2 %v4029_v21  ;;  %839 = vmatpush.msra.mxu3 %v4004_v0 }
 0x261   :  { %692 = vmatmul.f32.gmra.mxu3 %v655_v57  ;;  %822 = vmatmul.f32.gmra.mxu2 %v784_v4  ;;  %v1041_v57 = vld [vmem:[#allocation5 + $0x178] sm:$0xff] }
 0x262   :  { %971 = vmatpush.msra.mxu2 %v4034_v28  ;;  %840 = vmatpush.msra.mxu3 %v4012_v43 }
 0x264   :  { %841 = vmatpush.msra.mxu3 %v4018_v5 }
 0x266   :  { %842 = vmatpush.msra.mxu3 %v4024_v63 }
 0x268   :  { %843 = vmatpush.msra.mxu3 %v4029_v21 }
 0x269   :  { %695 = vmatmul.f32.gmra.mxu3 %v657_v58  ;;  %825 = vmatmul.f32.gmra.mxu2 %v786_v27 }
 0x26a   :  { %844 = vmatpush.msra.mxu3 %v4034_v28 }
 0x271   :  { %698 = vmatmul.f32.gmra.mxu3 %v659_v60 }
 0x293   :  { %v4163_v61 = vpop.f32.mrf.mxu2 }
 0x295   :  { %v4167_v6 = vpop.f32.mrf.mxu3 }
 0x29c   :  { %v4165_v3 = vpop.f32.mrf.mxu2 }
 0x2a4   :  { %v4169_v10 = vpop.f32.mrf.mxu2 }
 0x2ac   :  { %v4175_v18 = vpop.f32.mrf.mxu2 }
 0x2b4   :  { %v4171_v11 = vpop.f32.mrf.mxu3  ;;  %v719_v23 = vpop.f32.mrf.mxu2 }
 0x2bc   :  { %v722_v24 = vpop.f32.mrf.mxu2 }
 0x2c4   :  { %v725_v37 = vpop.f32.mrf.mxu2 }
 0x2cc   :  { %v4173_v15 = vpop.f32.mrf.mxu3  ;;  %v728_v12 = vpop.f32.mrf.mxu2 }
 0x2d4   :  { %v4177_v22 = vpop.f32.mrf.mxu3 }
 0x2dc   :  { %v690_v30 = vpop.f32.mrf.mxu3 }
 0x2dd   :  { %v720_v31 = vadd.f32 %v719_v23, %v690_v30 }
 0x2df   :  { %3256 = vmatmul.msk.f32.vlgmr.msrb.gmra.mxu3 %vm569_vm1, %v720_v31  ;;  %v817_v31 = vpop.f32.mrf.mxu2 }
 0x2e0   :  { %927 = vmatpush.msrb.mxu3 %v3842_v59 }
 0x2e2   :  { %928 = vmatpush.msrb.mxu3 %v3845_v62 }
 0x2e4   :  { %929 = vmatpush.msrb.mxu3 %v3855_v7  ;;  %v693_v33 = vpop.f32.mrf.mxu3 }
 0x2e5   :  { %v723_v29 = vadd.f32 %v722_v24, %v693_v33 }
 0x2e6   :  { %930 = vmatpush.msrb.mxu3 %v3861_v14 }
 0x2e7   :  { %3257 = vmatmul.msk.f32.gmra.mxu3 %vm569_vm1, %v723_v29  ;;  %v1114_v29 = vld [vmem:[#allocation7 + $0x58] sm:$0xff]  ;;  %v820_v16 = vpop.f32.mrf.mxu2 }
 0x2e8   :  { %931 = vmatpush.msrb.mxu3 %v3867_v19 }
 0x2ea   :  { %932 = vmatpush.msrb.mxu3 %v3874_v26 }
 0x2ec   :  { %933 = vmatpush.msrb.mxu3 %v3886_v32  ;;  %v696_v38 = vpop.f32.mrf.mxu3 }
 0x2ed   :  { %v726_v39 = vadd.f32 %v725_v37, %v696_v38  ;;  %v1113_v37 = vld [vmem:[#allocation7 + $0x50] sm:$0xff] }
 0x2ee   :  { %934 = vmatpush.msrb.mxu3 %v3894_v34 }
 0x2ef   :  { %3258 = vmatmul.msk.f32.gmra.mxu3 %vm569_vm1, %v726_v39  ;;  %v823_v4 = vpop.f32.mrf.mxu2 }
 0x2f0   :  { %935 = vmatpush.msrb.mxu3 %v3902_v35 }
 0x2f2   :  { %936 = vmatpush.msrb.mxu3 %v3910_v36 }
 0x2f4   :  { %937 = vmatpush.msrb.mxu3 %v3922_v8  ;;  %v699_v41 = vpop.f32.mrf.mxu3 }
 0x2f5   :  { %v729_v48 = vadd.f32 %v728_v12, %v699_v41 }
 0x2f6   :  { %938 = vmatpush.msrb.mxu3 %v3930_v40 }
 0x2f7   :  { %3259 = vmatmul.msk.f32.gmra.mxu3 %vm569_vm1, %v729_v48  ;;  %v826_v27 = vpop.f32.mrf.mxu2 }
 0x2f8   :  { %939 = vmatpush.msrb.mxu3 %v3936_v13 }
 0x2fa   :  { %940 = vmatpush.msrb.mxu3 %v3942_v9 }
 0x2fc   :  { %941 = vmatpush.msrb.mxu3 %v3951_v42 }
 0x2fe   :  { %942 = vmatpush.msrb.mxu3 %v3956_v1 }
 0x2ff   :  { %3260 = vmatmul.msk.f32.vlgmr.msra.gmra.mxu3 %vm414_vm0, %v781_v2 }
 0x300   :  { %1090 = vmatpush.msra.mxu3 %v3985_v20 }
 0x302   :  { %1091 = vmatpush.msra.mxu3 %v3989_v25 }
 0x304   :  { %1092 = vmatpush.msra.mxu3 %v3996_v17 }
 0x306   :  { %1093 = vmatpush.msra.mxu3 %v4004_v0 }
 0x307   :  { %3261 = vmatmul.msk.f32.gmra.mxu3 %vm414_vm0, %v783_v44 }
 0x308   :  { %1094 = vmatpush.msra.mxu3 %v4012_v43 }
 0x30a   :  { %1095 = vmatpush.msra.mxu3 %v4018_v5 }
 0x30c   :  { %1096 = vmatpush.msra.mxu3 %v4024_v63 }
 0x30e   :  { %1097 = vmatpush.msra.mxu3 %v4029_v21 }
 0x30f   :  { %3262 = vmatmul.msk.f32.gmra.mxu3 %vm414_vm0, %v785_v45  ;;  %v908_v45 = vld [vmem:[#allocation5 + $0x108] sm:$0xff] }
 0x310   :  { %1098 = vmatpush.msra.mxu3 %v4034_v28 }
 0x317   :  { %3263 = vmatmul.msk.f32.gmra.mxu3 %vm414_vm0, %v787_v46 }
 0x31f   :  { %943 = vmatmul.f32.vlgmr.msrb.gmra.mxu3 %v907_v47  ;;  %v910_v47 = vld [vmem:[#allocation5 + $0x118] sm:$0xff] }
 0x320   :  { %1268 = vmatpush.msrb.mxu3 %v1241_v49 }
 0x322   :  { %1269 = vmatpush.msrb.mxu3 %v1240_v50  ;;  %v912_v50 = vld [vmem:[#allocation5 + $0x128] sm:$0xff] }
 0x327   :  { %946 = vmatmul.f32.gmra.mxu3 %v909_v51 }
 0x32f   :  { %949 = vmatmul.f32.gmra.mxu3 %v911_v52  ;;  %v914_v52 = vld [vmem:[#allocation5 + $0x138] sm:$0xff] }
 0x337   :  { %952 = vmatmul.f32.gmra.mxu3 %v913_v53  ;;  %v1071_v53 = vpop.f32.mrf.mxu1 }
 0x33f   :  { %3276 = vmatmul.msk.f32.vlgmr.msra.gmra.mxu3 %vm414_vm0, %v1035_v54 }
 0x340   :  { %1435 = vmatpush.msra.mxu3 %v3842_v59 }
 0x342   :  { %1436 = vmatpush.msra.mxu3 %v3845_v62 }
 0x344   :  { %1437 = vmatpush.msra.mxu3 %v3855_v7 }
 0x346   :  { %1438 = vmatpush.msra.mxu3 %v3861_v14 }
 0x347   :  { %3277 = vmatmul.msk.f32.gmra.mxu3 %vm414_vm0, %v1037_v55 }
 0x348   :  { %1439 = vmatpush.msra.mxu3 %v3867_v19 }
 0x34a   :  { %1440 = vmatpush.msra.mxu3 %v3874_v26 }
 0x34c   :  { %1441 = vmatpush.msra.mxu3 %v3886_v32 }
 0x34e   :  { %1442 = vmatpush.msra.mxu3 %v3894_v34 }
 0x34f   :  { %3278 = vmatmul.msk.f32.gmra.mxu3 %vm414_vm0, %v1039_v56  ;;  %v1074_v56 = vpop.f32.mrf.mxu1 }
 0x350   :  { %1443 = vmatpush.msra.mxu3 %v3902_v35 }
 0x352   :  { %1444 = vmatpush.msra.mxu3 %v3910_v36 }
 0x354   :  { %1445 = vmatpush.msra.mxu3 %v3922_v8 }
 0x356   :  { %1446 = vmatpush.msra.mxu3 %v3930_v40 }
 0x357   :  { %3279 = vmatmul.msk.f32.gmra.mxu3 %vm414_vm0, %v1041_v57 }
 0x358   :  { %1447 = vmatpush.msra.mxu3 %v3936_v13 }
 0x35a   :  { %1448 = vmatpush.msra.mxu3 %v3942_v9 }
 0x35c   :  { %1449 = vmatpush.msra.mxu3 %v3951_v42 }
 0x35e   :  { %1450 = vmatpush.msra.mxu3 %v3956_v1 }
 0x362   :  { %v4232_v58 = vpop.f32.mrf.mxu3 }
 0x36a   :  { %v4234_v60 = vpop.f32.mrf.mxu3 }
 0x372   :  { %v4236_v23 = vpop.f32.mrf.mxu3 }
 0x37a   :  { %v4238_v30 = vpop.f32.mrf.mxu3 }
 0x382   :  { %v846_v24 = vpop.f32.mrf.mxu3 }
 0x383   :  { %v847_v33 = vadd.f32 %v846_v24, %v817_v31  ;;  %v1077_v24 = vpop.f32.mrf.mxu1 }
 0x385   :  { %3264 = vmatmul.msk.f32.vlgmr.msrb.gmra.mxu2 %vm569_vm1, %v847_v33 }
 0x386   :  { %1141 = vmatpush.msrb.mxu2 %v1114_v29 }
 0x388   :  { %1142 = vmatpush.msrb.mxu2 %v1113_v37 }
 0x38a   :  { %v849_v38 = vpop.f32.mrf.mxu3 }
 0x38b   :  { %v850_v39 = vadd.f32 %v849_v38, %v820_v16  ;;  %v1080_v16 = vpop.f32.mrf.mxu1 }
 0x38d   :  { %3265 = vmatmul.msk.f32.gmra.mxu2 %vm569_vm1, %v850_v39  ;;  %v1288_v39 = vld [vmem:[#allocation5 + $0x1c0] sm:$0xff] }
 0x392   :  { %v852_v12 = vpop.f32.mrf.mxu3 }
 0x393   :  { %v853_v41 = vadd.f32 %v852_v12, %v823_v4  ;;  %v1622_v4 = vld [vmem:[#allocation7 + $0x98] sm:$0xff]  ;;  %v1621_v12 = vld [vmem:[#allocation7 + $0x90] sm:$0xff] }
 0x395   :  { %3266 = vmatmul.msk.f32.gmra.mxu2 %vm569_vm1, %v853_v41  ;;  %v1290_v41 = vld [vmem:[#allocation5 + $0x1d0] sm:$0xff] }
 0x39a   :  { %v855_v48 = vpop.f32.mrf.mxu3 }
 0x39b   :  { %v856_v2 = vadd.f32 %v855_v48, %v826_v27  ;;  %v1292_v27 = vld [vmem:[#allocation5 + $0x1e0] sm:$0xff]  ;;  %v1294_v48 = vld [vmem:[#allocation5 + $0x1f0] sm:$0xff] }
 0x39d   :  { %3267 = vmatmul.msk.f32.gmra.mxu2 %vm569_vm1, %v856_v2  ;;  %v1416_v2 = vld [vmem:[#allocation5 + $0x208] sm:$0xff] }
 0x3a2   :  { %v4244_v44 = vpop.f32.mrf.mxu3 }
 0x3a5   :  { %3268 = vmatmul.msk.f32.vlgmr.msra.gmra.mxu2 %vm414_vm0, %v908_v45 }
 0x3a6   :  { %1308 = vmatpush.msra.mxu2 %v3842_v59 }
 0x3a8   :  { %1309 = vmatpush.msra.mxu2 %v3845_v62 }
 0x3aa   :  { %1310 = vmatpush.msra.mxu2 %v3855_v7  ;;  %v4250_v46 = vpop.f32.mrf.mxu3 }
 0x3ac   :  { %1311 = vmatpush.msra.mxu2 %v3861_v14 }
 0x3ad   :  { %3269 = vmatmul.msk.f32.gmra.mxu2 %vm414_vm0, %v910_v47 }
 0x3ae   :  { %1312 = vmatpush.msra.mxu2 %v3867_v19 }
 0x3b0   :  { %1313 = vmatpush.msra.mxu2 %v3874_v26 }
 0x3b2   :  { %1314 = vmatpush.msra.mxu2 %v3886_v32  ;;  %v4257_v49 = vpop.f32.mrf.mxu3 }
 0x3b4   :  { %1315 = vmatpush.msra.mxu2 %v3894_v34 }
 0x3b5   :  { %3270 = vmatmul.msk.f32.gmra.mxu2 %vm414_vm0, %v912_v50 }
 0x3b6   :  { %1316 = vmatpush.msra.mxu2 %v3902_v35 }
 0x3b8   :  { %1317 = vmatpush.msra.mxu2 %v3910_v36 }
 0x3ba   :  { %1318 = vmatpush.msra.mxu2 %v3922_v8  ;;  %v4264_v51 = vpop.f32.mrf.mxu3 }
 0x3bc   :  { %1319 = vmatpush.msra.mxu2 %v3930_v40 }
 0x3bd   :  { %3271 = vmatmul.msk.f32.gmra.mxu2 %vm414_vm0, %v914_v52 }
 0x3be   :  { %1320 = vmatpush.msra.mxu2 %v3936_v13 }
 0x3c0   :  { %1321 = vmatpush.msra.mxu2 %v3942_v9 }
 0x3c2   :  { %1322 = vmatpush.msra.mxu2 %v3951_v42  ;;  %v1100_v54 = vpop.f32.mrf.mxu3 }
 0x3c3   :  { %v1101_v55 = vadd.f32 %v1100_v54, %v1071_v53 }
 0x3c4   :  { %1323 = vmatpush.msra.mxu2 %v3956_v1 }
 0x3c5   :  { %3280 = vmatmul.msk.f32.vlgmr.msrb.gmra.mxu2 %vm569_vm1, %v1101_v55 }
 0x3c6   :  { %1471 = vmatpush.msrb.mxu2 %v3985_v20 }
 0x3c8   :  { %1472 = vmatpush.msrb.mxu2 %v3989_v25 }
 0x3ca   :  { %1473 = vmatpush.msrb.mxu2 %v3996_v17  ;;  %v1103_v57 = vpop.f32.mrf.mxu3 }
 0x3cb   :  { %v1104_v31 = vadd.f32 %v1103_v57, %v1074_v56  ;;  %v1164_v57 = vld [vmem:[#allocation5 + $0x198] sm:$0xff] }
 0x3cc   :  { %1474 = vmatpush.msrb.mxu2 %v4004_v0  ;;  %3285 = vmatmul.msk.f32.gmra.mxu1 %vm414_vm0, %v1164_v57 }
 0x3cd   :  { %3281 = vmatmul.msk.f32.gmra.mxu2 %vm569_vm1, %v1104_v31 }
 0x3ce   :  { %1475 = vmatpush.msrb.mxu2 %v4012_v43 }
 0x3d0   :  { %1476 = vmatpush.msrb.mxu2 %v4018_v5 }
 0x3d2   :  { %1477 = vmatpush.msrb.mxu2 %v4024_v63  ;;  %v1106_v33 = vpop.f32.mrf.mxu3 }
 0x3d3   :  { %v1107_v29 = vadd.f32 %v1106_v33, %v1077_v24 }
 0x3d4   :  { %1478 = vmatpush.msrb.mxu2 %v4029_v21 }
 0x3d5   :  { %3282 = vmatmul.msk.f32.gmra.mxu2 %vm569_vm1, %v1107_v29  ;;  %v1168_v29 = vld [vmem:[#allocation5 + $0x1b8] sm:$0xff] }
 0x3d6   :  { %1479 = vmatpush.msrb.mxu2 %v4034_v28 }
 0x3da   :  { %v1109_v37 = vpop.f32.mrf.mxu3 }
 0x3db   :  { %v1110_v38 = vadd.f32 %v1109_v37, %v1080_v16  ;;  %v1161_v16 = vld [vmem:[#allocation5 + $0x180] sm:$0xff]  ;;  %v1495_v37 = vld [vmem:[#allocation7 + $0x88] sm:$0xff] }
 0x3dd   :  { %3283 = vmatmul.msk.f32.gmra.mxu2 %vm569_vm1, %v1110_v38  ;;  %v1163_v38 = vld [vmem:[#allocation5 + $0x190] sm:$0xff] }
 0x3e5   :  { %1324 = vmatmul.f32.vlgmr.msra.gmra.mxu2 %v1288_v39  ;;  %v1165_v39 = vld [vmem:[#allocation5 + $0x1a0] sm:$0xff] }
 0x3e6   :  { %1649 = vmatpush.msra.mxu2 %v1622_v4  ;;  %v1167_v4 = vld [vmem:[#allocation5 + $0x1b0] sm:$0xff] }
 0x3e8   :  { %1650 = vmatpush.msra.mxu2 %v1621_v12  ;;  %v1289_v12 = vld [vmem:[#allocation5 + $0x1c8] sm:$0xff] }
 0x3ed   :  { %1327 = vmatmul.f32.gmra.mxu2 %v1290_v41  ;;  %v1293_v41 = vld [vmem:[#allocation5 + $0x1e8] sm:$0xff] }
 0x3f5   :  { %1330 = vmatmul.f32.gmra.mxu2 %v1292_v27  ;;  %v1295_v27 = vld [vmem:[#allocation5 + $0x1f8] sm:$0xff] }
 0x3fd   :  { %1333 = vmatmul.f32.gmra.mxu2 %v1294_v48 }
 0x405   :  { %3300 = vmatmul.msk.f32.vlgmr.msrb.gmra.mxu2 %vm414_vm0, %v1416_v2 }
 0x406   :  { %1816 = vmatpush.msrb.mxu2 %v3842_v59 }
 0x408   :  { %1817 = vmatpush.msrb.mxu2 %v3845_v62  ;;  %v4288_v45 = vpop.f32.mrf.mxu2 }
 0x40a   :  { %1818 = vmatpush.msrb.mxu2 %v3855_v7 }
 0x40c   :  { %1819 = vmatpush.msrb.mxu2 %v3861_v14 }
 0x40e   :  { %1820 = vmatpush.msrb.mxu2 %v3867_v19 }
 0x410   :  { %1821 = vmatpush.msrb.mxu2 %v3874_v26  ;;  %v4294_v47 = vpop.f32.mrf.mxu2 }
 0x412   :  { %1822 = vmatpush.msrb.mxu2 %v3886_v32 }
 0x414   :  { %1823 = vmatpush.msrb.mxu2 %v3894_v34 }
 0x416   :  { %1824 = vmatpush.msrb.mxu2 %v3902_v35 }
 0x418   :  { %1825 = vmatpush.msrb.mxu2 %v3910_v36  ;;  %v4300_v50 = vpop.f32.mrf.mxu2 }
 0x41a   :  { %1826 = vmatpush.msrb.mxu2 %v3922_v8 }
 0x41c   :  { %1827 = vmatpush.msrb.mxu2 %v3930_v40 }
 0x41e   :  { %1828 = vmatpush.msrb.mxu2 %v3936_v13 }
 0x420   :  { %1829 = vmatpush.msrb.mxu2 %v3942_v9  ;;  %v4306_v52 = vpop.f32.mrf.mxu2 }
 0x422   :  { %1830 = vmatpush.msrb.mxu2 %v3951_v42 }
 0x424   :  { %1831 = vmatpush.msrb.mxu2 %v3956_v1 }
 0x428   :  { %v973_v53 = vpop.f32.mrf.mxu2 }
 0x429   :  { %v974_v54 = vadd.f32 %v973_v53, %v4244_v44 }
 0x42b   :  { %3272 = vmatmul.msk.f32.vlgmr.msra.gmra.mxu0 %vm569_vm1, %v974_v54 }
 0x42c   :  { %1344 = vmatpush.msra.mxu0 %v3985_v20 }
 0x42e   :  { %1345 = vmatpush.msra.mxu0 %v3989_v25 }
 0x430   :  { %1346 = vmatpush.msra.mxu0 %v3996_v17  ;;  %v976_v55 = vpop.f32.mrf.mxu2 }
 0x431   :  { %v977_v56 = vadd.f32 %v976_v55, %v4250_v46  ;;  %v1166_v46 = vld [vmem:[#allocation5 + $0x1a8] sm:$0xff] }
 0x432   :  { %1347 = vmatpush.msra.mxu0 %v4004_v0  ;;  %3286 = vmatmul.msk.f32.gmra.mxu1 %vm414_vm0, %v1166_v46 }
 0x433   :  { %3273 = vmatmul.msk.f32.gmra.mxu0 %vm569_vm1, %v977_v56  ;;  %v1227_v56 = vpop.f32.mrf.mxu1 }
 0x434   :  { %1348 = vmatpush.msra.mxu0 %v4012_v43 }
 0x436   :  { %1349 = vmatpush.msra.mxu0 %v4018_v5 }
 0x438   :  { %1350 = vmatpush.msra.mxu0 %v4024_v63  ;;  %v979_v44 = vpop.f32.mrf.mxu2 }
 0x439   :  { %v980_v31 = vadd.f32 %v979_v44, %v4257_v49  ;;  %v1494_v49 = vld [vmem:[#allocation7 + $0x80] sm:$0xff] }
 0x43a   :  { %1351 = vmatpush.msra.mxu0 %v4029_v21  ;;  %3287 = vmatmul.msk.f32.gmra.mxu1 %vm414_vm0, %v1168_v29 }
 0x43b   :  { %3274 = vmatmul.msk.f32.gmra.mxu0 %vm569_vm1, %v980_v31 }
 0x43c   :  { %1352 = vmatpush.msra.mxu0 %v4034_v28 }
 0x440   :  { %v982_v24 = vpop.f32.mrf.mxu2 }
 0x441   :  { %v983_v33 = vadd.f32 %v982_v24, %v4264_v51  ;;  %v1291_v51 = vld [vmem:[#allocation5 + $0x1d8] sm:$0xff] }
 0x443   :  { %3275 = vmatmul.msk.f32.gmra.mxu0 %vm569_vm1, %v983_v33 }
 0x448   :  { %v4356_v54 = vpop.f32.mrf.mxu2 }
 0x449   :  { %v1230_v46 = vpop.f32.mrf.mxu1 }
 0x44b   :  { %1197 = vmatmul.f32.vlgmr.msrb.gmra.mxu0 %v1161_v16  ;;  %v1418_v16 = vld [vmem:[#allocation5 + $0x218] sm:$0xff] }
 0x44c   :  { %1522 = vmatpush.msrb.mxu0 %v1495_v37  ;;  %3301 = vmatmul.msk.f32.gmra.mxu2 %vm414_vm0, %v1418_v16  ;;  %v1748_v16 = vld [vmem:[#allocation7 + $0xa0] sm:$0xff] }
 0x44e   :  { %1523 = vmatpush.msrb.mxu0 %v1494_v49 }
 0x450   :  { %v4360_v57 = vpop.f32.mrf.mxu2 }
 0x453   :  { %1200 = vmatmul.f32.gmra.mxu0 %v1163_v38 }
 0x458   :  { %v4364_v24 = vpop.f32.mrf.mxu2 }
 0x459   :  { %4943 = vst [vmem:[#allocation16_spill] sm:$0xff] %v4364_v24 }
 0x45b   :  { %1203 = vmatmul.f32.gmra.mxu0 %v1165_v39 }
 0x460   :  { %v4373_v49 = vpop.f32.mrf.mxu2 }
 0x463   :  { %1206 = vmatmul.f32.gmra.mxu0 %v1167_v4  ;;  %v1420_v4 = vld [vmem:[#allocation5 + $0x228] sm:$0xff] }
 0x464   :  { %3302 = vmatmul.msk.f32.gmra.mxu2 %vm414_vm0, %v1420_v4 }
 0x46b   :  { %3292 = vmatmul.msk.f32.vlgmr.msra.gmra.mxu0 %vm414_vm0, %v1289_v12 }
 0x46c   :  { %1689 = vmatpush.msra.mxu0 %v3842_v59 }
 0x46e   :  { %1690 = vmatpush.msra.mxu0 %v3845_v62 }
 0x470   :  { %1691 = vmatpush.msra.mxu0 %v3855_v7 }
 0x472   :  { %1692 = vmatpush.msra.mxu0 %v3861_v14 }
 0x473   :  { %3293 = vmatmul.msk.f32.gmra.mxu0 %vm414_vm0, %v1291_v51 }
 0x474   :  { %1693 = vmatpush.msra.mxu0 %v3867_v19 }
 0x476   :  { %1694 = vmatpush.msra.mxu0 %v3874_v26 }
 0x478   :  { %1695 = vmatpush.msra.mxu0 %v3886_v32 }
 0x47a   :  { %1696 = vmatpush.msra.mxu0 %v3894_v34 }
 0x47b   :  { %3294 = vmatmul.msk.f32.gmra.mxu0 %vm414_vm0, %v1293_v41  ;;  %v1325_v41 = vpop.f32.mrf.mxu2 }
 0x47c   :  { %1697 = vmatpush.msra.mxu0 %v3902_v35 }
 0x47e   :  { %1698 = vmatpush.msra.mxu0 %v3910_v36 }
 0x480   :  { %1699 = vmatpush.msra.mxu0 %v3922_v8 }
 0x482   :  { %1700 = vmatpush.msra.mxu0 %v3930_v40 }
 0x483   :  { %3295 = vmatmul.msk.f32.gmra.mxu0 %vm414_vm0, %v1295_v27 }
 0x484   :  { %1701 = vmatpush.msra.mxu0 %v3936_v13 }
 0x486   :  { %1702 = vmatpush.msra.mxu0 %v3942_v9 }
 0x488   :  { %1703 = vmatpush.msra.mxu0 %v3951_v42 }
 0x48a   :  { %1704 = vmatpush.msra.mxu0 %v3956_v1 }
 0x4a8   :  { %v4350_v48 = vpop.f32.mrf.mxu0 }
 0x4af   :  { %v1233_v37 = vpop.f32.mrf.mxu1 }
 0x4b0   :  { %v4352_v2 = vpop.f32.mrf.mxu0 }
 0x4b7   :  { %v1236_v12 = vpop.f32.mrf.mxu1 }
 0x4b8   :  { %v4354_v53 = vpop.f32.mrf.mxu0 }
 0x4b9   :  { %4942 = vst [vmem:[#allocation15_spill] sm:$0xff] %v4354_v53 }
 0x4c0   :  { %v4358_v55 = vpop.f32.mrf.mxu0 }
 0x4c8   :  { %v1198_v44 = vpop.f32.mrf.mxu0 }
 0x4c9   :  { %v1228_v31 = vadd.f32 %v1227_v56, %v1198_v44  ;;  %v1422_v56 = vld [vmem:[#allocation5 + $0x238] sm:$0xff] }
 0x4ca   :  { %3303 = vmatmul.msk.f32.gmra.mxu2 %vm414_vm0, %v1422_v56 }
 0x4cb   :  { %3288 = vmatmul.msk.f32.vlgmr.msrb.gmra.mxu3 %vm569_vm1, %v1228_v31  ;;  %v1415_v31 = vld [vmem:[#allocation5 + $0x200] sm:$0xff] }
 0x4cc   :  { %1598 = vmatpush.msrb.mxu3 %v3985_v20 }
 0x4ce   :  { %1599 = vmatpush.msrb.mxu3 %v3989_v25 }
 0x4d0   :  { %1600 = vmatpush.msrb.mxu3 %v3996_v17  ;;  %v1201_v33 = vpop.f32.mrf.mxu0 }
 0x4d1   :  { %v1231_v29 = vadd.f32 %v1230_v46, %v1201_v33  ;;  %v1749_v33 = vld [vmem:[#allocation7 + $0xa8] sm:$0xff] }
 0x4d2   :  { %1601 = vmatpush.msrb.mxu3 %v4004_v0 }
 0x4d3   :  { %3289 = vmatmul.msk.f32.gmra.mxu3 %vm569_vm1, %v1231_v29  ;;  %v1328_v29 = vpop.f32.mrf.mxu2 }
 0x4d4   :  { %1602 = vmatpush.msrb.mxu3 %v4012_v43 }
 0x4d6   :  { %1603 = vmatpush.msrb.mxu3 %v4018_v5 }
 0x4d8   :  { %1604 = vmatpush.msrb.mxu3 %v4024_v63  ;;  %v1204_v38 = vpop.f32.mrf.mxu0 }
 0x4d9   :  { %v1234_v39 = vadd.f32 %v1233_v37, %v1204_v38  ;;  %v1417_v38 = vld [vmem:[#allocation5 + $0x210] sm:$0xff] }
 0x4da   :  { %1605 = vmatpush.msrb.mxu3 %v4029_v21 }
 0x4db   :  { %3290 = vmatmul.msk.f32.gmra.mxu3 %vm569_vm1, %v1234_v39  ;;  %v1331_v4 = vpop.f32.mrf.mxu2 }
 0x4dc   :  { %1606 = vmatpush.msrb.mxu3 %v4034_v28 }
 0x4e0   :  { %v1207_v51 = vpop.f32.mrf.mxu0 }
 0x4e1   :  { %v1237_v27 = vadd.f32 %v1236_v12, %v1207_v51  ;;  %v1419_v51 = vld [vmem:[#allocation5 + $0x220] sm:$0xff] }
 0x4e3   :  { %3291 = vmatmul.msk.f32.gmra.mxu3 %vm569_vm1, %v1237_v27  ;;  %v1334_v27 = vpop.f32.mrf.mxu2 }
 0x4e8   :  { %v1354_v44 = vpop.f32.mrf.mxu0 }
 0x4e9   :  { %v1355_v46 = vadd.f32 %v1354_v44, %v1325_v41  ;;  %v1421_v44 = vld [vmem:[#allocation5 + $0x230] sm:$0xff] }
 0x4eb   :  { %3296 = vmatmul.msk.f32.vlgmr.msrb.gmra.mxu1 %vm569_vm1, %v1355_v46  ;;  %1451 = vmatmul.f32.vlgmr.msra.gmra.mxu3 %v1415_v31  ;;  %v1542_v46 = vld [vmem:[#allocation5 + $0x240] sm:$0xff] }
 0x4ec   :  { %1725 = vmatpush.msrb.mxu1 %v3985_v20  ;;  %1776 = vmatpush.msra.mxu3 %v1749_v33  ;;  %v1543_v33 = vld [vmem:[#allocation5 + $0x248] sm:$0xff] }
 0x4ee   :  { %1726 = vmatpush.msrb.mxu1 %v3989_v25  ;;  %1777 = vmatpush.msra.mxu3 %v1748_v16  ;;  %v1875_v16 = vld [vmem:[#allocation7 + $0xb0] sm:$0xff] }
 0x4f0   :  { %1727 = vmatpush.msrb.mxu1 %v3996_v17  ;;  %v1357_v37 = vpop.f32.mrf.mxu0 }
 0x4f1   :  { %v1358_v39 = vadd.f32 %v1357_v37, %v1328_v29  ;;  %v1876_v29 = vld [vmem:[#allocation7 + $0xb8] sm:$0xff]  ;;  %v1544_v37 = vld [vmem:[#allocation5 + $0x250] sm:$0xff] }
 0x4f2   :  { %1728 = vmatpush.msrb.mxu1 %v4004_v0 }
 0x4f3   :  { %3297 = vmatmul.msk.f32.gmra.mxu1 %vm569_vm1, %v1358_v39  ;;  %1454 = vmatmul.f32.gmra.mxu3 %v1417_v38  ;;  %v1545_v38 = vld [vmem:[#allocation5 + $0x258] sm:$0xff]  ;;  %v1546_v39 = vld [vmem:[#allocation5 + $0x260] sm:$0xff] }
 0x4f4   :  { %1729 = vmatpush.msrb.mxu1 %v4012_v43 }
 0x4f6   :  { %1730 = vmatpush.msrb.mxu1 %v4018_v5 }
 0x4f8   :  { %1731 = vmatpush.msrb.mxu1 %v4024_v63  ;;  %v1360_v12 = vpop.f32.mrf.mxu0 }
 0x4f9   :  { %v1361_v41 = vadd.f32 %v1360_v12, %v1331_v4  ;;  %v1547_v4 = vld [vmem:[#allocation5 + $0x268] sm:$0xff]  ;;  %v1548_v12 = vld [vmem:[#allocation5 + $0x270] sm:$0xff] }
 0x4fa   :  { %1732 = vmatpush.msrb.mxu1 %v4029_v21 }
 0x4fb   :  { %3298 = vmatmul.msk.f32.gmra.mxu1 %vm569_vm1, %v1361_v41  ;;  %1457 = vmatmul.f32.gmra.mxu3 %v1419_v51  ;;  %v1549_v51 = vld [vmem:[#allocation5 + $0x278] sm:$0xff]  ;;  %v1670_v41 = vld [vmem:[#allocation5 + $0x288] sm:$0xff] }
 0x4fc   :  { %1733 = vmatpush.msrb.mxu1 %v4034_v28 }
 0x500   :  { %v1363_v56 = vpop.f32.mrf.mxu0 }
 0x501   :  { %v1364_v31 = vadd.f32 %v1363_v56, %v1334_v27 }
 0x503   :  { %3299 = vmatmul.msk.f32.gmra.mxu1 %vm569_vm1, %v1364_v31  ;;  %1460 = vmatmul.f32.gmra.mxu3 %v1421_v44 }
 0x50b   :  { %1578 = vmatmul.f32.vlgmr.msra.gmra.mxu1 %v1542_v46  ;;  %3308 = vmatmul.msk.f32.vlgmr.msrb.gmra.mxu3 %vm414_vm0, %v1543_v33  ;;  %v1481_v46 = vpop.f32.mrf.mxu2 }
 0x50c   :  { %1943 = vmatpush.msrb.mxu3 %v3842_v59  ;;  %1903 = vmatpush.msra.mxu1 %v1876_v29 }
 0x50e   :  { %1944 = vmatpush.msrb.mxu3 %v3845_v62  ;;  %1904 = vmatpush.msra.mxu1 %v1875_v16 }
 0x510   :  { %1945 = vmatpush.msrb.mxu3 %v3855_v7 }
 0x512   :  { %1946 = vmatpush.msrb.mxu3 %v3861_v14 }
 0x513   :  { %1581 = vmatmul.f32.gmra.mxu1 %v1544_v37  ;;  %3309 = vmatmul.msk.f32.gmra.mxu3 %vm414_vm0, %v1545_v38  ;;  %v1484_v38 = vpop.f32.mrf.mxu2 }
 0x514   :  { %1947 = vmatpush.msrb.mxu3 %v3867_v19 }
 0x516   :  { %1948 = vmatpush.msrb.mxu3 %v3874_v26 }
 0x518   :  { %1949 = vmatpush.msrb.mxu3 %v3886_v32 }
 0x51a   :  { %1950 = vmatpush.msrb.mxu3 %v3894_v34 }
 0x51b   :  { %1584 = vmatmul.f32.gmra.mxu1 %v1546_v39  ;;  %3310 = vmatmul.msk.f32.gmra.mxu3 %vm414_vm0, %v1547_v4 }
 0x51c   :  { %1951 = vmatpush.msrb.mxu3 %v3902_v35 }
 0x51e   :  { %1952 = vmatpush.msrb.mxu3 %v3910_v36 }
 0x520   :  { %1953 = vmatpush.msrb.mxu3 %v3922_v8 }
 0x522   :  { %1954 = vmatpush.msrb.mxu3 %v3930_v40 }
 0x523   :  { %1587 = vmatmul.f32.gmra.mxu1 %v1548_v12  ;;  %3311 = vmatmul.msk.f32.gmra.mxu3 %vm414_vm0, %v1549_v51  ;;  %v1672_v51 = vld [vmem:[#allocation5 + $0x298] sm:$0xff] }
 0x524   :  { %1955 = vmatpush.msrb.mxu3 %v3936_v13 }
 0x526   :  { %1956 = vmatpush.msrb.mxu3 %v3942_v9 }
 0x528   :  { %1957 = vmatpush.msrb.mxu3 %v3951_v42 }
 0x52a   :  { %1958 = vmatpush.msrb.mxu3 %v3956_v1 }
 0x52b   :  { %3316 = vmatmul.msk.f32.vlgmr.msrb.gmra.mxu1 %vm414_vm0, %v1670_v41  ;;  %v1487_v41 = vpop.f32.mrf.mxu2 }
 0x52c   :  { %2070 = vmatpush.msrb.mxu1 %v3842_v59 }
 0x52e   :  { %2071 = vmatpush.msrb.mxu1 %v3845_v62 }
 0x530   :  { %2072 = vmatpush.msrb.mxu1 %v3855_v7 }
 0x532   :  { %2073 = vmatpush.msrb.mxu1 %v3861_v14 }
 0x533   :  { %3317 = vmatmul.msk.f32.gmra.mxu1 %vm414_vm0, %v1672_v51 }
 0x534   :  { %2074 = vmatpush.msrb.mxu1 %v3867_v19 }
 0x536   :  { %2075 = vmatpush.msrb.mxu1 %v3874_v26 }
 0x538   :  { %2076 = vmatpush.msrb.mxu1 %v3886_v32 }
 0x53a   :  { %2077 = vmatpush.msrb.mxu1 %v3894_v34 }
 0x53c   :  { %2078 = vmatpush.msrb.mxu1 %v3902_v35 }
 0x53e   :  { %2079 = vmatpush.msrb.mxu1 %v3910_v36 }
 0x540   :  { %2080 = vmatpush.msrb.mxu1 %v3922_v8 }
 0x542   :  { %2081 = vmatpush.msrb.mxu1 %v3930_v40 }
 0x544   :  { %2082 = vmatpush.msrb.mxu1 %v3936_v13 }
 0x546   :  { %2083 = vmatpush.msrb.mxu1 %v3942_v9 }
 0x548   :  { %2084 = vmatpush.msrb.mxu1 %v3951_v42 }
 0x54a   :  { %2085 = vmatpush.msrb.mxu1 %v3956_v1 }
 0x54e   :  { %v4432_v27 = vpop.f32.mrf.mxu3 }
 0x556   :  { %v4434_v56 = vpop.f32.mrf.mxu3 }
 0x55e   :  { %v4436_v44 = vpop.f32.mrf.mxu3 }
 0x55f   :  { %4944 = vst [vmem:[#allocation17_spill] sm:$0xff] %v4436_v44  ;;  %v1676_v44 = vld [vmem:[#allocation5 + $0x2b8] sm:$0xff] }
 0x566   :  { %v4438_v31 = vpop.f32.mrf.mxu3 }
 0x568   :  { %v4440_v33 = vpop.f32.mrf.mxu1 }
 0x56e   :  { %v1452_v29 = vpop.f32.mrf.mxu3 }
 0x56f   :  { %v1482_v16 = vadd.f32 %v1481_v46, %v1452_v29 }
 0x570   :  { %v4442_v37 = vpop.f32.mrf.mxu1 }
 0x571   :  { %4945 = vst [vmem:[#allocation18_spill] sm:$0xff] %v4442_v37  ;;  %3304 = vmatmul.msk.f32.vlgmr.msrb.gmra.mxu0 %vm569_vm1, %v1482_v16  ;;  %v2003_v37 = vld [vmem:[#allocation7 + $0xc8] sm:$0xff] }
 0x572   :  { %1852 = vmatpush.msrb.mxu0 %v3985_v20 }
 0x574   :  { %1853 = vmatpush.msrb.mxu0 %v3989_v25 }
 0x576   :  { %1854 = vmatpush.msrb.mxu0 %v3996_v17  ;;  %v1455_v39 = vpop.f32.mrf.mxu3 }
 0x577   :  { %v1485_v4 = vadd.f32 %v1484_v38, %v1455_v39  ;;  %v1674_v38 = vld [vmem:[#allocation5 + $0x2a8] sm:$0xff]  ;;  %v1490_v39 = vpop.f32.mrf.mxu2 }
 0x578   :  { %1855 = vmatpush.msrb.mxu0 %v4004_v0  ;;  %v4449_v12 = vpop.f32.mrf.mxu1  ;;  %3318 = vmatmul.msk.f32.gmra.mxu1 %vm414_vm0, %v1674_v38 }
 0x579   :  { %4946 = vst [vmem:[#allocation19_spill] sm:$0xff] %v4449_v12  ;;  %3305 = vmatmul.msk.f32.gmra.mxu0 %vm569_vm1, %v1485_v4 }
 0x57a   :  { %1856 = vmatpush.msrb.mxu0 %v4012_v43 }
 0x57c   :  { %1857 = vmatpush.msrb.mxu0 %v4018_v5 }
 0x57e   :  { %1858 = vmatpush.msrb.mxu0 %v4024_v63  ;;  %v1458_v46 = vpop.f32.mrf.mxu3 }
 0x57f   :  { %v1488_v29 = vadd.f32 %v1487_v41, %v1458_v46  ;;  %v1669_v46 = vld [vmem:[#allocation5 + $0x280] sm:$0xff] }
 0x580   :  { %1859 = vmatpush.msrb.mxu0 %v4029_v21  ;;  %v4457_v16 = vpop.f32.mrf.mxu1  ;;  %3319 = vmatmul.msk.f32.gmra.mxu1 %vm414_vm0, %v1676_v44 }
 0x581   :  { %3306 = vmatmul.msk.f32.gmra.mxu0 %vm569_vm1, %v1488_v29  ;;  %v2002_v29 = vld [vmem:[#allocation7 + $0xc0] sm:$0xff] }
 0x582   :  { %1860 = vmatpush.msrb.mxu0 %v4034_v28 }
 0x586   :  { %v1461_v4 = vpop.f32.mrf.mxu3 }
 0x587   :  { %v1491_v51 = vadd.f32 %v1490_v39, %v1461_v4  ;;  %v1671_v39 = vld [vmem:[#allocation5 + $0x290] sm:$0xff] }
 0x588   :  { %v1579_v12 = vpop.f32.mrf.mxu1 }
 0x589   :  { %3307 = vmatmul.msk.f32.gmra.mxu0 %vm569_vm1, %v1491_v51 }
 0x58e   :  { %v1608_v41 = vpop.f32.mrf.mxu3 }
 0x58f   :  { %v1609_v24 = vadd.f32 %v1608_v41, %v1579_v12  ;;  %v1673_v12 = vld [vmem:[#allocation5 + $0x2a0] sm:$0xff]  ;;  %v1675_v41 = vld [vmem:[#allocation5 + $0x2b0] sm:$0xff] }
 0x590   :  { %v1582_v53 = vpop.f32.mrf.mxu1 }
 0x591   :  { %3312 = vmatmul.msk.f32.vlgmr.msra.gmra.mxu2 %vm569_vm1, %v1609_v24  ;;  %1705 = vmatmul.f32.vlgmr.msra.gmra.mxu0 %v1669_v46 }
 0x592   :  { %1979 = vmatpush.msra.mxu2 %v3985_v20  ;;  %2030 = vmatpush.msra.mxu0 %v2003_v37 }
 0x594   :  { %1980 = vmatpush.msra.mxu2 %v3989_v25  ;;  %2031 = vmatpush.msra.mxu0 %v2002_v29  ;;  %v1796_v29 = vld [vmem:[#allocation5 + $0x2c0] sm:$0xff] }
 0x596   :  { %1981 = vmatpush.msra.mxu2 %v3996_v17  ;;  %v1611_v38 = vpop.f32.mrf.mxu3 }
 0x597   :  { %v1612_v44 = vadd.f32 %v1611_v38, %v1582_v53  ;;  %v1797_v38 = vld [vmem:[#allocation5 + $0x2c8] sm:$0xff] }
 0x598   :  { %1982 = vmatpush.msra.mxu2 %v4004_v0  ;;  %v1585_v24 = vpop.f32.mrf.mxu1 }
 0x599   :  { %3313 = vmatmul.msk.f32.gmra.mxu2 %vm569_vm1, %v1612_v44  ;;  %1708 = vmatmul.f32.gmra.mxu0 %v1671_v39  ;;  %v2130_v39 = vld [vmem:[#allocation7 + $0xd8] sm:$0xff]  ;;  %v2129_v44 = vld [vmem:[#allocation7 + $0xd0] sm:$0xff] }
 0x59a   :  { %1983 = vmatpush.msra.mxu2 %v4012_v43 }
 0x59c   :  { %1984 = vmatpush.msra.mxu2 %v4018_v5 }
 0x59e   :  { %1985 = vmatpush.msra.mxu2 %v4024_v63  ;;  %v1614_v37 = vpop.f32.mrf.mxu3 }
 0x59f   :  { %v1615_v4 = vadd.f32 %v1614_v37, %v1585_v24  ;;  %v1798_v24 = vld [vmem:[#allocation5 + $0x2d0] sm:$0xff]  ;;  %v1799_v37 = vld [vmem:[#allocation5 + $0x2d8] sm:$0xff] }
 0x5a0   :  { %1986 = vmatpush.msra.mxu2 %v4029_v21  ;;  %v1588_v53 = vpop.f32.mrf.mxu1 }
 0x5a1   :  { %3314 = vmatmul.msk.f32.gmra.mxu2 %vm569_vm1, %v1615_v4  ;;  %1711 = vmatmul.f32.gmra.mxu0 %v1673_v12  ;;  %v1800_v12 = vld [vmem:[#allocation5 + $0x2e0] sm:$0xff]  ;;  %v1801_v4 = vld [vmem:[#allocation5 + $0x2e8] sm:$0xff] }
 0x5a2   :  { %1987 = vmatpush.msra.mxu2 %v4034_v28 }
 0x5a6   :  { %v1617_v51 = vpop.f32.mrf.mxu3 }
 0x5a7   :  { %v1618_v46 = vadd.f32 %v1617_v51, %v1588_v53  ;;  %v1802_v53 = vld [vmem:[#allocation5 + $0x2f0] sm:$0xff]  ;;  %v1803_v51 = vld [vmem:[#allocation5 + $0x2f8] sm:$0xff] }
 0x5a9   :  { %3315 = vmatmul.msk.f32.gmra.mxu2 %vm569_vm1, %v1618_v46  ;;  %1714 = vmatmul.f32.gmra.mxu0 %v1675_v41  ;;  %v1924_v41 = vld [vmem:[#allocation5 + $0x308] sm:$0xff] }
 0x5aa   :  { %v1928_v46 = vld [vmem:[#allocation5 + $0x328] sm:$0xff] }
 0x5b1   :  { %1832 = vmatmul.f32.vlgmr.msrb.gmra.mxu2 %v1796_v29  ;;  %3324 = vmatmul.msk.f32.vlgmr.msrb.gmra.mxu0 %vm414_vm0, %v1797_v38 }
 0x5b2   :  { %2197 = vmatpush.msrb.mxu0 %v3842_v59  ;;  %2157 = vmatpush.msrb.mxu2 %v2130_v39 }
 0x5b4   :  { %2198 = vmatpush.msrb.mxu0 %v3845_v62  ;;  %2158 = vmatpush.msrb.mxu2 %v2129_v44 }
 0x5b6   :  { %2199 = vmatpush.msrb.mxu0 %v3855_v7 }
 0x5b8   :  { %2200 = vmatpush.msrb.mxu0 %v3861_v14 }
 0x5b9   :  { %1835 = vmatmul.f32.gmra.mxu2 %v1798_v24  ;;  %3325 = vmatmul.msk.f32.gmra.mxu0 %vm414_vm0, %v1799_v37  ;;  %v1930_v24 = vld [vmem:[#allocation5 + $0x338] sm:$0xff] }
 0x5ba   :  { %2201 = vmatpush.msrb.mxu0 %v3867_v19 }
 0x5bc   :  { %2202 = vmatpush.msrb.mxu0 %v3874_v26 }
 0x5be   :  { %2203 = vmatpush.msrb.mxu0 %v3886_v32 }
 0x5c0   :  { %2204 = vmatpush.msrb.mxu0 %v3894_v34 }
 0x5c1   :  { %1838 = vmatmul.f32.gmra.mxu2 %v1800_v12  ;;  %3326 = vmatmul.msk.f32.gmra.mxu0 %vm414_vm0, %v1801_v4  ;;  %v1923_v12 = vld [vmem:[#allocation5 + $0x300] sm:$0xff] }
 0x5c2   :  { %2205 = vmatpush.msrb.mxu0 %v3902_v35 }
 0x5c4   :  { %2206 = vmatpush.msrb.mxu0 %v3910_v36 }
 0x5c6   :  { %2207 = vmatpush.msrb.mxu0 %v3922_v8 }
 0x5c8   :  { %2208 = vmatpush.msrb.mxu0 %v3930_v40 }
 0x5c9   :  { %1841 = vmatmul.f32.gmra.mxu2 %v1802_v53  ;;  %3327 = vmatmul.msk.f32.gmra.mxu0 %vm414_vm0, %v1803_v51 }
 0x5ca   :  { %2209 = vmatpush.msrb.mxu0 %v3936_v13 }
 0x5cc   :  { %2210 = vmatpush.msrb.mxu0 %v3942_v9 }
 0x5ce   :  { %2211 = vmatpush.msrb.mxu0 %v3951_v42 }
 0x5d0   :  { %2212 = vmatpush.msrb.mxu0 %v3956_v1 }
 0x5d1   :  { %3332 = vmatmul.msk.f32.vlgmr.msra.gmra.mxu2 %vm414_vm0, %v1924_v41  ;;  %v1925_v41 = vld [vmem:[#allocation5 + $0x310] sm:$0xff] }
 0x5d2   :  { %2324 = vmatpush.msra.mxu2 %v3842_v59 }
 0x5d4   :  { %2325 = vmatpush.msra.mxu2 %v3845_v62 }
 0x5d6   :  { %2326 = vmatpush.msra.mxu2 %v3855_v7 }
 0x5d8   :  { %2327 = vmatpush.msra.mxu2 %v3861_v14 }
 0x5da   :  { %2328 = vmatpush.msra.mxu2 %v3867_v19  ;;  %v1735_v19 = vpop.f32.mrf.mxu1 }
 0x5dc   :  { %2329 = vmatpush.msra.mxu2 %v3874_v26 }
 0x5de   :  { %2330 = vmatpush.msra.mxu2 %v3886_v32 }
 0x5e0   :  { %2331 = vmatpush.msra.mxu2 %v3894_v34 }
 0x5e2   :  { %2332 = vmatpush.msra.mxu2 %v3902_v35  ;;  %v1738_v34 = vpop.f32.mrf.mxu1 }
 0x5e4   :  { %2333 = vmatpush.msra.mxu2 %v3910_v36 }
 0x5e6   :  { %2334 = vmatpush.msra.mxu2 %v3922_v8 }
 0x5e8   :  { %2335 = vmatpush.msra.mxu2 %v3930_v40  ;;  %v1926_v40 = vld [vmem:[#allocation5 + $0x318] sm:$0xff] }
 0x5e9   :  { %3333 = vmatmul.msk.f32.gmra.mxu2 %vm414_vm0, %v1926_v40 }
 0x5ea   :  { %2336 = vmatpush.msra.mxu2 %v3936_v13 }
 0x5ec   :  { %2337 = vmatpush.msra.mxu2 %v3942_v9 }
 0x5ee   :  { %2338 = vmatpush.msra.mxu2 %v3951_v42  ;;  %v4513_v59 = vpop.f32.mrf.mxu0 }
 0x5f0   :  { %2339 = vmatpush.msra.mxu2 %v3956_v1 }
 0x5f1   :  { %3334 = vmatmul.msk.f32.gmra.mxu2 %vm414_vm0, %v1928_v46 }
 0x5f5   :  { %v1741_v13 = vpop.f32.mrf.mxu1 }
 0x5f6   :  { %v4516_v62 = vpop.f32.mrf.mxu0 }
 0x5f9   :  { %3335 = vmatmul.msk.f32.gmra.mxu2 %vm414_vm0, %v1930_v24  ;;  %v2052_v24 = vld [vmem:[#allocation5 + $0x350] sm:$0xff] }
 0x5fd   :  { %v1744_v38 = vpop.f32.mrf.mxu1 }
 0x5fe   :  { %v4518_v7 = vpop.f32.mrf.mxu0 }
 0x606   :  { %v4520_v14 = vpop.f32.mrf.mxu0 }
 0x60e   :  { %v1706_v26 = vpop.f32.mrf.mxu0 }
 0x60f   :  { %v1736_v32 = vadd.f32 %v1735_v19, %v1706_v26 }
 0x611   :  { %3320 = vmatmul.msk.f32.vlgmr.msra.gmra.mxu3 %vm569_vm1, %v1736_v32 }
 0x612   :  { %2106 = vmatpush.msra.mxu3 %v3985_v20 }
 0x614   :  { %2107 = vmatpush.msra.mxu3 %v3989_v25  ;;  %v4525_v35 = vpop.f32.mrf.mxu2 }
 0x616   :  { %2108 = vmatpush.msra.mxu3 %v3996_v17  ;;  %v1709_v36 = vpop.f32.mrf.mxu0 }
 0x617   :  { %v1739_v8 = vadd.f32 %v1738_v34, %v1709_v36  ;;  %v1927_v34 = vld [vmem:[#allocation5 + $0x320] sm:$0xff] }
 0x618   :  { %2109 = vmatpush.msra.mxu3 %v4004_v0 }
 0x619   :  { %3321 = vmatmul.msk.f32.gmra.mxu3 %vm569_vm1, %v1739_v8 }
 0x61a   :  { %2110 = vmatpush.msra.mxu3 %v4012_v43 }
 0x61c   :  { %2111 = vmatpush.msra.mxu3 %v4018_v5  ;;  %v4533_v9 = vpop.f32.mrf.mxu2 }
 0x61e   :  { %2112 = vmatpush.msra.mxu3 %v4024_v63  ;;  %v1712_v42 = vpop.f32.mrf.mxu0 }
 0x61f   :  { %v1742_v1 = vadd.f32 %v1741_v13, %v1712_v42  ;;  %v1929_v13 = vld [vmem:[#allocation5 + $0x330] sm:$0xff] }
 0x620   :  { %2113 = vmatpush.msra.mxu3 %v4029_v21 }
 0x621   :  { %3322 = vmatmul.msk.f32.gmra.mxu3 %vm569_vm1, %v1742_v1 }
 0x622   :  { %2114 = vmatpush.msra.mxu3 %v4034_v28 }
 0x624   :  { %v4540_v29 = vpop.f32.mrf.mxu2 }
 0x626   :  { %v1715_v39 = vpop.f32.mrf.mxu0 }
 0x627   :  { %v1745_v44 = vadd.f32 %v1744_v38, %v1715_v39  ;;  %v2051_v38 = vld [vmem:[#allocation5 + $0x348] sm:$0xff]  ;;  %v2050_v39 = vld [vmem:[#allocation5 + $0x340] sm:$0xff] }
 0x629   :  { %3323 = vmatmul.msk.f32.gmra.mxu3 %vm569_vm1, %v1745_v44  ;;  %v2053_v44 = vld [vmem:[#allocation5 + $0x358] sm:$0xff] }
 0x62c   :  { %v4544_v37 = vpop.f32.mrf.mxu2 }
 0x62e   :  { %v1862_v4 = vpop.f32.mrf.mxu0 }
 0x631   :  { %1959 = vmatmul.f32.vlgmr.msrb.gmra.mxu3 %v1923_v12  ;;  %v2055_v12 = vld [vmem:[#allocation5 + $0x368] sm:$0xff] }
 0x634   :  { %v1833_v53 = vpop.f32.mrf.mxu2 }
 0x635   :  { %v1863_v51 = vadd.f32 %v1862_v4, %v1833_v53  ;;  %v2054_v4 = vld [vmem:[#allocation5 + $0x360] sm:$0xff]  ;;  %v2057_v53 = vld [vmem:[#allocation5 + $0x378] sm:$0xff] }
 0x636   :  { %v1865_v19 = vpop.f32.mrf.mxu0 }
 0x637   :  { %3328 = vmatmul.msk.f32.vlgmr.msra.gmra.mxu1 %vm569_vm1, %v1863_v51  ;;  %v2056_v51 = vld [vmem:[#allocation5 + $0x370] sm:$0xff] }
 0x638   :  { %2233 = vmatpush.msra.mxu1 %v3985_v20 }
 0x639   :  { %1962 = vmatmul.f32.gmra.mxu3 %v1925_v41 }
 0x63a   :  { %2234 = vmatpush.msra.mxu1 %v3989_v25 }
 0x63c   :  { %2235 = vmatpush.msra.mxu1 %v3996_v17  ;;  %v1836_v26 = vpop.f32.mrf.mxu2 }
 0x63d   :  { %v1866_v32 = vadd.f32 %v1865_v19, %v1836_v26  ;;  %v650_v19 = vadd.f32 %v4175_v18, %v4177_v22  ;;  %v644_v22 = vadd.f32 %v4165_v3, %v4171_v11 }
 0x63e   :  { %2236 = vmatpush.msra.mxu1 %v4004_v0  ;;  %v1868_v36 = vpop.f32.mrf.mxu0 }
 0x63f   :  { %3329 = vmatmul.msk.f32.gmra.mxu1 %vm569_vm1, %v1866_v32  ;;  %v778_v26 = vadd.f32 %v4238_v30, %v650_v19  ;;  %v4951_v19 = vld [vmem:[#allocation19_spill] sm:$0xff] }
 0x640   :  { %2237 = vmatpush.msra.mxu1 %v4012_v43 }
 0x641   :  { %1965 = vmatmul.f32.gmra.mxu3 %v1927_v34  ;;  %v905_v34 = vadd.f32 %v4306_v52, %v778_v26 }
 0x642   :  { %2238 = vmatpush.msra.mxu1 %v4018_v5 }
 0x644   :  { %2239 = vmatpush.msra.mxu1 %v4024_v63  ;;  %v1839_v8 = vpop.f32.mrf.mxu2 }
 0x645   :  { %v1869_v40 = vadd.f32 %v1868_v36, %v1839_v8  ;;  %v641_v36 = vadd.f32 %v4163_v61, %v4167_v6  ;;  %v1032_v8 = vadd.f32 %v4358_v55, %v905_v34  ;;  %v776_v61 = vadd.f32 %v4234_v60, %v644_v22 }
 0x646   :  { %2240 = vmatpush.msra.mxu1 %v4029_v21  ;;  %v1871_v42 = vpop.f32.mrf.mxu0  ;;  %v647_v60 = vadd.f32 %v4169_v10, %v4173_v15 }
 0x647   :  { %3330 = vmatmul.msk.f32.gmra.mxu1 %vm569_vm1, %v1869_v40  ;;  %v775_v40 = vadd.f32 %v4232_v58, %v641_v36 }
 0x648   :  { %2241 = vmatpush.msra.mxu1 %v4034_v28 }
 0x649   :  { %1968 = vmatmul.f32.gmra.mxu3 %v1929_v13  ;;  %v902_v13 = vadd.f32 %v4288_v45, %v775_v40  ;;  %v903_v45 = vadd.f32 %v4294_v47, %v776_v61  ;;  %v2179_v61 = vld [vmem:[#allocation5 + $0x390] sm:$0xff] }
 0x64c   :  { %v1842_v1 = vpop.f32.mrf.mxu2 }
 0x64d   :  { %v1872_v46 = vadd.f32 %v1871_v42, %v1842_v1  ;;  %v1159_v42 = vadd.f32 %v4373_v49, %v1032_v8 }
 0x64f   :  { %3331 = vmatmul.msk.f32.gmra.mxu1 %vm569_vm1, %v1872_v46  ;;  %v1029_v46 = vadd.f32 %v4350_v48, %v902_v13  ;;  %v1286_v18 = vadd.f32 %v4438_v31, %v1159_v42  ;;  %v1030_v31 = vadd.f32 %v4352_v2, %v903_v45 }
 0x651   :  { %3340 = vmatmul.msk.f32.vlgmr.msra.gmra.mxu3 %vm414_vm0, %v2051_v38  ;;  %v1413_v30 = vadd.f32 %v4457_v16, %v1286_v18  ;;  %v1156_v6 = vadd.f32 %v4356_v54, %v1029_v46  ;;  %v777_v16 = vadd.f32 %v4236_v23, %v647_v60  ;;  %v1157_v47 = vadd.f32 %v4360_v57, %v1030_v31  ;;  %v2178_v57 = vld [vmem:[#allocation5 + $0x388] sm:$0xff]  ;;  %v2183_v31 = vld [vmem:[#allocation5 + $0x3b0] sm:$0xff] }
 0x652   :  { %v2305_v60 = vld [vmem:[#allocation5 + $0x3c8] sm:$0xff] }
 0x653   :  { %v1540_v58 = vadd.f32 %v4520_v14, %v1413_v30  ;;  %v1283_v52 = vadd.f32 %v4432_v27, %v1156_v6  ;;  %v904_v14 = vadd.f32 %v4300_v50, %v777_v16  ;;  %v4949_v50 = vld [vmem:[#allocation16_spill] sm:$0xff]  ;;  %v2307_v16 = vld [vmem:[#allocation5 + $0x3d8] sm:$0xff] }
 0x654   :  { %v1989_v49 = vpop.f32.mrf.mxu2 }
 0x655   :  { %v1667_v55 = vadd.f32 %v4544_v37, %v1540_v58  ;;  %v1410_v3 = vadd.f32 %v4440_v33, %v1283_v52  ;;  %v1284_v37 = vadd.f32 %v4434_v56, %v1157_v47  ;;  %v4947_v33 = vld [vmem:[#allocation15_spill] sm:$0xff] }
 0x656   :  { %v2181_v52 = vld [vmem:[#allocation5 + $0x3a0] sm:$0xff] }
 0x657   :  { %2086 = vmatmul.f32.vlgmr.msrb.gmra.mxu1 %v2050_v39  ;;  %v1537_v54 = vadd.f32 %v4513_v59, %v1410_v3  ;;  %v2308_v47 = vld [vmem:[#allocation5 + $0x3e0] sm:$0xff] }
 0x659   :  { %3341 = vmatmul.msk.f32.gmra.mxu3 %vm414_vm0, %v2053_v44  ;;  %v1664_v27 = vadd.f32 %v4525_v35, %v1537_v54  ;;  %v1031_v44 = vadd.f32 %v4947_v33, %v904_v14  ;;  %v2306_v54 = vld [vmem:[#allocation5 + $0x3d0] sm:$0xff]  ;;  %v2256_v33 = vld [vmem:[#allocation7 + $0xe0] sm:$0xff] }
 0x65a   :  { %v2310_v14 = vld [vmem:[#allocation5 + $0x3f0] sm:$0xff] }
 0x65b   :  { %v1158_v56 = vadd.f32 %v4949_v50, %v1031_v44 }
 0x65f   :  { %2089 = vmatmul.f32.gmra.mxu1 %v2052_v24  ;;  %v4948_v24 = vld [vmem:[#allocation18_spill] sm:$0xff] }
 0x661   :  { %3342 = vmatmul.msk.f32.gmra.mxu3 %vm414_vm0, %v2055_v12  ;;  %v1411_v12 = vadd.f32 %v4948_v24, %v1284_v37  ;;  %v2311_v37 = vld [vmem:[#allocation5 + $0x3f8] sm:$0xff] }
 0x663   :  { %v1538_v23 = vadd.f32 %v4516_v62, %v1411_v12 }
 0x665   :  { %v1665_v35 = vadd.f32 %v4533_v9, %v1538_v23  ;;  %v2180_v9 = vld [vmem:[#allocation5 + $0x398] sm:$0xff] }
 0x667   :  { %2092 = vmatmul.f32.gmra.mxu1 %v2054_v4  ;;  %v4950_v4 = vld [vmem:[#allocation17_spill] sm:$0xff] }
 0x669   :  { %3343 = vmatmul.msk.f32.gmra.mxu3 %vm414_vm0, %v2057_v53  ;;  %v1285_v53 = vadd.f32 %v4950_v4, %v1158_v56 }
 0x66b   :  { %v1412_v26 = vadd.f32 %v4951_v19, %v1285_v53  ;;  %v2384_v53 = vld [vmem:[#allocation7 + $0xf8] sm:$0xff] }
 0x66c   :  { %v1992_v59 = vpop.f32.mrf.mxu2  ;;  %2411 = vmatpush.msrb.mxu1 %v2384_v53  ;;  %v2468_v53 = vld [vmem:[%s4934_s7 + $0x8] sm:$0xff] }
 0x66d   :  { %v1539_v36 = vadd.f32 %v4518_v7, %v1412_v26 }
 0x66f   :  { %2095 = vmatmul.f32.gmra.mxu1 %v2056_v51 }
 0x677   :  { %3348 = vmatmul.msk.f32.vlgmr.msra.gmra.mxu1 %vm414_vm0, %v2178_v57 }
 0x67f   :  { %3349 = vmatmul.msk.f32.gmra.mxu1 %vm414_vm0, %v2180_v9 }
 0x694   :  { %v1779_v41 = vpop.f32.mrf.mxu3 }
 0x695   :  { %v1791_v38 = vadd.f32 %v1779_v41, %v1664_v27  ;;  %v2309_v27 = vld [vmem:[#allocation5 + $0x3e8] sm:$0xff] }
 0x69c   :  { %v1782_v32 = vpop.f32.mrf.mxu3 }
 0x69d   :  { %v1792_v51 = vadd.f32 %v1782_v32, %v1665_v35 }
 0x6a4   :  { %v1785_v1 = vpop.f32.mrf.mxu3 }
 0x6ac   :  { %v1788_v48 = vpop.f32.mrf.mxu3 }
 0x6ad   :  { %v1794_v11 = vadd.f32 %v1788_v48, %v1667_v55 }
 0x6b4   :  { %v1906_v2 = vpop.f32.mrf.mxu1  ;;  %v1960_v39 = vpop.f32.mrf.mxu3 }
 0x6b5   :  { %v4596_v10 = vadd.f32 %v1906_v2, %v1791_v38  ;;  %v1990_v15 = vadd.f32 %v1989_v49, %v1960_v39  ;;  %v2257_v2 = vld [vmem:[#allocation7 + $0xe8] sm:$0xff] }
 0x6b6   :  { %2284 = vmatpush.msrb.mxu3 %v2257_v2 }
 0x6b7   :  { %3336 = vmatmul.msk.f32.vlgmr.msra.gmra.mxu0 %vm569_vm1, %v1990_v15 }
 0x6b8   :  { %2360 = vmatpush.msra.mxu0 %v3985_v20  ;;  %2285 = vmatpush.msrb.mxu3 %v2256_v33 }
 0x6ba   :  { %2361 = vmatpush.msra.mxu0 %v3989_v25  ;;  %v1995_v25 = vpop.f32.mrf.mxu2 }
 0x6bc   :  { %2362 = vmatpush.msra.mxu0 %v3996_v17  ;;  %v1909_v41 = vpop.f32.mrf.mxu1  ;;  %v1963_v62 = vpop.f32.mrf.mxu3  ;;  %v1666_v17 = vadd.f32 %v4540_v29, %v1539_v36 }
 0x6bd   :  { %v4608_v34 = vadd.f32 %v1909_v41, %v1792_v51  ;;  %v1993_v20 = vadd.f32 %v1992_v59, %v1963_v62  ;;  %v2383_v51 = vld [vmem:[#allocation7 + $0xf0] sm:$0xff] }
 0x6be   :  { %2363 = vmatpush.msra.mxu0 %v4004_v0  ;;  %v1793_v32 = vadd.f32 %v1785_v1, %v1666_v17  ;;  %2412 = vmatpush.msrb.mxu1 %v2383_v51  ;;  %v3378_v51 = vld [vmem:[%s4934_s7 + $0x58] sm:$0xff] }
 0x6bf   :  { %3337 = vmatmul.msk.f32.gmra.mxu0 %vm569_vm1, %v1993_v20 }
 0x6c0   :  { %2364 = vmatpush.msra.mxu0 %v4012_v43  ;;  %v2182_v43 = vld [vmem:[#allocation5 + $0x3a8] sm:$0xff]  ;;  %2592 = vmatpush.msra.mxu1 %v3378_v51 }
 0x6c1   :  { %3350 = vmatmul.msk.f32.gmra.mxu1 %vm414_vm0, %v2182_v43 }
 0x6c2   :  { %2365 = vmatpush.msra.mxu0 %v4018_v5  ;;  %v1998_v29 = vpop.f32.mrf.mxu2 }
 0x6c4   :  { %2366 = vmatpush.msra.mxu0 %v4024_v63  ;;  %v1912_v8 = vpop.f32.mrf.mxu1  ;;  %v1966_v40 = vpop.f32.mrf.mxu3  ;;  %v2184_v63 = vld [vmem:[#allocation5 + $0x3b8] sm:$0xff] }
 0x6c5   :  { %v4618_v0 = vadd.f32 %v1912_v8, %v1793_v32  ;;  %v1996_v7 = vadd.f32 %v1995_v25, %v1966_v40 }
 0x6c6   :  { %2367 = vmatpush.msra.mxu0 %v4029_v21  ;;  %v2177_v21 = vld [vmem:[#allocation5 + $0x380] sm:$0xff] }
 0x6c7   :  { %3338 = vmatmul.msk.f32.gmra.mxu0 %vm569_vm1, %v1996_v7 }
 0x6c8   :  { %2368 = vmatpush.msra.mxu0 %v4034_v28 }
 0x6c9   :  { %3351 = vmatmul.msk.f32.gmra.mxu1 %vm414_vm0, %v2184_v63 }
 0x6cc   :  { %v1915_v13 = vpop.f32.mrf.mxu1  ;;  %v1969_v5 = vpop.f32.mrf.mxu3 }
 0x6cd   :  { %v1921_v42 = vadd.f32 %v1915_v13, %v1794_v11  ;;  %v1999_v1 = vadd.f32 %v1998_v29, %v1969_v5  ;;  %v2304_v11 = vld [vmem:[#allocation5 + $0x3c0] sm:$0xff] }
 0x6cf   :  { %3339 = vmatmul.msk.f32.gmra.mxu0 %vm569_vm1, %v1999_v1 }
 0x6d4   :  { %v2087_v46 = vpop.f32.mrf.mxu1  ;;  %v2116_v18 = vpop.f32.mrf.mxu3 }
 0x6d5   :  { %v2117_v22 = vadd.f32 %v2116_v18, %v2087_v46 }
 0x6d7   :  { %3344 = vmatmul.msk.f32.vlgmr.msrb.gmra.mxu2 %vm569_vm1, %v2117_v22  ;;  %2213 = vmatmul.f32.vlgmr.msrb.gmra.mxu0 %v2177_v21 }
 0x6dc   :  { %v2090_v28 = vpop.f32.mrf.mxu1  ;;  %v2119_v30 = vpop.f32.mrf.mxu3 }
 0x6dd   :  { %v2120_v6 = vadd.f32 %v2119_v30, %v2090_v28  ;;  %v3370_v30 = vld [vmem:[%s4934_s7 + $0x38] sm:$0xff] }
 0x6de   :  { %2516 = vmatpush.msrb.mxu2 %v3370_v30 }
 0x6df   :  { %3345 = vmatmul.msk.f32.gmra.mxu2 %vm569_vm1, %v2120_v6  ;;  %2216 = vmatmul.f32.gmra.mxu0 %v2179_v61  ;;  %v3369_v61 = vld [vmem:[%s4934_s7 + $0x30] sm:$0xff]  ;;  %v3368_v6 = vld [vmem:[%s4934_s7 + $0x28] sm:$0xff] }
 0x6e0   :  { %2517 = vmatpush.msrb.mxu2 %v3369_v61  ;;  %v3403_v61 = vld [vmem:[%s4934_s7 + $0xc0] sm:$0xff] }
 0x6e2   :  { %2518 = vmatpush.msrb.mxu2 %v3368_v6  ;;  %v3420_v6 = vld [vmem:[%s4934_s7 + $0x118] sm:$0xff] }
 0x6e4   :  { %v2093_v58 = vpop.f32.mrf.mxu1  ;;  %v2122_v45 = vpop.f32.mrf.mxu3 }
 0x6e5   :  { %v2123_v55 = vadd.f32 %v2122_v45, %v2093_v58  ;;  %v3367_v58 = vld [vmem:[%s4934_s7 + $0x20] sm:$0xff] }
 0x6e6   :  { %2519 = vmatpush.msrb.mxu2 %v3367_v58  ;;  %v3419_v58 = vld [vmem:[%s4934_s7 + $0x110] sm:$0xff] }
 0x6e7   :  { %3346 = vmatmul.msk.f32.gmra.mxu2 %vm569_vm1, %v2123_v55  ;;  %2219 = vmatmul.f32.gmra.mxu0 %v2181_v52 }
 0x6ec   :  { %v2096_v48 = vpop.f32.mrf.mxu1  ;;  %v2125_v49 = vpop.f32.mrf.mxu3 }
 0x6ed   :  { %v2126_v3 = vadd.f32 %v2125_v49, %v2096_v48 }
 0x6ef   :  { %3347 = vmatmul.msk.f32.gmra.mxu2 %vm569_vm1, %v2126_v3  ;;  %2222 = vmatmul.f32.gmra.mxu0 %v2183_v31 }
 0x6f4   :  { %v2243_v23 = vpop.f32.mrf.mxu1 }
 0x6f7   :  { %2340 = vmatmul.f32.vlgmr.msra.gmra.mxu2 %v2304_v11  ;;  %3356 = vmatmul.msk.f32.vlgmr.msra.gmra.mxu0 %vm414_vm0, %v2305_v60 }
 0x6fc   :  { %v2246_v35 = vpop.f32.mrf.mxu1 }
 0x6ff   :  { %2343 = vmatmul.f32.gmra.mxu2 %v2306_v54  ;;  %3357 = vmatmul.msk.f32.gmra.mxu0 %vm414_vm0, %v2307_v16 }
 0x707   :  { %2346 = vmatmul.f32.gmra.mxu2 %v2308_v47  ;;  %3358 = vmatmul.msk.f32.gmra.mxu0 %vm414_vm0, %v2309_v27  ;;  %v3473_v27 = vld [vmem:[%s4932_s5] ss:$0 sm:$0xff] }
 0x70f   :  { %2349 = vmatmul.f32.gmra.mxu2 %v2310_v14  ;;  %3359 = vmatmul.msk.f32.gmra.mxu0 %vm414_vm0, %v2311_v37 }
 0x734   :  { %v2033_v38 = vpop.f32.mrf.mxu0 }
 0x735   :  { %v2045_v39 = vadd.f32 %v2033_v38, %v4596_v10 }
 0x73c   :  { %v2036_v44 = vpop.f32.mrf.mxu0 }
 0x73d   :  { %v2046_v24 = vadd.f32 %v2036_v44, %v4608_v34 }
 0x73e   :  { %v2249_v19 = vpop.f32.mrf.mxu1 }
 0x744   :  { %v2039_v12 = vpop.f32.mrf.mxu0 }
 0x745   :  { %v2047_v15 = vadd.f32 %v2039_v12, %v4618_v0 }
 0x746   :  { %v2252_v25 = vpop.f32.mrf.mxu1 }
 0x74c   :  { %v2042_v59 = vpop.f32.mrf.mxu0 }
 0x74d   :  { %v2048_v57 = vadd.f32 %v2042_v59, %v1921_v42 }
 0x754   :  { %v2214_v50 = vpop.f32.mrf.mxu0 }
 0x755   :  { %v2244_v56 = vadd.f32 %v2243_v23, %v2214_v50  ;;  %v2442_v23 = vld [vmem:[%s4933_s6] sm:$0xff]  ;;  %v3365_v50 = vld [vmem:[%s4933_s6 + $0x8] sm:$0xff] }
 0x757   :  { %3352 = vmatmul.msk.f32.vlgmr.msrb.gmra.mxu3 %vm569_vm1, %v2244_v56  ;;  %v3387_v56 = vld [vmem:[%s4933_s6 + $0x20] sm:$0xff] }
 0x75a   :  { %v2160_v4 = vpop.f32.mrf.mxu2 }
 0x75b   :  { %v2172_v10 = vadd.f32 %v2160_v4, %v2045_v39  ;;  %v2469_v4 = vld [vmem:[%s4934_s7 + $0x10] sm:$0xff] }
 0x75c   :  { %v2217_v41 = vpop.f32.mrf.mxu0 }
 0x75d   :  { %v2247_v62 = vadd.f32 %v2246_v35, %v2217_v41  ;;  %v2470_v35 = vld [vmem:[%s4934_s7 + $0x18] sm:$0xff]  ;;  %v3377_v41 = vld [vmem:[%s4934_s7 + $0x50] sm:$0xff] }
 0x75e   :  { %2593 = vmatpush.msra.mxu1 %v3377_v41 }
 0x75f   :  { %3353 = vmatmul.msk.f32.gmra.mxu3 %vm569_vm1, %v2247_v62  ;;  %v3376_v62 = vld [vmem:[%s4934_s7 + $0x48] sm:$0xff] }
 0x760   :  { %2594 = vmatpush.msra.mxu1 %v3376_v62  ;;  %v3423_v62 = vld [vmem:[%s4936_s9 + $0x2] sm:$0x3] }
 0x762   :  { %v2163_v26 = vpop.f32.mrf.mxu2 }
 0x763   :  { %v2173_v34 = vadd.f32 %v2163_v26, %v2046_v24 }
 0x764   :  { %v2220_v20 = vpop.f32.mrf.mxu0 }
 0x765   :  { %v2250_v36 = vadd.f32 %v2249_v19, %v2220_v20  ;;  %v3375_v19 = vld [vmem:[%s4934_s7 + $0x40] sm:$0xff]  ;;  %v3401_v20 = vld [vmem:[%s4933_s6 + $0x30] sm:$0xff] }
 0x766   :  { %2595 = vmatpush.msra.mxu1 %v3375_v19  ;;  %v2931_v19 = vld [vmem:[%s4936_s9] sm:$0x3] }
 0x767   :  { %3354 = vmatmul.msk.f32.gmra.mxu3 %vm569_vm1, %v2250_v36  ;;  %v3415_v36 = vld [vmem:[%s4933_s6 + $0x40] sm:$0xff] }
 0x76a   :  { %v2166_v9 = vpop.f32.mrf.mxu2 }
 0x76b   :  { %v2174_v17 = vadd.f32 %v2166_v9, %v2047_v15 }
 0x76c   :  { %v2223_v32 = vpop.f32.mrf.mxu0 }
 0x76d   :  { %v2253_v8 = vadd.f32 %v2252_v25, %v2223_v32  ;;  %v3380_v25 = vld [vmem:[%s4933_s6 + $0x18] sm:$0xff] }
 0x76e   :  { %v3408_v32 = vld [vmem:[%s4933_s6 + $0x38] sm:$0xff] }
 0x76f   :  { %3355 = vmatmul.msk.f32.gmra.mxu3 %vm569_vm1, %v2253_v8  ;;  %v3385_v8 = vld [vmem:[%s4934_s7 + $0x78] sm:$0xff] }
 0x772   :  { %v2169_v40 = vpop.f32.mrf.mxu2 }
 0x773   :  { %v2175_v0 = vadd.f32 %v2169_v40, %v2048_v57  ;;  %v3373_v57 = vld [vmem:[%s4933_s6 + $0x10] sm:$0xff] }
 0x774   :  { %v2370_v7 = vpop.f32.mrf.mxu0  ;;  %v3384_v40 = vld [vmem:[%s4934_s7 + $0x70] sm:$0xff] }
 0x77a   :  { %v2341_v43 = vpop.f32.mrf.mxu2 }
 0x77b   :  { %v2371_v29 = vadd.f32 %v2370_v7, %v2341_v43  ;;  %v3382_v7 = vld [vmem:[%s4934_s7 + $0x60] sm:$0xff]  ;;  %v3392_v43 = vld [vmem:[%s4934_s7 + $0x98] sm:$0xff] }
 0x77c   :  { %v2373_v13 = vpop.f32.mrf.mxu0 }
 0x77d   :  { %3360 = vmatmul.msk.f32.vlgmr.msrb.gmra.mxu1 %vm569_vm1, %v2371_v29  ;;  %v3399_v29 = vld [vmem:[%s4934_s7 + $0xb8] sm:$0xff] }
 0x77e   :  { %2700 = vmatpush.msrb.mxu1 %v3392_v43 }
 0x782   :  { %v2344_v5 = vpop.f32.mrf.mxu2 }
 0x783   :  { %v2374_v42 = vadd.f32 %v2373_v13, %v2344_v5  ;;  %v3391_v13 = vld [vmem:[%s4934_s7 + $0x90] sm:$0xff] }
 0x784   :  { %v2376_v1 = vpop.f32.mrf.mxu0  ;;  %v3398_v5 = vld [vmem:[%s4934_s7 + $0xb0] sm:$0xff]  ;;  %2701 = vmatpush.msrb.mxu1 %v3391_v13  ;;  %v3118_v13 = vld [vmem:[#allocation8 + $0x70] sm:$0xff] }
 0x785   :  { %3361 = vmatmul.msk.f32.gmra.mxu1 %vm569_vm1, %v2374_v42 }
 0x78a   :  { %v2347_v63 = vpop.f32.mrf.mxu2 }
 0x78b   :  { %v2377_v46 = vadd.f32 %v2376_v1, %v2347_v63  ;;  %v3390_v1 = vld [vmem:[%s4934_s7 + $0x88] sm:$0xff] }
 0x78c   :  { %v2379_v18 = vpop.f32.mrf.mxu0  ;;  %v3397_v63 = vld [vmem:[%s4934_s7 + $0xa8] sm:$0xff]  ;;  %2702 = vmatpush.msrb.mxu1 %v3390_v1  ;;  %v3165_v1 = vld [vmem:[%s4939_s12 + $0x78] sm:$0xff] }
 0x78d   :  { %3362 = vmatmul.msk.f32.gmra.mxu1 %vm569_vm1, %v2377_v46  ;;  %v3389_v46 = vld [vmem:[%s4934_s7 + $0x80] sm:$0xff] }
 0x78e   :  { %2703 = vmatpush.msrb.mxu1 %v3389_v46  ;;  %v3163_v46 = vld [vmem:[%s4939_s12 + $0x68] sm:$0xff] }
 0x792   :  { %v2350_v21 = vpop.f32.mrf.mxu2 }
 0x793   :  { %v2380_v22 = vadd.f32 %v2379_v18, %v2350_v21  ;;  %v3396_v18 = vld [vmem:[%s4934_s7 + $0xa0] sm:$0xff]  ;;  %v3406_v21 = vld [vmem:[%s4934_s7 + $0xd8] sm:$0xff] }
 0x795   :  { %3363 = vmatmul.msk.f32.gmra.mxu1 %vm569_vm1, %v2380_v22  ;;  %v3405_v22 = vld [vmem:[%s4934_s7 + $0xd0] sm:$0xff] }
 0x7da   :  { %v2287_v28 = vpop.f32.mrf.mxu3 }
 0x7db   :  { %v2299_v47 = vadd.f32 %v2287_v28, %v2172_v10  ;;  %v2467_v10 = vld [vmem:[%s4934_s7] sm:$0xff]  ;;  %v3404_v28 = vld [vmem:[%s4934_s7 + $0xc8] sm:$0xff] }
 0x7e2   :  { %v2290_v45 = vpop.f32.mrf.mxu3 }
 0x7e3   :  { %v2300_v11 = vadd.f32 %v2290_v45, %v2173_v34  ;;  %v3418_v45 = vld [vmem:[%s4934_s7 + $0x108] sm:$0xff] }
 0x7ea   :  { %v2293_v48 = vpop.f32.mrf.mxu3 }
 0x7eb   :  { %v2301_v3 = vadd.f32 %v2293_v48, %v2174_v17  ;;  %v3394_v17 = vld [vmem:[%s4933_s6 + $0x28] sm:$0xff] }
 0x7f2   :  { %v2296_v31 = vpop.f32.mrf.mxu3 }
 0x7f3   :  { %v2302_v60 = vadd.f32 %v2296_v31, %v2175_v0  ;;  %v3383_v0 = vld [vmem:[%s4934_s7 + $0x68] sm:$0xff] }
 0x7fa   :  { %v2414_v52 = vpop.f32.mrf.mxu1 }
 0x7fb   :  { %v2426_v38 = vadd.f32 %v2414_v52, %v2299_v47  ;;  %v3417_v52 = vld [vmem:[%s4934_s7 + $0x100] sm:$0xff]  ;;  %v2989_v47 = vld [vmem:[#allocation8 + $0x38] sm:$0xff] }
 0x7fd   :  { %v2434_v24 = vadd.f32 %v3473_v27, %v2426_v38  ;;  %v2986_v38 = vld [vmem:[#allocation8 + $0x20] sm:$0xff] }
 0x7ff   :  { %v4672_v59 = vmax.f32 %v2434_v24, 0.0 }
 0x802   :  { %v2417_v55 = vpop.f32.mrf.mxu1 }
 0x803   :  { %v2427_v14 = vadd.f32 %v2417_v55, %v2300_v11  ;;  %v3411_v11 = vld [vmem:[%s4934_s7 + $0xe8] sm:$0xff] }
 0x805   :  { %v2435_v33 = vadd.f32 %v3473_v27, %v2427_v14  ;;  %v2988_v14 = vld [vmem:[#allocation8 + $0x30] sm:$0xff] }
 0x807   :  { %v4667_v15 = vmax.f32 %v2435_v33, 0.0 }
 0x80a   :  { %v2420_v49 = vpop.f32.mrf.mxu1 }
 0x80b   :  { %v2428_v54 = vadd.f32 %v2420_v49, %v2301_v3  ;;  %v3413_v49 = vld [vmem:[%s4934_s7 + $0xf8] sm:$0xff]  ;;  %v3412_v3 = vld [vmem:[%s4934_s7 + $0xf0] sm:$0xff] }
 0x80d   :  { %v2436_v2 = vadd.f32 %v3473_v27, %v2428_v54 }
 0x80f   :  { %v4662_v12 = vmax.f32 %v2436_v2, 0.0 }
 0x812   :  { %v2423_v16 = vpop.f32.mrf.mxu1 }
 0x813   :  { %v2429_v37 = vadd.f32 %v2423_v16, %v2302_v60  ;;  %v3410_v60 = vld [vmem:[%s4934_s7 + $0xe0] sm:$0xff] }
 0x815   :  { %v2437_v39 = vadd.f32 %v3473_v27, %v2429_v37  ;;  %v2987_v37 = vld [vmem:[#allocation8 + $0x28] sm:$0xff] }
 0x817   :  { %v4660_v44 = vmax.f32 %v2437_v39, 0.0 }
 0x819   :  { %2459 = vmatpush.msra.mxu3 %v4660_v44  ;;  %2564 = vmatpush.msrb.mxu0 %v4660_v44 }
 0x81a   :  { %2618 = vmatpush.msra.mxu2 %v4660_v44 }
 0x81b   :  { %2460 = vmatpush.msra.mxu3 %v4662_v12  ;;  %2565 = vmatpush.msrb.mxu0 %v4662_v12 }
 0x81c   :  { %2619 = vmatpush.msra.mxu2 %v4662_v12 }
 0x81d   :  { %2461 = vmatpush.msra.mxu3 %v4667_v15  ;;  %2566 = vmatpush.msrb.mxu0 %v4667_v15 }
 0x81e   :  { %2620 = vmatpush.msra.mxu2 %v4667_v15 }
 0x81f   :  { %2462 = vmatpush.msra.mxu3 %v4672_v59  ;;  %2567 = vmatpush.msrb.mxu0 %v4672_v59 }
 0x820   :  { %2621 = vmatpush.msra.mxu2 %v4672_v59  ;;  %3364 = vmatmul.msk.f32.vlgmr.msra.gmra.mxu3 %vm2443_vm2, %v2442_v23 }
 0x821   :  { %2488 = vmatpush.msrb.mxu3 %v4660_v44  ;;  %2672 = vmatpush.msra.mxu0 %v4660_v44 }
 0x822   :  { %3374 = vmatmul.msk.f32.vlgmr.msrb.gmra.mxu0 %vm2443_vm2, %v3373_v57 }
 0x823   :  { %2489 = vmatpush.msrb.mxu3 %v4662_v12  ;;  %2673 = vmatpush.msra.mxu0 %v4662_v12 }
 0x825   :  { %2490 = vmatpush.msrb.mxu3 %v4667_v15  ;;  %2674 = vmatpush.msra.mxu0 %v4667_v15 }
 0x827   :  { %2491 = vmatpush.msrb.mxu3 %v4672_v59  ;;  %2675 = vmatpush.msra.mxu0 %v4672_v59 }
 0x828   :  { %3366 = vmatmul.msk.f32.vlgmr.msrb.gmra.mxu3 %vm2443_vm2, %v3365_v50 }
 0x829   :  { %2780 = vmatpush.msrb.mxu0 %v4660_v44  ;;  %2539 = vmatpush.msra.mxu3 %v2470_v35 }
 0x82a   :  { %3388 = vmatmul.msk.f32.vlgmr.msra.gmra.mxu0 %vm2443_vm2, %v3387_v56 }
 0x82b   :  { %2781 = vmatpush.msrb.mxu0 %v4662_v12  ;;  %2540 = vmatpush.msra.mxu3 %v2469_v4 }
 0x82d   :  { %2782 = vmatpush.msrb.mxu0 %v4667_v15  ;;  %2541 = vmatpush.msra.mxu3 %v2468_v53  ;;  %v3474_v53 = vld [vmem:[%s4935_s8] ss:$0 sm:$0xff] }
 0x82f   :  { %2783 = vmatpush.msrb.mxu0 %v4672_v59  ;;  %2542 = vmatpush.msra.mxu3 %v2467_v10 }
 0x831   :  { %2888 = vmatpush.msra.mxu0 %v4660_v44  ;;  %2646 = vmatpush.msrb.mxu3 %v3385_v8  ;;  %v3062_v8 = vld [vmem:[#allocation8 + $0x40] sm:$0xff] }
 0x832   :  { %3402 = vmatmul.msk.f32.vlgmr.msrb.gmra.mxu0 %vm2443_vm2, %v3401_v20  ;;  %v2958_v20 = vld [vmem:[#allocation8 + $0x10] sm:$0xff] }
 0x833   :  { %2889 = vmatpush.msra.mxu0 %v4662_v12  ;;  %2647 = vmatpush.msrb.mxu3 %v3384_v40 }
 0x835   :  { %2890 = vmatpush.msra.mxu0 %v4667_v15  ;;  %2648 = vmatpush.msrb.mxu3 %v3383_v0 }
 0x837   :  { %2891 = vmatpush.msra.mxu0 %v4672_v59  ;;  %2649 = vmatpush.msrb.mxu3 %v3382_v7  ;;  %v3430_v7 = vld [vmem:[%s4936_s9 + $0x6] sm:$0x3] }
 0x839   :  { %3005 = vmatpush.msrb.mxu0 %v2989_v47  ;;  %v3475_v47 = vld [vmem:[%s4938_s11] ss:$0 sm:$0xff]  ;;  %s3618_s11 = smov [#allocation10]  }
 0x83a   :  { %3416 = vmatmul.msk.f32.vlgmr.msra.gmra.mxu0 %vm2443_vm2, %v3415_v36  ;;  %v2957_v36 = vld [vmem:[#allocation8 + $0x8] sm:$0xff] }
 0x83b   :  { %3006 = vmatpush.msrb.mxu0 %v2988_v14 }
 0x83d   :  { %3007 = vmatpush.msrb.mxu0 %v2987_v37 }
 0x83f   :  { %3008 = vmatpush.msrb.mxu0 %v2986_v38 }
 0x89f   :  { %v2569_v26 = vpop.f32.mrf.mxu0 }
 0x8a0   :  { %3379 = vmatmul.msk.f32.vlgmr.msra.gmra.mxu1 %vm2443_vm2, %v2569_v26  ;;  %v3427_v26 = vld [vmem:[%s4936_s9 + $0x4] sm:$0x3] }
 0x8a1   :  { %2808 = vmatpush.msra.mxu1 %v3406_v21  ;;  %v3161_v21 = vld [vmem:[%s4939_s12 + $0x58] sm:$0xff] }
 0x8a3   :  { %v2464_v34 = vpop.f32.mrf.mxu3  ;;  %2809 = vmatpush.msra.mxu1 %v3405_v22  ;;  %v3160_v22 = vld [vmem:[%s4939_s12 + $0x50] sm:$0xff] }
 0x8a4   :  { %3372 = vmatmul.msk.f32.vlgmr.msra.gmra.mxu3 %vm2443_vm2, %v2464_v34  ;;  %v2959_v34 = vld [vmem:[#allocation8 + $0x18] sm:$0xff] }
 0x8a5   :  { %2754 = vmatpush.msra.mxu3 %v3399_v29  ;;  %2810 = vmatpush.msra.mxu1 %v3404_v28  ;;  %v3119_v29 = vld [vmem:[#allocation8 + $0x78] sm:$0xff] }
 0x8a6   :  { %v3159_v28 = vld [vmem:[%s4939_s12 + $0x48] sm:$0xff] }
 0x8a7   :  { %v2677_v42 = vpop.f32.mrf.mxu0  ;;  %2755 = vmatpush.msra.mxu3 %v3398_v5  ;;  %2811 = vmatpush.msra.mxu1 %v3403_v61  ;;  %v3117_v5 = vld [vmem:[#allocation8 + $0x68] sm:$0xff] }
 0x8a8   :  { %3393 = vmatmul.msk.f32.vlgmr.msrb.gmra.mxu1 %vm2443_vm2, %v2677_v42  ;;  %v3116_v42 = vld [vmem:[#allocation8 + $0x60] sm:$0xff]  ;;  %v3157_v61 = vld [vmem:[%s4939_s12 + $0x38] sm:$0xff] }
 0x8a9   :  { %2756 = vmatpush.msra.mxu3 %v3397_v63  ;;  %2916 = vmatpush.msrb.mxu1 %v3420_v6  ;;  %v3164_v63 = vld [vmem:[%s4939_s12 + $0x70] sm:$0xff] }
 0x8ab   :  { %v2493_v9 = vpop.f32.mrf.mxu3  ;;  %2757 = vmatpush.msra.mxu3 %v3396_v18  ;;  %2917 = vmatpush.msrb.mxu1 %v3419_v58  ;;  %v3162_v18 = vld [vmem:[%s4939_s12 + $0x60] sm:$0xff]  ;;  %v3156_v58 = vld [vmem:[%s4939_s12 + $0x30] sm:$0xff] }
 0x8ac   :  { %3371 = vmatmul.msk.f32.vlgmr.msrb.gmra.mxu2 %vm2443_vm2, %v2493_v9  ;;  %v2956_v9 = vld [vmem:[#allocation8] sm:$0xff] }
 0x8ad   :  { %2726 = vmatpush.msrb.mxu2 %v4660_v44  ;;  %2918 = vmatpush.msrb.mxu1 %v3418_v45  ;;  %v3155_v45 = vld [vmem:[%s4939_s12 + $0x28] sm:$0xff] }
 0x8af   :  { %2727 = vmatpush.msrb.mxu2 %v4662_v12  ;;  %v2785_v30 = vpop.f32.mrf.mxu0  ;;  %2919 = vmatpush.msrb.mxu1 %v3417_v52  ;;  %v3154_v52 = vld [vmem:[%s4939_s12 + $0x20] sm:$0xff] }
 0x8b0   :  { %3407 = vmatmul.msk.f32.vlgmr.msra.gmra.mxu1 %vm2443_vm2, %v2785_v30  ;;  %v3158_v30 = vld [vmem:[%s4939_s12 + $0x40] sm:$0xff] }
 0x8b1   :  { %2728 = vmatpush.msrb.mxu2 %v4667_v15  ;;  %3028 = vmatpush.msra.mxu1 %v2959_v34 }
 0x8b3   :  { %2729 = vmatpush.msrb.mxu2 %v4672_v59  ;;  %3029 = vmatpush.msra.mxu1 %v2958_v20 }
 0x8b4   :  { %3381 = vmatmul.msk.f32.vlgmr.msra.gmra.mxu2 %vm2443_vm2, %v3380_v25  ;;  %v3065_v25 = vld [vmem:[#allocation8 + $0x58] sm:$0xff] }
 0x8b5   :  { %2834 = vmatpush.msra.mxu2 %v4660_v44  ;;  %3030 = vmatpush.msra.mxu1 %v2957_v36 }
 0x8b7   :  { %2835 = vmatpush.msra.mxu2 %v4662_v12  ;;  %v2893_v55 = vpop.f32.mrf.mxu0  ;;  %3031 = vmatpush.msra.mxu1 %v2956_v9 }
 0x8b8   :  { %3421 = vmatmul.msk.f32.vlgmr.msrb.gmra.mxu1 %vm2443_vm2, %v2893_v55 }
 0x8b9   :  { %2836 = vmatpush.msra.mxu2 %v4667_v15  ;;  %3135 = vmatpush.msrb.mxu1 %v3119_v29 }
 0x8bb   :  { %2837 = vmatpush.msra.mxu2 %v4672_v59  ;;  %3136 = vmatpush.msrb.mxu1 %v3118_v13 }
 0x8bc   :  { %3395 = vmatmul.msk.f32.vlgmr.msrb.gmra.mxu2 %vm2443_vm2, %v3394_v17  ;;  %v3064_v17 = vld [vmem:[#allocation8 + $0x50] sm:$0xff] }
 0x8bd   :  { %3137 = vmatpush.msrb.mxu1 %v3117_v5 }
 0x8bf   :  { %3138 = vmatpush.msrb.mxu1 %v3116_v42 }
 0x8c4   :  { %3409 = vmatmul.msk.f32.vlgmr.msra.gmra.mxu2 %vm2443_vm2, %v3408_v32  ;;  %v3063_v32 = vld [vmem:[#allocation8 + $0x48] sm:$0xff] }
 0x91d   :  { %v2597_v27 = vpop.f32.mrf.mxu1 }
 0x925   :  { %v2705_v39 = vpop.f32.mrf.mxu1 }
 0x927   :  { %v2544_v2 = vpop.f32.mrf.mxu3 }
 0x92d   :  { %v2813_v15 = vpop.f32.mrf.mxu1 }
 0x92f   :  { %v2521_v48 = vpop.f32.mrf.mxu2 }
 0x930   :  { %v2545_v33 = vadd.f32 %v2544_v2, %v2521_v48  ;;  %v3153_v48 = vld [vmem:[%s4939_s12 + $0x18] sm:$0xff]  ;;  %v3615_v2 = vmov 0  }
 0x931   :  { %3470 = vset.pattern.permute.xlu1 %v3615_v2  ;;  %3471 = vset.pattern.permute.xlu0 %v3615_v2 }
 0x932   :  { %v2600_v24 = vadd.f32 %v2597_v27, %v2545_v33 }
 0x935   :  { %v2921_v35 = vpop.f32.mrf.mxu1 }
 0x937   :  { %v2623_v31 = vpop.f32.mrf.mxu2 }
 0x938   :  { %3386 = vmatmul.msk.f32.vlgmr.msrb.gmra.mxu3 %vm2443_vm2, %v2623_v31  ;;  %v3151_v31 = vld [vmem:[%s4939_s12 + $0x8] sm:$0xff] }
 0x939   :  { %2862 = vmatpush.msrb.mxu3 %v3413_v49  ;;  %v3152_v49 = vld [vmem:[%s4939_s12 + $0x10] sm:$0xff] }
 0x93b   :  { %2863 = vmatpush.msrb.mxu3 %v3412_v3  ;;  %v3150_v3 = vld [vmem:[%s4939_s12] sm:$0xff] }
 0x93d   :  { %2864 = vmatpush.msrb.mxu3 %v3411_v11 }
 0x93f   :  { %v2731_v54 = vpop.f32.mrf.mxu2  ;;  %2865 = vmatpush.msrb.mxu3 %v3410_v60 }
 0x940   :  { %3400 = vmatmul.msk.f32.vlgmr.msra.gmra.mxu3 %vm2443_vm2, %v2731_v54 }
 0x947   :  { %v2839_v16 = vpop.f32.mrf.mxu2 }
 0x948   :  { %3414 = vmatmul.msk.f32.vlgmr.msrb.gmra.mxu3 %vm2443_vm2, %v2839_v16 }
 0x9bb   :  { %v2651_v44 = vpop.f32.mrf.mxu3 }
 0x9bc   :  { %v2654_v12 = vadd.f32 %v2651_v44, %v2600_v24 }
 0x9be   :  { %v2708_v23 = vadd.f32 %v2705_v39, %v2654_v12  ;;  %v3476_v39 = vld [vmem:[%s4940_s13] ss:$0 sm:$0xff]  ;;  %s3222_s13 = sshll.u32 %s3618_s11, 4  ;;  %s3223_s13 = int_to_ptr.vmem [resolvable:$true] %s3222_s13 }
 0x9c3   :  { %v2759_v59 = vpop.f32.mrf.mxu3 }
 0x9c4   :  { %v2762_v57 = vadd.f32 %v2759_v59, %v2708_v23 }
 0x9c6   :  { %v2816_v50 = vadd.f32 %v2813_v15, %v2762_v57  ;;  %v3617_v15 = vmov 6.0  }
 0x9c7   :  { %3477 = vrcp.f32 %v3617_v15 }
 0x9cb   :  { %v2867_v56 = vpop.f32.mrf.mxu3 }
 0x9cc   :  { %v2870_v4 = vadd.f32 %v2867_v56, %v2816_v50 }
 0x9cd   :  { %v3478_v59 = vpop.eup %3477 }
 0x9ce   :  { %v2924_v10 = vadd.f32 %v2921_v35, %v2870_v4  ;;  %v3199_v23 = vmul.f32 6.0, %v3478_v59  ;;  %vm3203_vm5 = vweird.f32 %v3478_v59 }
 0x9d0   :  { %v2929_v51 = vadd.f32 %v3474_v53, %v2924_v10  ;;  %v3200_v57 = vsub.f32 1.0, %v3199_v23 }
 0x9d2   :  { %v2930_v41 = vmax.f32 %v2929_v51, 0.0  ;;  %v3201_v50 = vmul.f32 %v3478_v59, %v3200_v57 }
 0x9d4   :  { %2951 = vmatpush.msrb.mxu2 %v2930_v41  ;;  %2980 = vmatpush.msra.mxu3 %v2930_v41  ;;  %v3202_v56 = vadd.f32 %v3478_v59, %v3201_v50 }
 0x9d5   :  { %3110 = vmatpush.msra.mxu0 %v2930_v41  ;;  %3424 = vmatmul.msk.f32.vlgmr.msra.gmra.mxu3 %vm2932_vm3, %v3423_v62 }
 0x9d6   :  { %3056 = vmatpush.msra.mxu2 %v2930_v41  ;;  %3081 = vmatpush.msrb.mxu3 %v3065_v25  ;;  %v3204_v35 = vsel %vm3203_vm5, %v3478_v59, %v3202_v56 }
 0x9d7   :  { %3422 = vmatmul.msk.f32.vlgmr.msrb.gmra.mxu2 %vm2932_vm3, %v2931_v19 }
 0x9d8   :  { %3082 = vmatpush.msrb.mxu3 %v3064_v17  ;;  %3170 = vmatpush.msrb.mxu2 %v3165_v1 }
 0x9da   :  { %3083 = vmatpush.msrb.mxu3 %v3063_v32  ;;  %3171 = vmatpush.msrb.mxu2 %v3164_v63 }
 0x9dc   :  { %3084 = vmatpush.msrb.mxu3 %v3062_v8  ;;  %3172 = vmatpush.msrb.mxu2 %v3163_v46 }
 0x9de   :  { %3173 = vmatpush.msrb.mxu2 %v3162_v18 }
 0x9df   :  { %3428 = vmatmul.msk.f32.vlgmr.msra.gmra.mxu2 %vm2932_vm3, %v3427_v26 }
 0x9e0   :  { %3174 = vmatpush.msrb.mxu2 %v3161_v21 }
 0x9e2   :  { %3175 = vmatpush.msrb.mxu2 %v3160_v22 }
 0x9e4   :  { %3176 = vmatpush.msrb.mxu2 %v3159_v28 }
 0x9e6   :  { %3177 = vmatpush.msrb.mxu2 %v3158_v30 }
 0x9e8   :  { %3178 = vmatpush.msrb.mxu2 %v3157_v61 }
 0x9ea   :  { %3179 = vmatpush.msrb.mxu2 %v3156_v58 }
 0x9ec   :  { %3180 = vmatpush.msrb.mxu2 %v3155_v45 }
 0x9ee   :  { %3181 = vmatpush.msrb.mxu2 %v3154_v52 }
 0x9f0   :  { %3182 = vmatpush.msrb.mxu2 %v3153_v48 }
 0x9f2   :  { %3183 = vmatpush.msrb.mxu2 %v3152_v49 }
 0x9f4   :  { %3184 = vmatpush.msrb.mxu2 %v3151_v31 }
 0x9f6   :  { %3185 = vmatpush.msrb.mxu2 %v3150_v3 }
 0xa58   :  { %v2982_v40 = vpop.f32.mrf.mxu3 }
 0xa59   :  { %3425 = vmatmul.msk.f32.vlgmr.msrb.gmra.mxu0 %vm2443_vm2, %v2982_v40 }
 0xa5a   :  { %v2953_v0 = vpop.f32.mrf.mxu2 }
 0xa5b   :  { %3426 = vmatmul.msk.f32.vlgmr.msra.gmra.mxu1 %vm2443_vm2, %v2953_v0 }
 0xa61   :  { %3431 = vmatmul.msk.f32.vlgmr.msra.gmra.mxu0 %vm2932_vm3, %v3430_v7 }
 0xa62   :  { %v3058_v43 = vpop.f32.mrf.mxu2 }
 0xa63   :  { %3429 = vmatmul.msk.f32.vlgmr.msrb.gmra.mxu3 %vm2443_vm2, %v3058_v43 }
 0xad6   :  { %v3010_v6 = vpop.f32.mrf.mxu0 }
 0xad8   :  { %v3033_v11 = vpop.f32.mrf.mxu1 }
 0xad9   :  { %v3034_v54 = vadd.f32 %v3033_v11, %v3010_v6 }
 0xade   :  { %v3112_v55 = vpop.f32.mrf.mxu0 }
 0xadf   :  { %3432 = vmatmul.msk.f32.vlgmr.msrb.gmra.mxu1 %vm2443_vm2, %v3112_v55 }
 0xae6   :  { %v3086_v60 = vpop.f32.mrf.mxu3 }
 0xae7   :  { %v3089_v16 = vadd.f32 %v3086_v60, %v3034_v54 }
 0xb5c   :  { %v3140_v27 = vpop.f32.mrf.mxu1 }
 0xb5d   :  { %v3143_v14 = vadd.f32 %v3140_v27, %v3089_v16 }
 0xb5f   :  { %v3148_v37 = vadd.f32 %v3475_v47, %v3143_v14 }
 0xb61   :  { %v3149_v38 = vmax.f32 %v3148_v37, 0.0 }
 0xb63   :  { %3186 = vmatmul.f32.vlgmr.msrb.gmra.mxu2 %v3149_v38 }
 0xbe6   :  { %v3187_v33 = vpop.f32.mrf.mxu2 }
 0xbe7   :  { %v3188_v44 = vadd.f32 %v3476_v39, %v3187_v33 }
 0xbe9   :  { %3208 = vperm.xlu1 %3470, %v3188_v44   ;;  %3191 = vrot.lane.b32.xlu0 %v3188_v44, %s3616_s0 }
 0xc5b   :  { %v3192_v24 = vpop.permute.xlu0 %3191  ;;  %v3209_v51 = vpop.permute.xlu1 %3208 }
 0xc5c   :  { %v3195_v12 = vsel %vm3194_vm4, %v3192_v24, 0.0 }
 0xc5d   :  { %3196 = vadd.xlane.f32.xlu0 %v3195_v12 }
 0xcd0   :  { %v3197_v4 = vpop.xlane.xlu0 %3196 }
 0xcd1   :  { %v3205_v53 = vmul.f32 %v3204_v35, %v3197_v4 }
 0xcd3   :  { %v3206_v10 = vsub.f32 %v3188_v44, %v3205_v53 }
 0xcd5   :  { %v3211_v41 = vadd.f32 %v3209_v51, %v3206_v10 }
 0xcd7   :  { %3213 = vrot.lane.b32.xlu1 %v3211_v41, %s3616_s0 }
 0xd49   :  { %v3214_v62 = vpop.permute.xlu1 %3213 }
 0xd4a   :  { %3216 = vst.msk [vmem:[#allocation10] sm:$0x3] %vm3194_vm4, %v3214_v62 }
 0xd4b   :  { %3227 = dma.vmem_to_hbm [thread:$0]  %s3223_s13, 32, %s3225_s15, [#allocation4]  }
 0xd4c   :  { %3605 = dma.done.wait [#allocation4], 32  }
 0xd4d   :  { %3606 = vsyncadd [#allocation4], 4294967264 }
 0xd4e   :  { %3232 = vsyncpa [#allocation3], 1 }
 0xd4f   :  { %3233 = vsyncpa [#allocation6], 1 }
 0xd50   :  { %3234 = vsyncpa [#allocation9], 1 }
 0xd51   :  { %3235 = vsyncpa [#allocation4], 1 }

</bundles_post_ra>
